<compile_context>
chip_gen: v7x
topology: tpu7x:2x2x1
jax: 0.10.0
libtpu: 0.0.40
codegen_flags: <defaults>
</compile_context>

<pallas_src>
import math

import numpy as np
import jax
import jax.numpy as jnp
from jax.experimental import pallas as pl
from jax.experimental.pallas import tpu as pltpu

# ----------------------- small, forward-consistent config ------------------
HIDDEN = 32                       # config.hidden_size
HEADS = 4                         # config.num_attention_heads
HEAD_DIM = HIDDEN // HEADS        # 8
INTERMEDIATE = 48                 # config.intermediate_size
INNER = int(INTERMEDIATE * 2 / 3)  # SwiGLU inner hidden (= 32)
LAYERS = 2                        # config.num_hidden_layers (small)
EPS = 1e-6                        # config.layer_norm_eps
LS_INIT = 0.1                     # config.initializer_factor
ROPE_THETA = 10000.0              # config.rope_theta
SPATIAL_MERGE = 1                 # config.spatial_merge_size
GRID_SHAPES = [(1, 4, 4)]         # (t, h, w) -> S = 16 tokens

# Padded, lane-dense layout constants.
D_PAD = 128                       # packed hidden dim padded to full lane width
I_PAD = 128                       # SwiGLU inner dim padded to full lane width
HD_PAD = 128                      # per-head slab width (head_dim 8 -> 128 lanes)
QK_SLAB = HEADS * HD_PAD          # 512 : q (or k, or v) in per-head-slab layout
COMPUTE_DTYPE = jnp.bfloat16      # MXU operand dtype (f32 accumulation)

STACKED_ORDER = ("norm1", "qkv_w", "q_norm", "k_norm", "proj_w", "proj_b", "ls1",
                 "norm2", "fc13_w", "fc13_b", "mlp_norm", "fc2_w", "fc2_b", "ls2")


# ------------------------------ kernel helpers ------------------------------
def _rms_norm_pad(x, w, d_real):
    """RMSNorm over a zero-padded lane axis; variance uses the real dim."""
    var = jnp.sum(x * x, axis=-1, keepdims=True) * (1.0 / d_real)
    return (x * jax.lax.rsqrt(var + EPS)) * w


def _one_layer(x, cos, sin_signed, l, refs):
    """One UniViTARVisionEncoderLayer on the VMEM-resident hidden state."""
    (norm1_ref, qkv_w_ref, q_norm_ref, k_norm_ref, proj_w_ref, proj_b_ref,
     ls1_ref, norm2_ref, fc13_w_ref, fc13_b_ref, mlp_norm_ref, fc2_w_ref,
     fc2_b_ref, ls2_ref) = refs
    half = HEAD_DIM // 2

    # ------------------------- attention branch -------------------------
    xn = _rms_norm_pad(x, norm1_ref[l], HIDDEN)
    qkv = jnp.dot(xn.astype(COMPUTE_DTYPE), qkv_w_ref[l],
                  preferred_element_type=jnp.float32)          # (S, 3*QK_SLAB)
    q = qkv[:, :QK_SLAB]                   # per-head slab layout, 128-aligned
    k = qkv[:, QK_SLAB:2 * QK_SLAB]
    v = qkv[:, 2 * QK_SLAB:]

    def rope(t):
        # rotate_half via two XLU lane rolls; signs live in sin_signed, whose
        # zeros on padded lanes also kill any cross-slab roll spillover.
        t_rot = (pltpu.roll(t, shift=half, axis=1)
                 + pltpu.roll(t, shift=QK_SLAB - half, axis=1))
        return t * cos + t_rot * sin_signed

    # qk_normalization: RMSNorm over the full flattened (h d) hidden dim,
    # with the flash-attn softmax_scale folded into q.
    q = _rms_norm_pad(rope(q), q_norm_ref[l], HIDDEN) * (1.0 / math.sqrt(HEAD_DIM))
    k = _rms_norm_pad(rope(k), k_norm_ref[l], HIDDEN)

    qb = q.astype(COMPUTE_DTYPE)           # cast whole slabs once (hoisted)
    kb = k.astype(COMPUTE_DTYPE)
    vb = v.astype(COMPUTE_DTYPE)

    ctx_slabs = []
    for h in range(HEADS):                 # static unroll over 128-lane slabs
        sl = slice(h * HD_PAD, (h + 1) * HD_PAD)
        s = jax.lax.dot_general(qb[:, sl], kb[:, sl], (((1,), (1,)), ((), ())),
                                preferred_element_type=jnp.float32)   # (S, S)
        s = s - jnp.max(s, axis=-1, keepdims=True)
        p = jnp.exp(s)
        p = p * pl.reciprocal(jnp.sum(p, axis=-1, keepdims=True))     # exact
        ctx_slabs.append(jnp.dot(p.astype(COMPUTE_DTYPE), vb[:, sl],
                                 preferred_element_type=jnp.float32))
    # 128-aligned lane concat -> no relayout; single K=512 projection matmul.
    ctx = jnp.concatenate(ctx_slabs, axis=-1)                 # (S, QK_SLAB)
    attn = jnp.dot(ctx.astype(COMPUTE_DTYPE), proj_w_ref[l],
                   preferred_element_type=jnp.float32) + proj_b_ref[l]
    x = x + attn * ls1_ref[l]              # drop_path1 = Identity

    # -------------------------- SwiGLU MLP branch --------------------------
    xn2 = _rms_norm_pad(x, norm2_ref[l], HIDDEN)
    h13 = jnp.dot(xn2.astype(COMPUTE_DTYPE), fc13_w_ref[l],
                  preferred_element_type=jnp.float32) + fc13_b_ref[l]
    h1 = h13[:, :I_PAD]                    # fc1 output (128-aligned slice)
    h3 = h13[:, I_PAD:]                    # fc3 output
    h1 = h1 * jax.nn.sigmoid(h1)           # SiLU
    hm = _rms_norm_pad(h1 * h3, mlp_norm_ref[l], INNER)
    mlp = jnp.dot(hm.astype(COMPUTE_DTYPE), fc2_w_ref[l],
                  preferred_element_type=jnp.float32) + fc2_b_ref[l]
    return x + mlp * ls2_ref[l]            # drop_path2 = Identity


def encoder_stack_kernel(x_ref, cos_ref, sin_ref,
                         norm1_ref, qkv_w_ref, q_norm_ref, k_norm_ref,
                         proj_w_ref, proj_b_ref, ls1_ref,
                         norm2_ref, fc13_w_ref, fc13_b_ref,
                         mlp_norm_ref, fc2_w_ref, fc2_b_ref, ls2_ref,
                         out_ref):
    """Whole encoder stack in one grid step; layers statically unrolled."""
    refs = (norm1_ref, qkv_w_ref, q_norm_ref, k_norm_ref, proj_w_ref,
            proj_b_ref, ls1_ref, norm2_ref, fc13_w_ref, fc13_b_ref,
            mlp_norm_ref, fc2_w_ref, fc2_b_ref, ls2_ref)
    x = x_ref[...]                          # (S, D_PAD) f32, padded lanes 0
    cos = cos_ref[...]                      # (S, QK_SLAB) f32
    sin_signed = sin_ref[...]               # (S, QK_SLAB) f32, sign-folded
    for l in range(LAYERS):                 # small static unroll (LAYERS=2)
        x = _one_layer(x, cos, sin_signed, l, refs)
    out_ref[...] = x                        # single HBM writeback


# ------------------------------- host wrapper -------------------------------
def _cost_estimate(S, args):
    ml = 2 * S * D_PAD * 3 * QK_SLAB                       # qkv matmul
    ml += HEADS * (4 * S * S * HD_PAD)                     # per-head attn
    ml += 2 * S * QK_SLAB * D_PAD                          # merged proj
    ml += 2 * S * D_PAD * 2 * I_PAD + 2 * S * I_PAD * D_PAD  # fc13 + fc2
    trans = HEADS * S * S + S * I_PAD + 8 * S
    bytes_accessed = sum(int(np.prod(a.shape)) * a.dtype.itemsize for a in args)
    bytes_accessed += S * D_PAD * 4
    return pl.CostEstimate(flops=int(LAYERS * ml),
                           transcendentals=int(LAYERS * trans),
                           bytes_accessed=int(bytes_accessed))


@jax.jit
def univitar_encoder_forward(inputs_embeds, stacked, cos_slab, sin_slab):
    """inputs_embeds: (1, S, D). Returns last_hidden_state of the same shape."""
    B, S, D = inputs_embeds.shape
    x = inputs_embeds.reshape(S, D)
    x_pad = jnp.zeros((S, D_PAD), jnp.float32).at[:, :D].set(x)

    params = [stacked[k] for k in STACKED_ORDER]
    args = (x_pad, cos_slab, sin_slab, *params)

    def full_spec(a):                       # whole array resident in VMEM
        nd = a.ndim
        return pl.BlockSpec(a.shape, lambda i, nd=nd: (0,) * nd)

    out_pad = pl.pallas_call(
        encoder_stack_kernel,
        out_shape=jax.ShapeDtypeStruct((S, D_PAD), jnp.float32),
        grid=(1,),
        in_specs=[full_spec(a) for a in args],
        out_specs=pl.BlockSpec((S, D_PAD), lambda i: (0, 0)),
        compiler_params=pltpu.CompilerParams(
            dimension_semantics=("arbitrary",),
            vmem_limit_bytes=32 * 1024 * 1024),
        cost_estimate=_cost_estimate(S, args),
    )(*args)
    return out_pad[:, :D].reshape(B, S, D)


# -------------------- RoPE2D table (VisionRotaryEmbedding2D) -----------------
def compute_rotary_cos_sin(grid_shapes, head_dim, theta, s):
    dim = head_dim // 2
    inv_freq = 1.0 / theta ** (np.arange(0, dim, 2, dtype=np.float32) / dim)
    pos_list = []
    for t, h, w in grid_shapes:
        hpos = np.broadcast_to(np.arange(h)[:, None], (h, w))
        hpos = hpos.reshape(h // s, s, w // s, s).transpose(0, 2, 1, 3).reshape(-1)
        wpos = np.broadcast_to(np.arange(w)[None, :], (h, w))
        wpos = wpos.reshape(h // s, s, w // s, s).transpose(0, 2, 1, 3).reshape(-1)
        ids = np.stack([hpos, wpos], axis=-1)
        pos_list.append(np.tile(ids, (t, 1)))
    pos_ids = np.concatenate(pos_list, axis=0)                     # (S, 2)
    max_grid = int(np.max(np.asarray(grid_shapes)))
    freqs_full = np.outer(np.arange(max_grid, dtype=np.float32), inv_freq)
    freqs = freqs_full[pos_ids].reshape(pos_ids.shape[0], -1)      # (S, head_dim//2)
    cos = np.concatenate([np.cos(freqs), np.cos(freqs)], axis=-1)  # repeat(.., 2)
    sin = np.concatenate([np.sin(freqs), np.sin(freqs)], axis=-1)  # (S, head_dim)
    return cos.astype(np.float32), sin.astype(np.float32)


def build_rope_tables(cos_head, sin_head):
    """cos/sin (S, head_dim) -> per-head-slab layout (S, QK_SLAB).

    The rotate_half sign is folded into the sin table (first head_dim//2 lanes
    of each head negated); padded lanes are zero, which also masks any
    cross-slab spillover from the in-kernel lane rolls.
    """
    S = cos_head.shape[0]
    half = HEAD_DIM // 2
    sin_signed = np.concatenate([-sin_head[:, :half], sin_head[:, half:]], axis=-1)
    cos_slab = np.zeros((S, QK_SLAB), np.float32)
    sin_slab = np.zeros((S, QK_SLAB), np.float32)
    for h in range(HEADS):
        cos_slab[:, h * HD_PAD:h * HD_PAD + HEAD_DIM] = cos_head
        sin_slab[:, h * HD_PAD:h * HD_PAD + HEAD_DIM] = sin_signed
    return jnp.asarray(cos_slab), jnp.asarray(sin_slab)


# --------------------------- deterministic params ----------------------------
def init_layer_params(key):
    D, inner = HIDDEN, INNER
    ks = jax.random.split(key, 9)
    rnd = lambda k, shape: (0.02 * jax.random.normal(k, shape)).astype(jnp.float32)
    return dict(
        qkv_w=rnd(ks[0], (D, 3 * D)),                 # qkv_bias=False
        q_norm_w=jnp.ones((1, D), jnp.float32),
        k_norm_w=jnp.ones((1, D), jnp.float32),
        proj_w=rnd(ks[1], (D, D)),
        proj_b=rnd(ks[2], (1, D)),
        norm1_w=jnp.ones((1, D), jnp.float32),
        norm2_w=jnp.ones((1, D), jnp.float32),
        ls1=jnp.full((1, D), LS_INIT, jnp.float32),
        ls2=jnp.full((1, D), LS_INIT, jnp.float32),
        fc1_w=rnd(ks[3], (D, inner)),
        fc1_b=rnd(ks[4], (1, inner)),
        fc2_w=rnd(ks[5], (inner, D)),
        fc2_b=rnd(ks[6], (1, D)),
        fc3_w=rnd(ks[7], (D, inner)),
        fc3_b=rnd(ks[8], (1, inner)),
        mlp_norm_w=jnp.ones((1, inner), jnp.float32),
    )


def pack_params(layer_params):
    """Pad to the lane-dense / per-head-slab layout and stack on a layer axis."""
    D, I, hd = HIDDEN, INNER, HEAD_DIM

    def zpad(a, shape):
        a = np.asarray(a, np.float32)
        out = np.zeros(shape, np.float32)
        out[tuple(slice(0, n) for n in a.shape)] = a
        return out

    def to_slab_vec(w):                       # (1, D) -> (1, QK_SLAB)
        w = np.asarray(w, np.float32).reshape(-1)
        out = np.zeros((1, QK_SLAB), np.float32)
        for h in range(HEADS):
            out[0, h * HD_PAD:h * HD_PAD + hd] = w[h * hd:(h + 1) * hd]
        return out

    def pad_qkv(w):                           # (D, 3D) -> (D_PAD, 3*QK_SLAB)
        w = np.asarray(w, np.float32)
        out = np.zeros((D_PAD, 3 * QK_SLAB), np.float32)
        for part in range(3):
            for h in range(HEADS):
                src = w[:, part * D + h * hd: part * D + (h + 1) * hd]
                dst = part * QK_SLAB + h * HD_PAD
                out[:D, dst:dst + hd] = src
        return out

    def pad_proj(w):                          # (D, D) -> (QK_SLAB, D_PAD)
        w = np.asarray(w, np.float32)
        out = np.zeros((QK_SLAB, D_PAD), np.float32)
        for h in range(HEADS):
            out[h * HD_PAD:h * HD_PAD + hd, :D] = w[h * hd:(h + 1) * hd, :]
        return out

    def pad_fc13(w1, b1, w3, b3):             # fuse fc1 / fc3 into one wide matmul
        w = np.zeros((D_PAD, 2 * I_PAD), np.float32)
        w[:D, :I] = np.asarray(w1, np.float32)
        w[:D, I_PAD:I_PAD + I] = np.asarray(w3, np.float32)
        b = np.zeros((1, 2 * I_PAD), np.float32)
        b[0, :I] = np.asarray(b1, np.float32).reshape(-1)
        b[0, I_PAD:I_PAD + I] = np.asarray(b3, np.float32).reshape(-1)
        return w, b

    cols = {k: [] for k in STACKED_ORDER}
    for p in layer_params:
        cols["norm1"].append(zpad(p["norm1_w"], (1, D_PAD)))
        cols["qkv_w"].append(pad_qkv(p["qkv_w"]))
        cols["q_norm"].append(to_slab_vec(p["q_norm_w"]))
        cols["k_norm"].append(to_slab_vec(p["k_norm_w"]))
        cols["proj_w"].append(pad_proj(p["proj_w"]))
        cols["proj_b"].append(zpad(p["proj_b"], (1, D_PAD)))
        cols["ls1"].append(zpad(p["ls1"], (1, D_PAD)))
        cols["norm2"].append(zpad(p["norm2_w"], (1, D_PAD)))
        w13, b13 = pad_fc13(p["fc1_w"], p["fc1_b"], p["fc3_w"], p["fc3_b"])
        cols["fc13_w"].append(w13)
        cols["fc13_b"].append(b13)
        cols["mlp_norm"].append(zpad(p["mlp_norm_w"], (1, I_PAD)))
        cols["fc2_w"].append(zpad(p["fc2_w"], (I_PAD, D_PAD)))
        cols["fc2_b"].append(zpad(p["fc2_b"], (1, D_PAD)))
        cols["ls2"].append(zpad(p["ls2"], (1, D_PAD)))

    weight_keys = {"qkv_w", "proj_w", "fc13_w", "fc2_w"}
    return {k: jnp.asarray(np.stack(v, 0),
                           COMPUTE_DTYPE if k in weight_keys else jnp.float32)
            for k, v in cols.items()}


# --------------------- pure-JAX fp32 reference (real sizes) ------------------
def _rms_norm_ref(x, w):
    var = jnp.mean(jnp.square(x), axis=-1, keepdims=True)
    return w * (x * jax.lax.rsqrt(var + EPS))


def reference_layer(x, cos, sin, p):
    """Direct (unpadded, per-head) formulation of UniViTARVisionEncoderLayer."""
    S, D = x.shape
    H, hd = HEADS, HEAD_DIM
    xn = _rms_norm_ref(x, p["norm1_w"])
    qkv = xn @ p["qkv_w"]
    q, k, v = qkv[:, :D], qkv[:, D:2 * D], qkv[:, 2 * D:]

    def rope(t):
        th = t.reshape(S, H, hd)
        rot = jnp.concatenate([-th[..., hd // 2:], th[..., :hd // 2]], axis=-1)
        return (th * cos[:, None, :] + rot * sin[:, None, :]).reshape(S, D)

    q = _rms_norm_ref(rope(q), p["q_norm_w"])
    k = _rms_norm_ref(rope(k), p["k_norm_w"])
    qh = q.reshape(S, H, hd).transpose(1, 0, 2)
    kh = k.reshape(S, H, hd).transpose(1, 0, 2)
    vh = v.reshape(S, H, hd).transpose(1, 0, 2)
    scores = jnp.einsum("hqd,hkd->hqk", qh, kh) / math.sqrt(hd)
    probs = jax.nn.softmax(scores, axis=-1)
    ctx = jnp.einsum("hqk,hkd->hqd", probs, vh).transpose(1, 0, 2).reshape(S, D)
    x = x + (ctx @ p["proj_w"] + p["proj_b"]) * p["ls1"]

    xn2 = _rms_norm_ref(x, p["norm2_w"])
    h1 = xn2 @ p["fc1_w"] + p["fc1_b"]
    h1 = h1 * jax.nn.sigmoid(h1)
    h3 = xn2 @ p["fc3_w"] + p["fc3_b"]
    hm = _rms_norm_ref(h1 * h3, p["mlp_norm_w"])
    return x + (hm @ p["fc2_w"] + p["fc2_b"]) * p["ls2"]


# ------------------------------------ main ------------------------------------
if __name__ == "__main__":
    key = jax.random.PRNGKey(0)
    k_in, k_p = jax.random.split(key)

    S = sum(t * h * w for t, h, w in GRID_SHAPES)          # 16 tokens
    inputs_embeds = jax.random.normal(k_in, (1, S, HIDDEN), jnp.float32)

    layer_keys = jax.random.split(k_p, LAYERS)
    layer_params = [init_layer_params(k) for k in layer_keys]

    cos_head, sin_head = compute_rotary_cos_sin(GRID_SHAPES, HEAD_DIM,
                                                ROPE_THETA, SPATIAL_MERGE)
    cos_slab, sin_slab = build_rope_tables(cos_head, sin_head)
    stacked = pack_params(layer_params)

    out = univitar_encoder_forward(inputs_embeds, stacked, cos_slab, sin_slab)
    out = jax.block_until_ready(out)

    # plain-JAX fp32 reference (independent, unpadded formulation)
    ref = inputs_embeds[0]
    for p in layer_params:
        ref = reference_layer(ref, cos_head, sin_head, p)
    ref = np.asarray(jax.block_until_ready(ref))[None]

    # kernel uses bf16 MXU operands (f32 accumulation) -> small tolerance
    np.testing.assert_allclose(np.asarray(out), ref, rtol=2e-2, atol=2e-2)
    print("KERNEL_OK")
</pallas_src>

<mosaic_0001>
module attributes {stable_mosaic.version = 11 : i64} {
  func.func @encoder_stack_kernel(%arg0: i32, %arg1: memref<16x128xf32, #tpu.memory_space<vmem>>, %arg2: memref<16x512xf32, #tpu.memory_space<vmem>>, %arg3: memref<16x512xf32, #tpu.memory_space<vmem>>, %arg4: memref<2x1x128xf32, #tpu.memory_space<vmem>>, %arg5: memref<2x128x1536xbf16, #tpu.memory_space<vmem>>, %arg6: memref<2x1x512xf32, #tpu.memory_space<vmem>>, %arg7: memref<2x1x512xf32, #tpu.memory_space<vmem>>, %arg8: memref<2x512x128xbf16, #tpu.memory_space<vmem>>, %arg9: memref<2x1x128xf32, #tpu.memory_space<vmem>>, %arg10: memref<2x1x128xf32, #tpu.memory_space<vmem>>, %arg11: memref<2x1x128xf32, #tpu.memory_space<vmem>>, %arg12: memref<2x128x256xbf16, #tpu.memory_space<vmem>>, %arg13: memref<2x1x256xf32, #tpu.memory_space<vmem>>, %arg14: memref<2x1x128xf32, #tpu.memory_space<vmem>>, %arg15: memref<2x128x128xbf16, #tpu.memory_space<vmem>>, %arg16: memref<2x1x128xf32, #tpu.memory_space<vmem>>, %arg17: memref<2x1x128xf32, #tpu.memory_space<vmem>>, %arg18: memref<16x128xf32, #tpu.memory_space<vmem>>) attributes {dimension_semantics = [#tpu.dimension_semantics<arbitrary>], iteration_bounds = array<i64: 1>, scalar_prefetch = 0 : i64, scratch_operands = 0 : i64, tpu.core_type = #tpu.core_type<tc>, window_params = [{pipeline_mode = #tpu.pipeline_mode<synchronous>, transform_indices = @transform_0, window_bounds = array<i64: 16, 128>}, {pipeline_mode = #tpu.pipeline_mode<synchronous>, transform_indices = @transform_1, window_bounds = array<i64: 16, 512>}, {pipeline_mode = #tpu.pipeline_mode<synchronous>, transform_indices = @transform_2, window_bounds = array<i64: 16, 512>}, {pipeline_mode = #tpu.pipeline_mode<synchronous>, transform_indices = @transform_3, window_bounds = array<i64: 2, 1, 128>}, {pipeline_mode = #tpu.pipeline_mode<synchronous>, transform_indices = @transform_4, window_bounds = array<i64: 2, 128, 1536>}, {pipeline_mode = #tpu.pipeline_mode<synchronous>, transform_indices = @transform_5, window_bounds = array<i64: 2, 1, 512>}, {pipeline_mode = #tpu.pipeline_mode<synchronous>, transform_indices = @transform_6, window_bounds = array<i64: 2, 1, 512>}, {pipeline_mode = #tpu.pipeline_mode<synchronous>, transform_indices = @transform_7, window_bounds = array<i64: 2, 512, 128>}, {pipeline_mode = #tpu.pipeline_mode<synchronous>, transform_indices = @transform_8, window_bounds = array<i64: 2, 1, 128>}, {pipeline_mode = #tpu.pipeline_mode<synchronous>, transform_indices = @transform_9, window_bounds = array<i64: 2, 1, 128>}, {pipeline_mode = #tpu.pipeline_mode<synchronous>, transform_indices = @transform_10, window_bounds = array<i64: 2, 1, 128>}, {pipeline_mode = #tpu.pipeline_mode<synchronous>, transform_indices = @transform_11, window_bounds = array<i64: 2, 128, 256>}, {pipeline_mode = #tpu.pipeline_mode<synchronous>, transform_indices = @transform_12, window_bounds = array<i64: 2, 1, 256>}, {pipeline_mode = #tpu.pipeline_mode<synchronous>, transform_indices = @transform_13, window_bounds = array<i64: 2, 1, 128>}, {pipeline_mode = #tpu.pipeline_mode<synchronous>, transform_indices = @transform_14, window_bounds = array<i64: 2, 128, 128>}, {pipeline_mode = #tpu.pipeline_mode<synchronous>, transform_indices = @transform_15, window_bounds = array<i64: 2, 1, 128>}, {pipeline_mode = #tpu.pipeline_mode<synchronous>, transform_indices = @transform_16, window_bounds = array<i64: 2, 1, 128>}, {pipeline_mode = #tpu.pipeline_mode<synchronous>, transform_indices = @transform_17, window_bounds = array<i64: 16, 128>}]} {
    %c0 = arith.constant 0 : index
    %c0_0 = arith.constant 0 : index
    %0 = vector.load %arg1[%c0, %c0_0] : memref<16x128xf32, #tpu.memory_space<vmem>>, vector<16x128xf32>
    %c0_1 = arith.constant 0 : index
    %c0_2 = arith.constant 0 : index
    %1 = vector.load %arg2[%c0_1, %c0_2] : memref<16x512xf32, #tpu.memory_space<vmem>>, vector<16x512xf32>
    %c0_3 = arith.constant 0 : index
    %c0_4 = arith.constant 0 : index
    %2 = vector.load %arg3[%c0_3, %c0_4] : memref<16x512xf32, #tpu.memory_space<vmem>>, vector<16x512xf32>
    %c0_5 = arith.constant 0 : index
    %c0_6 = arith.constant 0 : index
    %c0_7 = arith.constant 0 : index
    %3 = vector.load %arg4[%c0_5, %c0_6, %c0_7] : memref<2x1x128xf32, #tpu.memory_space<vmem>>, vector<1x1x128xf32>
    %4 = vector.shape_cast %3 : vector<1x1x128xf32> to vector<1x128xf32>
    %5 = arith.mulf %0, %0 : vector<16x128xf32>
    %cst = arith.constant dense<0.000000e+00> : vector<16xf32>
    %6 = vector.multi_reduction <add>, %5, %cst [1] : vector<16x128xf32> to vector<16xf32>
    %7 = vector.shape_cast %6 : vector<16xf32> to vector<16x1xf32>
    %cst_8 = arith.constant 3.125000e-02 : f32
    %8 = vector.broadcast %cst_8 : f32 to vector<16x1xf32>
    %9 = arith.mulf %7, %8 : vector<16x1xf32>
    %cst_9 = arith.constant 9.99999997E-7 : f32
    %10 = vector.broadcast %cst_9 : f32 to vector<16x1xf32>
    %11 = arith.addf %9, %10 : vector<16x1xf32>
    %12 = math.rsqrt %11 : vector<16x1xf32>
    %13 = vector.broadcast %12 : vector<16x1xf32> to vector<16x128xf32>
    %14 = arith.mulf %0, %13 : vector<16x128xf32>
    %15 = vector.broadcast %4 : vector<1x128xf32> to vector<16x128xf32>
    %16 = arith.mulf %14, %15 : vector<16x128xf32>
    %17 = arith.truncf %16 : vector<16x128xf32> to vector<16x128xbf16>
    %c0_10 = arith.constant 0 : index
    %c0_11 = arith.constant 0 : index
    %c0_12 = arith.constant 0 : index
    %18 = vector.load %arg5[%c0_10, %c0_11, %c0_12] : memref<2x128x1536xbf16, #tpu.memory_space<vmem>>, vector<1x128x1536xbf16>
    %19 = vector.shape_cast %18 : vector<1x128x1536xbf16> to vector<128x1536xbf16>
    %cst_13 = arith.constant dense<0.000000e+00> : vector<16x1536xf32>
    %20 = tpu.matmul %17, %19, %cst_13 {dimension_numbers = #tpu.dot_dimension_numbers<[1], [0], [0], [1], [0, 0, 1, 1], [], []>} : vector<16x128xbf16>, vector<128x1536xbf16>, vector<16x1536xf32> -> vector<16x1536xf32>
    %21 = vector.extract_strided_slice %20 {offsets = [0, 0], sizes = [16, 512], strides = [1, 1]} : vector<16x1536xf32> to vector<16x512xf32>
    %22 = vector.extract_strided_slice %20 {offsets = [0, 512], sizes = [16, 512], strides = [1, 1]} : vector<16x1536xf32> to vector<16x512xf32>
    %23 = vector.extract_strided_slice %20 {offsets = [0, 1024], sizes = [16, 512], strides = [1, 1]} : vector<16x1536xf32> to vector<16x512xf32>
    %c4_i32 = arith.constant 4 : i32
    %24 = tpu.dynamic_rotate %21 by %c4_i32 dim 1 : vector<16x512xf32>, i32 -> vector<16x512xf32>
    %c508_i32 = arith.constant 508 : i32
    %25 = tpu.dynamic_rotate %21 by %c508_i32 dim 1 : vector<16x512xf32>, i32 -> vector<16x512xf32>
    %26 = arith.addf %24, %25 : vector<16x512xf32>
    %27 = arith.mulf %21, %1 : vector<16x512xf32>
    %28 = arith.mulf %26, %2 : vector<16x512xf32>
    %29 = arith.addf %27, %28 : vector<16x512xf32>
    %c0_14 = arith.constant 0 : index
    %c0_15 = arith.constant 0 : index
    %c0_16 = arith.constant 0 : index
    %30 = vector.load %arg6[%c0_14, %c0_15, %c0_16] : memref<2x1x512xf32, #tpu.memory_space<vmem>>, vector<1x1x512xf32>
    %31 = vector.shape_cast %30 : vector<1x1x512xf32> to vector<1x512xf32>
    %32 = arith.mulf %29, %29 : vector<16x512xf32>
    %cst_17 = arith.constant dense<0.000000e+00> : vector<16xf32>
    %33 = vector.multi_reduction <add>, %32, %cst_17 [1] : vector<16x512xf32> to vector<16xf32>
    %34 = vector.shape_cast %33 : vector<16xf32> to vector<16x1xf32>
    %cst_18 = arith.constant 3.125000e-02 : f32
    %35 = vector.broadcast %cst_18 : f32 to vector<16x1xf32>
    %36 = arith.mulf %34, %35 : vector<16x1xf32>
    %cst_19 = arith.constant 9.99999997E-7 : f32
    %37 = vector.broadcast %cst_19 : f32 to vector<16x1xf32>
    %38 = arith.addf %36, %37 : vector<16x1xf32>
    %39 = math.rsqrt %38 : vector<16x1xf32>
    %40 = vector.broadcast %39 : vector<16x1xf32> to vector<16x512xf32>
    %41 = arith.mulf %29, %40 : vector<16x512xf32>
    %42 = vector.broadcast %31 : vector<1x512xf32> to vector<16x512xf32>
    %43 = arith.mulf %41, %42 : vector<16x512xf32>
    %cst_20 = arith.constant 0.353553385 : f32
    %44 = vector.broadcast %cst_20 : f32 to vector<16x512xf32>
    %45 = arith.mulf %43, %44 : vector<16x512xf32>
    %c4_i32_21 = arith.constant 4 : i32
    %46 = tpu.dynamic_rotate %22 by %c4_i32_21 dim 1 : vector<16x512xf32>, i32 -> vector<16x512xf32>
    %c508_i32_22 = arith.constant 508 : i32
    %47 = tpu.dynamic_rotate %22 by %c508_i32_22 dim 1 : vector<16x512xf32>, i32 -> vector<16x512xf32>
    %48 = arith.addf %46, %47 : vector<16x512xf32>
    %49 = arith.mulf %22, %1 : vector<16x512xf32>
    %50 = arith.mulf %48, %2 : vector<16x512xf32>
    %51 = arith.addf %49, %50 : vector<16x512xf32>
    %c0_23 = arith.constant 0 : index
    %c0_24 = arith.constant 0 : index
    %c0_25 = arith.constant 0 : index
    %52 = vector.load %arg7[%c0_23, %c0_24, %c0_25] : memref<2x1x512xf32, #tpu.memory_space<vmem>>, vector<1x1x512xf32>
    %53 = vector.shape_cast %52 : vector<1x1x512xf32> to vector<1x512xf32>
    %54 = arith.mulf %51, %51 : vector<16x512xf32>
    %cst_26 = arith.constant dense<0.000000e+00> : vector<16xf32>
    %55 = vector.multi_reduction <add>, %54, %cst_26 [1] : vector<16x512xf32> to vector<16xf32>
    %56 = vector.shape_cast %55 : vector<16xf32> to vector<16x1xf32>
    %cst_27 = arith.constant 3.125000e-02 : f32
    %57 = vector.broadcast %cst_27 : f32 to vector<16x1xf32>
    %58 = arith.mulf %56, %57 : vector<16x1xf32>
    %cst_28 = arith.constant 9.99999997E-7 : f32
    %59 = vector.broadcast %cst_28 : f32 to vector<16x1xf32>
    %60 = arith.addf %58, %59 : vector<16x1xf32>
    %61 = math.rsqrt %60 : vector<16x1xf32>
    %62 = vector.broadcast %61 : vector<16x1xf32> to vector<16x512xf32>
    %63 = arith.mulf %51, %62 : vector<16x512xf32>
    %64 = vector.broadcast %53 : vector<1x512xf32> to vector<16x512xf32>
    %65 = arith.mulf %63, %64 : vector<16x512xf32>
    %66 = arith.truncf %45 : vector<16x512xf32> to vector<16x512xbf16>
    %67 = arith.truncf %65 : vector<16x512xf32> to vector<16x512xbf16>
    %68 = arith.truncf %23 : vector<16x512xf32> to vector<16x512xbf16>
    %69 = vector.extract_strided_slice %66 {offsets = [0, 0], sizes = [16, 128], strides = [1, 1]} : vector<16x512xbf16> to vector<16x128xbf16>
    %70 = vector.extract_strided_slice %67 {offsets = [0, 0], sizes = [16, 128], strides = [1, 1]} : vector<16x512xbf16> to vector<16x128xbf16>
    %cst_29 = arith.constant dense<0.000000e+00> : vector<16x16xf32>
    %71 = tpu.matmul %69, %70, %cst_29 {dimension_numbers = #tpu.dot_dimension_numbers<[1], [1], [0], [0], [0, 0, 1, 0], [], []>} : vector<16x128xbf16>, vector<16x128xbf16>, vector<16x16xf32> -> vector<16x16xf32>
    %cst_30 = arith.constant dense<0xFF800000> : vector<16xf32>
    %72 = vector.multi_reduction <maximumf>, %71, %cst_30 [1] : vector<16x16xf32> to vector<16xf32>
    %73 = vector.shape_cast %72 : vector<16xf32> to vector<16x1xf32>
    %74 = vector.broadcast %73 : vector<16x1xf32> to vector<16x16xf32>
    %75 = arith.subf %71, %74 : vector<16x16xf32>
    %76 = math.exp %75 : vector<16x16xf32>
    %cst_31 = arith.constant dense<0.000000e+00> : vector<16xf32>
    %77 = vector.multi_reduction <add>, %76, %cst_31 [1] : vector<16x16xf32> to vector<16xf32>
    %78 = vector.shape_cast %77 : vector<16xf32> to vector<16x1xf32>
    %79 = tpu.reciprocal %78 : vector<16x1xf32> -> vector<16x1xf32>
    %80 = vector.broadcast %79 : vector<16x1xf32> to vector<16x16xf32>
    %81 = arith.mulf %76, %80 : vector<16x16xf32>
    %82 = arith.truncf %81 : vector<16x16xf32> to vector<16x16xbf16>
    %83 = vector.extract_strided_slice %68 {offsets = [0, 0], sizes = [16, 128], strides = [1, 1]} : vector<16x512xbf16> to vector<16x128xbf16>
    %cst_32 = arith.constant dense<0.000000e+00> : vector<16x128xf32>
    %84 = tpu.matmul %82, %83, %cst_32 {dimension_numbers = #tpu.dot_dimension_numbers<[1], [0], [0], [1], [0, 0, 1, 1], [], []>} : vector<16x16xbf16>, vector<16x128xbf16>, vector<16x128xf32> -> vector<16x128xf32>
    %85 = vector.extract_strided_slice %66 {offsets = [0, 128], sizes = [16, 128], strides = [1, 1]} : vector<16x512xbf16> to vector<16x128xbf16>
    %86 = vector.extract_strided_slice %67 {offsets = [0, 128], sizes = [16, 128], strides = [1, 1]} : vector<16x512xbf16> to vector<16x128xbf16>
    %cst_33 = arith.constant dense<0.000000e+00> : vector<16x16xf32>
    %87 = tpu.matmul %85, %86, %cst_33 {dimension_numbers = #tpu.dot_dimension_numbers<[1], [1], [0], [0], [0, 0, 1, 0], [], []>} : vector<16x128xbf16>, vector<16x128xbf16>, vector<16x16xf32> -> vector<16x16xf32>
    %cst_34 = arith.constant dense<0xFF800000> : vector<16xf32>
    %88 = vector.multi_reduction <maximumf>, %87, %cst_34 [1] : vector<16x16xf32> to vector<16xf32>
    %89 = vector.shape_cast %88 : vector<16xf32> to vector<16x1xf32>
    %90 = vector.broadcast %89 : vector<16x1xf32> to vector<16x16xf32>
    %91 = arith.subf %87, %90 : vector<16x16xf32>
    %92 = math.exp %91 : vector<16x16xf32>
    %cst_35 = arith.constant dense<0.000000e+00> : vector<16xf32>
    %93 = vector.multi_reduction <add>, %92, %cst_35 [1] : vector<16x16xf32> to vector<16xf32>
    %94 = vector.shape_cast %93 : vector<16xf32> to vector<16x1xf32>
    %95 = tpu.reciprocal %94 : vector<16x1xf32> -> vector<16x1xf32>
    %96 = vector.broadcast %95 : vector<16x1xf32> to vector<16x16xf32>
    %97 = arith.mulf %92, %96 : vector<16x16xf32>
    %98 = arith.truncf %97 : vector<16x16xf32> to vector<16x16xbf16>
    %99 = vector.extract_strided_slice %68 {offsets = [0, 128], sizes = [16, 128], strides = [1, 1]} : vector<16x512xbf16> to vector<16x128xbf16>
    %cst_36 = arith.constant dense<0.000000e+00> : vector<16x128xf32>
    %100 = tpu.matmul %98, %99, %cst_36 {dimension_numbers = #tpu.dot_dimension_numbers<[1], [0], [0], [1], [0, 0, 1, 1], [], []>} : vector<16x16xbf16>, vector<16x128xbf16>, vector<16x128xf32> -> vector<16x128xf32>
    %101 = vector.extract_strided_slice %66 {offsets = [0, 256], sizes = [16, 128], strides = [1, 1]} : vector<16x512xbf16> to vector<16x128xbf16>
    %102 = vector.extract_strided_slice %67 {offsets = [0, 256], sizes = [16, 128], strides = [1, 1]} : vector<16x512xbf16> to vector<16x128xbf16>
    %cst_37 = arith.constant dense<0.000000e+00> : vector<16x16xf32>
    %103 = tpu.matmul %101, %102, %cst_37 {dimension_numbers = #tpu.dot_dimension_numbers<[1], [1], [0], [0], [0, 0, 1, 0], [], []>} : vector<16x128xbf16>, vector<16x128xbf16>, vector<16x16xf32> -> vector<16x16xf32>
    %cst_38 = arith.constant dense<0xFF800000> : vector<16xf32>
    %104 = vector.multi_reduction <maximumf>, %103, %cst_38 [1] : vector<16x16xf32> to vector<16xf32>
    %105 = vector.shape_cast %104 : vector<16xf32> to vector<16x1xf32>
    %106 = vector.broadcast %105 : vector<16x1xf32> to vector<16x16xf32>
    %107 = arith.subf %103, %106 : vector<16x16xf32>
    %108 = math.exp %107 : vector<16x16xf32>
    %cst_39 = arith.constant dense<0.000000e+00> : vector<16xf32>
    %109 = vector.multi_reduction <add>, %108, %cst_39 [1] : vector<16x16xf32> to vector<16xf32>
    %110 = vector.shape_cast %109 : vector<16xf32> to vector<16x1xf32>
    %111 = tpu.reciprocal %110 : vector<16x1xf32> -> vector<16x1xf32>
    %112 = vector.broadcast %111 : vector<16x1xf32> to vector<16x16xf32>
    %113 = arith.mulf %108, %112 : vector<16x16xf32>
    %114 = arith.truncf %113 : vector<16x16xf32> to vector<16x16xbf16>
    %115 = vector.extract_strided_slice %68 {offsets = [0, 256], sizes = [16, 128], strides = [1, 1]} : vector<16x512xbf16> to vector<16x128xbf16>
    %cst_40 = arith.constant dense<0.000000e+00> : vector<16x128xf32>
    %116 = tpu.matmul %114, %115, %cst_40 {dimension_numbers = #tpu.dot_dimension_numbers<[1], [0], [0], [1], [0, 0, 1, 1], [], []>} : vector<16x16xbf16>, vector<16x128xbf16>, vector<16x128xf32> -> vector<16x128xf32>
    %117 = vector.extract_strided_slice %66 {offsets = [0, 384], sizes = [16, 128], strides = [1, 1]} : vector<16x512xbf16> to vector<16x128xbf16>
    %118 = vector.extract_strided_slice %67 {offsets = [0, 384], sizes = [16, 128], strides = [1, 1]} : vector<16x512xbf16> to vector<16x128xbf16>
    %cst_41 = arith.constant dense<0.000000e+00> : vector<16x16xf32>
    %119 = tpu.matmul %117, %118, %cst_41 {dimension_numbers = #tpu.dot_dimension_numbers<[1], [1], [0], [0], [0, 0, 1, 0], [], []>} : vector<16x128xbf16>, vector<16x128xbf16>, vector<16x16xf32> -> vector<16x16xf32>
    %cst_42 = arith.constant dense<0xFF800000> : vector<16xf32>
    %120 = vector.multi_reduction <maximumf>, %119, %cst_42 [1] : vector<16x16xf32> to vector<16xf32>
    %121 = vector.shape_cast %120 : vector<16xf32> to vector<16x1xf32>
    %122 = vector.broadcast %121 : vector<16x1xf32> to vector<16x16xf32>
    %123 = arith.subf %119, %122 : vector<16x16xf32>
    %124 = math.exp %123 : vector<16x16xf32>
    %cst_43 = arith.constant dense<0.000000e+00> : vector<16xf32>
    %125 = vector.multi_reduction <add>, %124, %cst_43 [1] : vector<16x16xf32> to vector<16xf32>
    %126 = vector.shape_cast %125 : vector<16xf32> to vector<16x1xf32>
    %127 = tpu.reciprocal %126 : vector<16x1xf32> -> vector<16x1xf32>
    %128 = vector.broadcast %127 : vector<16x1xf32> to vector<16x16xf32>
    %129 = arith.mulf %124, %128 : vector<16x16xf32>
    %130 = arith.truncf %129 : vector<16x16xf32> to vector<16x16xbf16>
    %131 = vector.extract_strided_slice %68 {offsets = [0, 384], sizes = [16, 128], strides = [1, 1]} : vector<16x512xbf16> to vector<16x128xbf16>
    %cst_44 = arith.constant dense<0.000000e+00> : vector<16x128xf32>
    %132 = tpu.matmul %130, %131, %cst_44 {dimension_numbers = #tpu.dot_dimension_numbers<[1], [0], [0], [1], [0, 0, 1, 1], [], []>} : vector<16x16xbf16>, vector<16x128xbf16>, vector<16x128xf32> -> vector<16x128xf32>
    %133 = tpu.concatenate %84, %100, %116, %132 in 1 : vector<16x128xf32>, vector<16x128xf32>, vector<16x128xf32>, vector<16x128xf32> -> vector<16x512xf32>
    %134 = arith.truncf %133 : vector<16x512xf32> to vector<16x512xbf16>
    %c0_45 = arith.constant 0 : index
    %c0_46 = arith.constant 0 : index
    %c0_47 = arith.constant 0 : index
    %135 = vector.load %arg8[%c0_45, %c0_46, %c0_47] : memref<2x512x128xbf16, #tpu.memory_space<vmem>>, vector<1x512x128xbf16>
    %136 = vector.shape_cast %135 : vector<1x512x128xbf16> to vector<512x128xbf16>
    %cst_48 = arith.constant dense<0.000000e+00> : vector<16x128xf32>
    %137 = tpu.matmul %134, %136, %cst_48 {dimension_numbers = #tpu.dot_dimension_numbers<[1], [0], [0], [1], [0, 0, 1, 1], [], []>} : vector<16x512xbf16>, vector<512x128xbf16>, vector<16x128xf32> -> vector<16x128xf32>
    %c0_49 = arith.constant 0 : index
    %c0_50 = arith.constant 0 : index
    %c0_51 = arith.constant 0 : index
    %138 = vector.load %arg9[%c0_49, %c0_50, %c0_51] : memref<2x1x128xf32, #tpu.memory_space<vmem>>, vector<1x1x128xf32>
    %139 = vector.shape_cast %138 : vector<1x1x128xf32> to vector<1x128xf32>
    %140 = vector.broadcast %139 : vector<1x128xf32> to vector<16x128xf32>
    %141 = arith.addf %137, %140 : vector<16x128xf32>
    %c0_52 = arith.constant 0 : index
    %c0_53 = arith.constant 0 : index
    %c0_54 = arith.constant 0 : index
    %142 = vector.load %arg10[%c0_52, %c0_53, %c0_54] : memref<2x1x128xf32, #tpu.memory_space<vmem>>, vector<1x1x128xf32>
    %143 = vector.shape_cast %142 : vector<1x1x128xf32> to vector<1x128xf32>
    %144 = vector.broadcast %143 : vector<1x128xf32> to vector<16x128xf32>
    %145 = arith.mulf %141, %144 : vector<16x128xf32>
    %146 = arith.addf %0, %145 : vector<16x128xf32>
    %c0_55 = arith.constant 0 : index
    %c0_56 = arith.constant 0 : index
    %c0_57 = arith.constant 0 : index
    %147 = vector.load %arg11[%c0_55, %c0_56, %c0_57] : memref<2x1x128xf32, #tpu.memory_space<vmem>>, vector<1x1x128xf32>
    %148 = vector.shape_cast %147 : vector<1x1x128xf32> to vector<1x128xf32>
    %149 = arith.mulf %146, %146 : vector<16x128xf32>
    %cst_58 = arith.constant dense<0.000000e+00> : vector<16xf32>
    %150 = vector.multi_reduction <add>, %149, %cst_58 [1] : vector<16x128xf32> to vector<16xf32>
    %151 = vector.shape_cast %150 : vector<16xf32> to vector<16x1xf32>
    %cst_59 = arith.constant 3.125000e-02 : f32
    %152 = vector.broadcast %cst_59 : f32 to vector<16x1xf32>
    %153 = arith.mulf %151, %152 : vector<16x1xf32>
    %cst_60 = arith.constant 9.99999997E-7 : f32
    %154 = vector.broadcast %cst_60 : f32 to vector<16x1xf32>
    %155 = arith.addf %153, %154 : vector<16x1xf32>
    %156 = math.rsqrt %155 : vector<16x1xf32>
    %157 = vector.broadcast %156 : vector<16x1xf32> to vector<16x128xf32>
    %158 = arith.mulf %146, %157 : vector<16x128xf32>
    %159 = vector.broadcast %148 : vector<1x128xf32> to vector<16x128xf32>
    %160 = arith.mulf %158, %159 : vector<16x128xf32>
    %161 = arith.truncf %160 : vector<16x128xf32> to vector<16x128xbf16>
    %c0_61 = arith.constant 0 : index
    %c0_62 = arith.constant 0 : index
    %c0_63 = arith.constant 0 : index
    %162 = vector.load %arg12[%c0_61, %c0_62, %c0_63] : memref<2x128x256xbf16, #tpu.memory_space<vmem>>, vector<1x128x256xbf16>
    %163 = vector.shape_cast %162 : vector<1x128x256xbf16> to vector<128x256xbf16>
    %cst_64 = arith.constant dense<0.000000e+00> : vector<16x256xf32>
    %164 = tpu.matmul %161, %163, %cst_64 {dimension_numbers = #tpu.dot_dimension_numbers<[1], [0], [0], [1], [0, 0, 1, 1], [], []>} : vector<16x128xbf16>, vector<128x256xbf16>, vector<16x256xf32> -> vector<16x256xf32>
    %c0_65 = arith.constant 0 : index
    %c0_66 = arith.constant 0 : index
    %c0_67 = arith.constant 0 : index
    %165 = vector.load %arg13[%c0_65, %c0_66, %c0_67] : memref<2x1x256xf32, #tpu.memory_space<vmem>>, vector<1x1x256xf32>
    %166 = vector.shape_cast %165 : vector<1x1x256xf32> to vector<1x256xf32>
    %167 = vector.broadcast %166 : vector<1x256xf32> to vector<16x256xf32>
    %168 = arith.addf %164, %167 : vector<16x256xf32>
    %169 = vector.extract_strided_slice %168 {offsets = [0, 0], sizes = [16, 128], strides = [1, 1]} : vector<16x256xf32> to vector<16x128xf32>
    %170 = vector.extract_strided_slice %168 {offsets = [0, 128], sizes = [16, 128], strides = [1, 1]} : vector<16x256xf32> to vector<16x128xf32>
    %171 = arith.negf %169 : vector<16x128xf32>
    %172 = math.exp %171 : vector<16x128xf32>
    %cst_68 = arith.constant 1.000000e+00 : f32
    %173 = vector.broadcast %cst_68 : f32 to vector<16x128xf32>
    %174 = arith.addf %173, %172 : vector<16x128xf32>
    %175 = arith.divf %173, %174 : vector<16x128xf32>
    %176 = arith.mulf %169, %175 : vector<16x128xf32>
    %177 = arith.mulf %176, %170 : vector<16x128xf32>
    %c0_69 = arith.constant 0 : index
    %c0_70 = arith.constant 0 : index
    %c0_71 = arith.constant 0 : index
    %178 = vector.load %arg14[%c0_69, %c0_70, %c0_71] : memref<2x1x128xf32, #tpu.memory_space<vmem>>, vector<1x1x128xf32>
    %179 = vector.shape_cast %178 : vector<1x1x128xf32> to vector<1x128xf32>
    %180 = arith.mulf %177, %177 : vector<16x128xf32>
    %cst_72 = arith.constant dense<0.000000e+00> : vector<16xf32>
    %181 = vector.multi_reduction <add>, %180, %cst_72 [1] : vector<16x128xf32> to vector<16xf32>
    %182 = vector.shape_cast %181 : vector<16xf32> to vector<16x1xf32>
    %cst_73 = arith.constant 3.125000e-02 : f32
    %183 = vector.broadcast %cst_73 : f32 to vector<16x1xf32>
    %184 = arith.mulf %182, %183 : vector<16x1xf32>
    %cst_74 = arith.constant 9.99999997E-7 : f32
    %185 = vector.broadcast %cst_74 : f32 to vector<16x1xf32>
    %186 = arith.addf %184, %185 : vector<16x1xf32>
    %187 = math.rsqrt %186 : vector<16x1xf32>
    %188 = vector.broadcast %187 : vector<16x1xf32> to vector<16x128xf32>
    %189 = arith.mulf %177, %188 : vector<16x128xf32>
    %190 = vector.broadcast %179 : vector<1x128xf32> to vector<16x128xf32>
    %191 = arith.mulf %189, %190 : vector<16x128xf32>
    %192 = arith.truncf %191 : vector<16x128xf32> to vector<16x128xbf16>
    %c0_75 = arith.constant 0 : index
    %c0_76 = arith.constant 0 : index
    %c0_77 = arith.constant 0 : index
    %193 = vector.load %arg15[%c0_75, %c0_76, %c0_77] : memref<2x128x128xbf16, #tpu.memory_space<vmem>>, vector<1x128x128xbf16>
    %194 = vector.shape_cast %193 : vector<1x128x128xbf16> to vector<128x128xbf16>
    %cst_78 = arith.constant dense<0.000000e+00> : vector<16x128xf32>
    %195 = tpu.matmul %192, %194, %cst_78 {dimension_numbers = #tpu.dot_dimension_numbers<[1], [0], [0], [1], [0, 0, 1, 1], [], []>} : vector<16x128xbf16>, vector<128x128xbf16>, vector<16x128xf32> -> vector<16x128xf32>
    %c0_79 = arith.constant 0 : index
    %c0_80 = arith.constant 0 : index
    %c0_81 = arith.constant 0 : index
    %196 = vector.load %arg16[%c0_79, %c0_80, %c0_81] : memref<2x1x128xf32, #tpu.memory_space<vmem>>, vector<1x1x128xf32>
    %197 = vector.shape_cast %196 : vector<1x1x128xf32> to vector<1x128xf32>
    %198 = vector.broadcast %197 : vector<1x128xf32> to vector<16x128xf32>
    %199 = arith.addf %195, %198 : vector<16x128xf32>
    %c0_82 = arith.constant 0 : index
    %c0_83 = arith.constant 0 : index
    %c0_84 = arith.constant 0 : index
    %200 = vector.load %arg17[%c0_82, %c0_83, %c0_84] : memref<2x1x128xf32, #tpu.memory_space<vmem>>, vector<1x1x128xf32>
    %201 = vector.shape_cast %200 : vector<1x1x128xf32> to vector<1x128xf32>
    %202 = vector.broadcast %201 : vector<1x128xf32> to vector<16x128xf32>
    %203 = arith.mulf %199, %202 : vector<16x128xf32>
    %204 = arith.addf %146, %203 : vector<16x128xf32>
    %c1 = arith.constant 1 : index
    %c0_85 = arith.constant 0 : index
    %c0_86 = arith.constant 0 : index
    %205 = vector.load %arg4[%c1, %c0_85, %c0_86] : memref<2x1x128xf32, #tpu.memory_space<vmem>>, vector<1x1x128xf32>
    %206 = vector.shape_cast %205 : vector<1x1x128xf32> to vector<1x128xf32>
    %207 = arith.mulf %204, %204 : vector<16x128xf32>
    %cst_87 = arith.constant dense<0.000000e+00> : vector<16xf32>
    %208 = vector.multi_reduction <add>, %207, %cst_87 [1] : vector<16x128xf32> to vector<16xf32>
    %209 = vector.shape_cast %208 : vector<16xf32> to vector<16x1xf32>
    %cst_88 = arith.constant 3.125000e-02 : f32
    %210 = vector.broadcast %cst_88 : f32 to vector<16x1xf32>
    %211 = arith.mulf %209, %210 : vector<16x1xf32>
    %cst_89 = arith.constant 9.99999997E-7 : f32
    %212 = vector.broadcast %cst_89 : f32 to vector<16x1xf32>
    %213 = arith.addf %211, %212 : vector<16x1xf32>
    %214 = math.rsqrt %213 : vector<16x1xf32>
    %215 = vector.broadcast %214 : vector<16x1xf32> to vector<16x128xf32>
    %216 = arith.mulf %204, %215 : vector<16x128xf32>
    %217 = vector.broadcast %206 : vector<1x128xf32> to vector<16x128xf32>
    %218 = arith.mulf %216, %217 : vector<16x128xf32>
    %219 = arith.truncf %218 : vector<16x128xf32> to vector<16x128xbf16>
    %c1_90 = arith.constant 1 : index
    %c0_91 = arith.constant 0 : index
    %c0_92 = arith.constant 0 : index
    %220 = vector.load %arg5[%c1_90, %c0_91, %c0_92] : memref<2x128x1536xbf16, #tpu.memory_space<vmem>>, vector<1x128x1536xbf16>
    %221 = vector.shape_cast %220 : vector<1x128x1536xbf16> to vector<128x1536xbf16>
    %cst_93 = arith.constant dense<0.000000e+00> : vector<16x1536xf32>
    %222 = tpu.matmul %219, %221, %cst_93 {dimension_numbers = #tpu.dot_dimension_numbers<[1], [0], [0], [1], [0, 0, 1, 1], [], []>} : vector<16x128xbf16>, vector<128x1536xbf16>, vector<16x1536xf32> -> vector<16x1536xf32>
    %223 = vector.extract_strided_slice %222 {offsets = [0, 0], sizes = [16, 512], strides = [1, 1]} : vector<16x1536xf32> to vector<16x512xf32>
    %224 = vector.extract_strided_slice %222 {offsets = [0, 512], sizes = [16, 512], strides = [1, 1]} : vector<16x1536xf32> to vector<16x512xf32>
    %225 = vector.extract_strided_slice %222 {offsets = [0, 1024], sizes = [16, 512], strides = [1, 1]} : vector<16x1536xf32> to vector<16x512xf32>
    %c4_i32_94 = arith.constant 4 : i32
    %226 = tpu.dynamic_rotate %223 by %c4_i32_94 dim 1 : vector<16x512xf32>, i32 -> vector<16x512xf32>
    %c508_i32_95 = arith.constant 508 : i32
    %227 = tpu.dynamic_rotate %223 by %c508_i32_95 dim 1 : vector<16x512xf32>, i32 -> vector<16x512xf32>
    %228 = arith.addf %226, %227 : vector<16x512xf32>
    %229 = arith.mulf %223, %1 : vector<16x512xf32>
    %230 = arith.mulf %228, %2 : vector<16x512xf32>
    %231 = arith.addf %229, %230 : vector<16x512xf32>
    %c1_96 = arith.constant 1 : index
    %c0_97 = arith.constant 0 : index
    %c0_98 = arith.constant 0 : index
    %232 = vector.load %arg6[%c1_96, %c0_97, %c0_98] : memref<2x1x512xf32, #tpu.memory_space<vmem>>, vector<1x1x512xf32>
    %233 = vector.shape_cast %232 : vector<1x1x512xf32> to vector<1x512xf32>
    %234 = arith.mulf %231, %231 : vector<16x512xf32>
    %cst_99 = arith.constant dense<0.000000e+00> : vector<16xf32>
    %235 = vector.multi_reduction <add>, %234, %cst_99 [1] : vector<16x512xf32> to vector<16xf32>
    %236 = vector.shape_cast %235 : vector<16xf32> to vector<16x1xf32>
    %cst_100 = arith.constant 3.125000e-02 : f32
    %237 = vector.broadcast %cst_100 : f32 to vector<16x1xf32>
    %238 = arith.mulf %236, %237 : vector<16x1xf32>
    %cst_101 = arith.constant 9.99999997E-7 : f32
    %239 = vector.broadcast %cst_101 : f32 to vector<16x1xf32>
    %240 = arith.addf %238, %239 : vector<16x1xf32>
    %241 = math.rsqrt %240 : vector<16x1xf32>
    %242 = vector.broadcast %241 : vector<16x1xf32> to vector<16x512xf32>
    %243 = arith.mulf %231, %242 : vector<16x512xf32>
    %244 = vector.broadcast %233 : vector<1x512xf32> to vector<16x512xf32>
    %245 = arith.mulf %243, %244 : vector<16x512xf32>
    %cst_102 = arith.constant 0.353553385 : f32
    %246 = vector.broadcast %cst_102 : f32 to vector<16x512xf32>
    %247 = arith.mulf %245, %246 : vector<16x512xf32>
    %c4_i32_103 = arith.constant 4 : i32
    %248 = tpu.dynamic_rotate %224 by %c4_i32_103 dim 1 : vector<16x512xf32>, i32 -> vector<16x512xf32>
    %c508_i32_104 = arith.constant 508 : i32
    %249 = tpu.dynamic_rotate %224 by %c508_i32_104 dim 1 : vector<16x512xf32>, i32 -> vector<16x512xf32>
    %250 = arith.addf %248, %249 : vector<16x512xf32>
    %251 = arith.mulf %224, %1 : vector<16x512xf32>
    %252 = arith.mulf %250, %2 : vector<16x512xf32>
    %253 = arith.addf %251, %252 : vector<16x512xf32>
    %c1_105 = arith.constant 1 : index
    %c0_106 = arith.constant 0 : index
    %c0_107 = arith.constant 0 : index
    %254 = vector.load %arg7[%c1_105, %c0_106, %c0_107] : memref<2x1x512xf32, #tpu.memory_space<vmem>>, vector<1x1x512xf32>
    %255 = vector.shape_cast %254 : vector<1x1x512xf32> to vector<1x512xf32>
    %256 = arith.mulf %253, %253 : vector<16x512xf32>
    %cst_108 = arith.constant dense<0.000000e+00> : vector<16xf32>
    %257 = vector.multi_reduction <add>, %256, %cst_108 [1] : vector<16x512xf32> to vector<16xf32>
    %258 = vector.shape_cast %257 : vector<16xf32> to vector<16x1xf32>
    %cst_109 = arith.constant 3.125000e-02 : f32
    %259 = vector.broadcast %cst_109 : f32 to vector<16x1xf32>
    %260 = arith.mulf %258, %259 : vector<16x1xf32>
    %cst_110 = arith.constant 9.99999997E-7 : f32
    %261 = vector.broadcast %cst_110 : f32 to vector<16x1xf32>
    %262 = arith.addf %260, %261 : vector<16x1xf32>
    %263 = math.rsqrt %262 : vector<16x1xf32>
    %264 = vector.broadcast %263 : vector<16x1xf32> to vector<16x512xf32>
    %265 = arith.mulf %253, %264 : vector<16x512xf32>
    %266 = vector.broadcast %255 : vector<1x512xf32> to vector<16x512xf32>
    %267 = arith.mulf %265, %266 : vector<16x512xf32>
    %268 = arith.truncf %247 : vector<16x512xf32> to vector<16x512xbf16>
    %269 = arith.truncf %267 : vector<16x512xf32> to vector<16x512xbf16>
    %270 = arith.truncf %225 : vector<16x512xf32> to vector<16x512xbf16>
    %271 = vector.extract_strided_slice %268 {offsets = [0, 0], sizes = [16, 128], strides = [1, 1]} : vector<16x512xbf16> to vector<16x128xbf16>
    %272 = vector.extract_strided_slice %269 {offsets = [0, 0], sizes = [16, 128], strides = [1, 1]} : vector<16x512xbf16> to vector<16x128xbf16>
    %cst_111 = arith.constant dense<0.000000e+00> : vector<16x16xf32>
    %273 = tpu.matmul %271, %272, %cst_111 {dimension_numbers = #tpu.dot_dimension_numbers<[1], [1], [0], [0], [0, 0, 1, 0], [], []>} : vector<16x128xbf16>, vector<16x128xbf16>, vector<16x16xf32> -> vector<16x16xf32>
    %cst_112 = arith.constant dense<0xFF800000> : vector<16xf32>
    %274 = vector.multi_reduction <maximumf>, %273, %cst_112 [1] : vector<16x16xf32> to vector<16xf32>
    %275 = vector.shape_cast %274 : vector<16xf32> to vector<16x1xf32>
    %276 = vector.broadcast %275 : vector<16x1xf32> to vector<16x16xf32>
    %277 = arith.subf %273, %276 : vector<16x16xf32>
    %278 = math.exp %277 : vector<16x16xf32>
    %cst_113 = arith.constant dense<0.000000e+00> : vector<16xf32>
    %279 = vector.multi_reduction <add>, %278, %cst_113 [1] : vector<16x16xf32> to vector<16xf32>
    %280 = vector.shape_cast %279 : vector<16xf32> to vector<16x1xf32>
    %281 = tpu.reciprocal %280 : vector<16x1xf32> -> vector<16x1xf32>
    %282 = vector.broadcast %281 : vector<16x1xf32> to vector<16x16xf32>
    %283 = arith.mulf %278, %282 : vector<16x16xf32>
    %284 = arith.truncf %283 : vector<16x16xf32> to vector<16x16xbf16>
    %285 = vector.extract_strided_slice %270 {offsets = [0, 0], sizes = [16, 128], strides = [1, 1]} : vector<16x512xbf16> to vector<16x128xbf16>
    %cst_114 = arith.constant dense<0.000000e+00> : vector<16x128xf32>
    %286 = tpu.matmul %284, %285, %cst_114 {dimension_numbers = #tpu.dot_dimension_numbers<[1], [0], [0], [1], [0, 0, 1, 1], [], []>} : vector<16x16xbf16>, vector<16x128xbf16>, vector<16x128xf32> -> vector<16x128xf32>
    %287 = vector.extract_strided_slice %268 {offsets = [0, 128], sizes = [16, 128], strides = [1, 1]} : vector<16x512xbf16> to vector<16x128xbf16>
    %288 = vector.extract_strided_slice %269 {offsets = [0, 128], sizes = [16, 128], strides = [1, 1]} : vector<16x512xbf16> to vector<16x128xbf16>
    %cst_115 = arith.constant dense<0.000000e+00> : vector<16x16xf32>
    %289 = tpu.matmul %287, %288, %cst_115 {dimension_numbers = #tpu.dot_dimension_numbers<[1], [1], [0], [0], [0, 0, 1, 0], [], []>} : vector<16x128xbf16>, vector<16x128xbf16>, vector<16x16xf32> -> vector<16x16xf32>
    %cst_116 = arith.constant dense<0xFF800000> : vector<16xf32>
    %290 = vector.multi_reduction <maximumf>, %289, %cst_116 [1] : vector<16x16xf32> to vector<16xf32>
    %291 = vector.shape_cast %290 : vector<16xf32> to vector<16x1xf32>
    %292 = vector.broadcast %291 : vector<16x1xf32> to vector<16x16xf32>
    %293 = arith.subf %289, %292 : vector<16x16xf32>
    %294 = math.exp %293 : vector<16x16xf32>
    %cst_117 = arith.constant dense<0.000000e+00> : vector<16xf32>
    %295 = vector.multi_reduction <add>, %294, %cst_117 [1] : vector<16x16xf32> to vector<16xf32>
    %296 = vector.shape_cast %295 : vector<16xf32> to vector<16x1xf32>
    %297 = tpu.reciprocal %296 : vector<16x1xf32> -> vector<16x1xf32>
    %298 = vector.broadcast %297 : vector<16x1xf32> to vector<16x16xf32>
    %299 = arith.mulf %294, %298 : vector<16x16xf32>
    %300 = arith.truncf %299 : vector<16x16xf32> to vector<16x16xbf16>
    %301 = vector.extract_strided_slice %270 {offsets = [0, 128], sizes = [16, 128], strides = [1, 1]} : vector<16x512xbf16> to vector<16x128xbf16>
    %cst_118 = arith.constant dense<0.000000e+00> : vector<16x128xf32>
    %302 = tpu.matmul %300, %301, %cst_118 {dimension_numbers = #tpu.dot_dimension_numbers<[1], [0], [0], [1], [0, 0, 1, 1], [], []>} : vector<16x16xbf16>, vector<16x128xbf16>, vector<16x128xf32> -> vector<16x128xf32>
    %303 = vector.extract_strided_slice %268 {offsets = [0, 256], sizes = [16, 128], strides = [1, 1]} : vector<16x512xbf16> to vector<16x128xbf16>
    %304 = vector.extract_strided_slice %269 {offsets = [0, 256], sizes = [16, 128], strides = [1, 1]} : vector<16x512xbf16> to vector<16x128xbf16>
    %cst_119 = arith.constant dense<0.000000e+00> : vector<16x16xf32>
    %305 = tpu.matmul %303, %304, %cst_119 {dimension_numbers = #tpu.dot_dimension_numbers<[1], [1], [0], [0], [0, 0, 1, 0], [], []>} : vector<16x128xbf16>, vector<16x128xbf16>, vector<16x16xf32> -> vector<16x16xf32>
    %cst_120 = arith.constant dense<0xFF800000> : vector<16xf32>
    %306 = vector.multi_reduction <maximumf>, %305, %cst_120 [1] : vector<16x16xf32> to vector<16xf32>
    %307 = vector.shape_cast %306 : vector<16xf32> to vector<16x1xf32>
    %308 = vector.broadcast %307 : vector<16x1xf32> to vector<16x16xf32>
    %309 = arith.subf %305, %308 : vector<16x16xf32>
    %310 = math.exp %309 : vector<16x16xf32>
    %cst_121 = arith.constant dense<0.000000e+00> : vector<16xf32>
    %311 = vector.multi_reduction <add>, %310, %cst_121 [1] : vector<16x16xf32> to vector<16xf32>
    %312 = vector.shape_cast %311 : vector<16xf32> to vector<16x1xf32>
    %313 = tpu.reciprocal %312 : vector<16x1xf32> -> vector<16x1xf32>
    %314 = vector.broadcast %313 : vector<16x1xf32> to vector<16x16xf32>
    %315 = arith.mulf %310, %314 : vector<16x16xf32>
    %316 = arith.truncf %315 : vector<16x16xf32> to vector<16x16xbf16>
    %317 = vector.extract_strided_slice %270 {offsets = [0, 256], sizes = [16, 128], strides = [1, 1]} : vector<16x512xbf16> to vector<16x128xbf16>
    %cst_122 = arith.constant dense<0.000000e+00> : vector<16x128xf32>
    %318 = tpu.matmul %316, %317, %cst_122 {dimension_numbers = #tpu.dot_dimension_numbers<[1], [0], [0], [1], [0, 0, 1, 1], [], []>} : vector<16x16xbf16>, vector<16x128xbf16>, vector<16x128xf32> -> vector<16x128xf32>
    %319 = vector.extract_strided_slice %268 {offsets = [0, 384], sizes = [16, 128], strides = [1, 1]} : vector<16x512xbf16> to vector<16x128xbf16>
    %320 = vector.extract_strided_slice %269 {offsets = [0, 384], sizes = [16, 128], strides = [1, 1]} : vector<16x512xbf16> to vector<16x128xbf16>
    %cst_123 = arith.constant dense<0.000000e+00> : vector<16x16xf32>
    %321 = tpu.matmul %319, %320, %cst_123 {dimension_numbers = #tpu.dot_dimension_numbers<[1], [1], [0], [0], [0, 0, 1, 0], [], []>} : vector<16x128xbf16>, vector<16x128xbf16>, vector<16x16xf32> -> vector<16x16xf32>
    %cst_124 = arith.constant dense<0xFF800000> : vector<16xf32>
    %322 = vector.multi_reduction <maximumf>, %321, %cst_124 [1] : vector<16x16xf32> to vector<16xf32>
    %323 = vector.shape_cast %322 : vector<16xf32> to vector<16x1xf32>
    %324 = vector.broadcast %323 : vector<16x1xf32> to vector<16x16xf32>
    %325 = arith.subf %321, %324 : vector<16x16xf32>
    %326 = math.exp %325 : vector<16x16xf32>
    %cst_125 = arith.constant dense<0.000000e+00> : vector<16xf32>
    %327 = vector.multi_reduction <add>, %326, %cst_125 [1] : vector<16x16xf32> to vector<16xf32>
    %328 = vector.shape_cast %327 : vector<16xf32> to vector<16x1xf32>
    %329 = tpu.reciprocal %328 : vector<16x1xf32> -> vector<16x1xf32>
    %330 = vector.broadcast %329 : vector<16x1xf32> to vector<16x16xf32>
    %331 = arith.mulf %326, %330 : vector<16x16xf32>
    %332 = arith.truncf %331 : vector<16x16xf32> to vector<16x16xbf16>
    %333 = vector.extract_strided_slice %270 {offsets = [0, 384], sizes = [16, 128], strides = [1, 1]} : vector<16x512xbf16> to vector<16x128xbf16>
    %cst_126 = arith.constant dense<0.000000e+00> : vector<16x128xf32>
    %334 = tpu.matmul %332, %333, %cst_126 {dimension_numbers = #tpu.dot_dimension_numbers<[1], [0], [0], [1], [0, 0, 1, 1], [], []>} : vector<16x16xbf16>, vector<16x128xbf16>, vector<16x128xf32> -> vector<16x128xf32>
    %335 = tpu.concatenate %286, %302, %318, %334 in 1 : vector<16x128xf32>, vector<16x128xf32>, vector<16x128xf32>, vector<16x128xf32> -> vector<16x512xf32>
    %336 = arith.truncf %335 : vector<16x512xf32> to vector<16x512xbf16>
    %c1_127 = arith.constant 1 : index
    %c0_128 = arith.constant 0 : index
    %c0_129 = arith.constant 0 : index
    %337 = vector.load %arg8[%c1_127, %c0_128, %c0_129] : memref<2x512x128xbf16, #tpu.memory_space<vmem>>, vector<1x512x128xbf16>
    %338 = vector.shape_cast %337 : vector<1x512x128xbf16> to vector<512x128xbf16>
    %cst_130 = arith.constant dense<0.000000e+00> : vector<16x128xf32>
    %339 = tpu.matmul %336, %338, %cst_130 {dimension_numbers = #tpu.dot_dimension_numbers<[1], [0], [0], [1], [0, 0, 1, 1], [], []>} : vector<16x512xbf16>, vector<512x128xbf16>, vector<16x128xf32> -> vector<16x128xf32>
    %c1_131 = arith.constant 1 : index
    %c0_132 = arith.constant 0 : index
    %c0_133 = arith.constant 0 : index
    %340 = vector.load %arg9[%c1_131, %c0_132, %c0_133] : memref<2x1x128xf32, #tpu.memory_space<vmem>>, vector<1x1x128xf32>
    %341 = vector.shape_cast %340 : vector<1x1x128xf32> to vector<1x128xf32>
    %342 = vector.broadcast %341 : vector<1x128xf32> to vector<16x128xf32>
    %343 = arith.addf %339, %342 : vector<16x128xf32>
    %c1_134 = arith.constant 1 : index
    %c0_135 = arith.constant 0 : index
    %c0_136 = arith.constant 0 : index
    %344 = vector.load %arg10[%c1_134, %c0_135, %c0_136] : memref<2x1x128xf32, #tpu.memory_space<vmem>>, vector<1x1x128xf32>
    %345 = vector.shape_cast %344 : vector<1x1x128xf32> to vector<1x128xf32>
    %346 = vector.broadcast %345 : vector<1x128xf32> to vector<16x128xf32>
    %347 = arith.mulf %343, %346 : vector<16x128xf32>
    %348 = arith.addf %204, %347 : vector<16x128xf32>
    %c1_137 = arith.constant 1 : index
    %c0_138 = arith.constant 0 : index
    %c0_139 = arith.constant 0 : index
    %349 = vector.load %arg11[%c1_137, %c0_138, %c0_139] : memref<2x1x128xf32, #tpu.memory_space<vmem>>, vector<1x1x128xf32>
    %350 = vector.shape_cast %349 : vector<1x1x128xf32> to vector<1x128xf32>
    %351 = arith.mulf %348, %348 : vector<16x128xf32>
    %cst_140 = arith.constant dense<0.000000e+00> : vector<16xf32>
    %352 = vector.multi_reduction <add>, %351, %cst_140 [1] : vector<16x128xf32> to vector<16xf32>
    %353 = vector.shape_cast %352 : vector<16xf32> to vector<16x1xf32>
    %cst_141 = arith.constant 3.125000e-02 : f32
    %354 = vector.broadcast %cst_141 : f32 to vector<16x1xf32>
    %355 = arith.mulf %353, %354 : vector<16x1xf32>
    %cst_142 = arith.constant 9.99999997E-7 : f32
    %356 = vector.broadcast %cst_142 : f32 to vector<16x1xf32>
    %357 = arith.addf %355, %356 : vector<16x1xf32>
    %358 = math.rsqrt %357 : vector<16x1xf32>
    %359 = vector.broadcast %358 : vector<16x1xf32> to vector<16x128xf32>
    %360 = arith.mulf %348, %359 : vector<16x128xf32>
    %361 = vector.broadcast %350 : vector<1x128xf32> to vector<16x128xf32>
    %362 = arith.mulf %360, %361 : vector<16x128xf32>
    %363 = arith.truncf %362 : vector<16x128xf32> to vector<16x128xbf16>
    %c1_143 = arith.constant 1 : index
    %c0_144 = arith.constant 0 : index
    %c0_145 = arith.constant 0 : index
    %364 = vector.load %arg12[%c1_143, %c0_144, %c0_145] : memref<2x128x256xbf16, #tpu.memory_space<vmem>>, vector<1x128x256xbf16>
    %365 = vector.shape_cast %364 : vector<1x128x256xbf16> to vector<128x256xbf16>
    %cst_146 = arith.constant dense<0.000000e+00> : vector<16x256xf32>
    %366 = tpu.matmul %363, %365, %cst_146 {dimension_numbers = #tpu.dot_dimension_numbers<[1], [0], [0], [1], [0, 0, 1, 1], [], []>} : vector<16x128xbf16>, vector<128x256xbf16>, vector<16x256xf32> -> vector<16x256xf32>
    %c1_147 = arith.constant 1 : index
    %c0_148 = arith.constant 0 : index
    %c0_149 = arith.constant 0 : index
    %367 = vector.load %arg13[%c1_147, %c0_148, %c0_149] : memref<2x1x256xf32, #tpu.memory_space<vmem>>, vector<1x1x256xf32>
    %368 = vector.shape_cast %367 : vector<1x1x256xf32> to vector<1x256xf32>
    %369 = vector.broadcast %368 : vector<1x256xf32> to vector<16x256xf32>
    %370 = arith.addf %366, %369 : vector<16x256xf32>
    %371 = vector.extract_strided_slice %370 {offsets = [0, 0], sizes = [16, 128], strides = [1, 1]} : vector<16x256xf32> to vector<16x128xf32>
    %372 = vector.extract_strided_slice %370 {offsets = [0, 128], sizes = [16, 128], strides = [1, 1]} : vector<16x256xf32> to vector<16x128xf32>
    %373 = arith.negf %371 : vector<16x128xf32>
    %374 = math.exp %373 : vector<16x128xf32>
    %cst_150 = arith.constant 1.000000e+00 : f32
    %375 = vector.broadcast %cst_150 : f32 to vector<16x128xf32>
    %376 = arith.addf %375, %374 : vector<16x128xf32>
    %377 = arith.divf %375, %376 : vector<16x128xf32>
    %378 = arith.mulf %371, %377 : vector<16x128xf32>
    %379 = arith.mulf %378, %372 : vector<16x128xf32>
    %c1_151 = arith.constant 1 : index
    %c0_152 = arith.constant 0 : index
    %c0_153 = arith.constant 0 : index
    %380 = vector.load %arg14[%c1_151, %c0_152, %c0_153] : memref<2x1x128xf32, #tpu.memory_space<vmem>>, vector<1x1x128xf32>
    %381 = vector.shape_cast %380 : vector<1x1x128xf32> to vector<1x128xf32>
    %382 = arith.mulf %379, %379 : vector<16x128xf32>
    %cst_154 = arith.constant dense<0.000000e+00> : vector<16xf32>
    %383 = vector.multi_reduction <add>, %382, %cst_154 [1] : vector<16x128xf32> to vector<16xf32>
    %384 = vector.shape_cast %383 : vector<16xf32> to vector<16x1xf32>
    %cst_155 = arith.constant 3.125000e-02 : f32
    %385 = vector.broadcast %cst_155 : f32 to vector<16x1xf32>
    %386 = arith.mulf %384, %385 : vector<16x1xf32>
    %cst_156 = arith.constant 9.99999997E-7 : f32
    %387 = vector.broadcast %cst_156 : f32 to vector<16x1xf32>
    %388 = arith.addf %386, %387 : vector<16x1xf32>
    %389 = math.rsqrt %388 : vector<16x1xf32>
    %390 = vector.broadcast %389 : vector<16x1xf32> to vector<16x128xf32>
    %391 = arith.mulf %379, %390 : vector<16x128xf32>
    %392 = vector.broadcast %381 : vector<1x128xf32> to vector<16x128xf32>
    %393 = arith.mulf %391, %392 : vector<16x128xf32>
    %394 = arith.truncf %393 : vector<16x128xf32> to vector<16x128xbf16>
    %c1_157 = arith.constant 1 : index
    %c0_158 = arith.constant 0 : index
    %c0_159 = arith.constant 0 : index
    %395 = vector.load %arg15[%c1_157, %c0_158, %c0_159] : memref<2x128x128xbf16, #tpu.memory_space<vmem>>, vector<1x128x128xbf16>
    %396 = vector.shape_cast %395 : vector<1x128x128xbf16> to vector<128x128xbf16>
    %cst_160 = arith.constant dense<0.000000e+00> : vector<16x128xf32>
    %397 = tpu.matmul %394, %396, %cst_160 {dimension_numbers = #tpu.dot_dimension_numbers<[1], [0], [0], [1], [0, 0, 1, 1], [], []>} : vector<16x128xbf16>, vector<128x128xbf16>, vector<16x128xf32> -> vector<16x128xf32>
    %c1_161 = arith.constant 1 : index
    %c0_162 = arith.constant 0 : index
    %c0_163 = arith.constant 0 : index
    %398 = vector.load %arg16[%c1_161, %c0_162, %c0_163] : memref<2x1x128xf32, #tpu.memory_space<vmem>>, vector<1x1x128xf32>
    %399 = vector.shape_cast %398 : vector<1x1x128xf32> to vector<1x128xf32>
    %400 = vector.broadcast %399 : vector<1x128xf32> to vector<16x128xf32>
    %401 = arith.addf %397, %400 : vector<16x128xf32>
    %c1_164 = arith.constant 1 : index
    %c0_165 = arith.constant 0 : index
    %c0_166 = arith.constant 0 : index
    %402 = vector.load %arg17[%c1_164, %c0_165, %c0_166] : memref<2x1x128xf32, #tpu.memory_space<vmem>>, vector<1x1x128xf32>
    %403 = vector.shape_cast %402 : vector<1x1x128xf32> to vector<1x128xf32>
    %404 = vector.broadcast %403 : vector<1x128xf32> to vector<16x128xf32>
    %405 = arith.mulf %401, %404 : vector<16x128xf32>
    %406 = arith.addf %348, %405 : vector<16x128xf32>
    %c0_167 = arith.constant 0 : index
    %c0_168 = arith.constant 0 : index
    %407 = vector.load %arg18[%c0_167, %c0_168] : memref<16x128xf32, #tpu.memory_space<vmem>>, vector<16x128xf32>
    tpu.vector_store %arg18[%c0_167, %c0_168], %406 {strides = array<i32>} : memref<16x128xf32, #tpu.memory_space<vmem>>, vector<16x128xf32>,
    return
  }
  func.func @transform_0(%arg0: i32) -> (i32, i32) {
    %c0_i32 = arith.constant 0 : i32
    %c0_i32_0 = arith.constant 0 : i32
    %c0_i32_1 = arith.constant 0 : i32
    return %c0_i32, %c0_i32_0 : i32, i32
  }
  func.func @transform_1(%arg0: i32) -> (i32, i32) {
    %c0_i32 = arith.constant 0 : i32
    %c0_i32_0 = arith.constant 0 : i32
    %c0_i32_1 = arith.constant 0 : i32
    return %c0_i32, %c0_i32_0 : i32, i32
  }
  func.func @transform_2(%arg0: i32) -> (i32, i32) {
    %c0_i32 = arith.constant 0 : i32
    %c0_i32_0 = arith.constant 0 : i32
    %c0_i32_1 = arith.constant 0 : i32
    return %c0_i32, %c0_i32_0 : i32, i32
  }
  func.func @transform_3(%arg0: i32) -> (i32, i32, i32) {
    %c0_i32 = arith.constant 0 : i32
    %c0_i32_0 = arith.constant 0 : i32
    %c0_i32_1 = arith.constant 0 : i32
    %c0_i32_2 = arith.constant 0 : i32
    return %c0_i32, %c0_i32_0, %c0_i32_1 : i32, i32, i32
  }
  func.func @transform_4(%arg0: i32) -> (i32, i32, i32) {
    %c0_i32 = arith.constant 0 : i32
    %c0_i32_0 = arith.constant 0 : i32
    %c0_i32_1 = arith.constant 0 : i32
    %c0_i32_2 = arith.constant 0 : i32
    return %c0_i32, %c0_i32_0, %c0_i32_1 : i32, i32, i32
  }
  func.func @transform_5(%arg0: i32) -> (i32, i32, i32) {
    %c0_i32 = arith.constant 0 : i32
    %c0_i32_0 = arith.constant 0 : i32
    %c0_i32_1 = arith.constant 0 : i32
    %c0_i32_2 = arith.constant 0 : i32
    return %c0_i32, %c0_i32_0, %c0_i32_1 : i32, i32, i32
  }
  func.func @transform_6(%arg0: i32) -> (i32, i32, i32) {
    %c0_i32 = arith.constant 0 : i32
    %c0_i32_0 = arith.constant 0 : i32
    %c0_i32_1 = arith.constant 0 : i32
    %c0_i32_2 = arith.constant 0 : i32
    return %c0_i32, %c0_i32_0, %c0_i32_1 : i32, i32, i32
  }
  func.func @transform_7(%arg0: i32) -> (i32, i32, i32) {
    %c0_i32 = arith.constant 0 : i32
    %c0_i32_0 = arith.constant 0 : i32
    %c0_i32_1 = arith.constant 0 : i32
    %c0_i32_2 = arith.constant 0 : i32
    return %c0_i32, %c0_i32_0, %c0_i32_1 : i32, i32, i32
  }
  func.func @transform_8(%arg0: i32) -> (i32, i32, i32) {
    %c0_i32 = arith.constant 0 : i32
    %c0_i32_0 = arith.constant 0 : i32
    %c0_i32_1 = arith.constant 0 : i32
    %c0_i32_2 = arith.constant 0 : i32
    return %c0_i32, %c0_i32_0, %c0_i32_1 : i32, i32, i32
  }
  func.func @transform_9(%arg0: i32) -> (i32, i32, i32) {
    %c0_i32 = arith.constant 0 : i32
    %c0_i32_0 = arith.constant 0 : i32
    %c0_i32_1 = arith.constant 0 : i32
    %c0_i32_2 = arith.constant 0 : i32
    return %c0_i32, %c0_i32_0, %c0_i32_1 : i32, i32, i32
  }
  func.func @transform_10(%arg0: i32) -> (i32, i32, i32) {
    %c0_i32 = arith.constant 0 : i32
    %c0_i32_0 = arith.constant 0 : i32
    %c0_i32_1 = arith.constant 0 : i32
    %c0_i32_2 = arith.constant 0 : i32
    return %c0_i32, %c0_i32_0, %c0_i32_1 : i32, i32, i32
  }
  func.func @transform_11(%arg0: i32) -> (i32, i32, i32) {
    %c0_i32 = arith.constant 0 : i32
    %c0_i32_0 = arith.constant 0 : i32
    %c0_i32_1 = arith.constant 0 : i32
    %c0_i32_2 = arith.constant 0 : i32
    return %c0_i32, %c0_i32_0, %c0_i32_1 : i32, i32, i32
  }
  func.func @transform_12(%arg0: i32) -> (i32, i32, i32) {
    %c0_i32 = arith.constant 0 : i32
    %c0_i32_0 = arith.constant 0 : i32
    %c0_i32_1 = arith.constant 0 : i32
    %c0_i32_2 = arith.constant 0 : i32
    return %c0_i32, %c0_i32_0, %c0_i32_1 : i32, i32, i32
  }
  func.func @transform_13(%arg0: i32) -> (i32, i32, i32) {
    %c0_i32 = arith.constant 0 : i32
    %c0_i32_0 = arith.constant 0 : i32
    %c0_i32_1 = arith.constant 0 : i32
    %c0_i32_2 = arith.constant 0 : i32
    return %c0_i32, %c0_i32_0, %c0_i32_1 : i32, i32, i32
  }
  func.func @transform_14(%arg0: i32) -> (i32, i32, i32) {
    %c0_i32 = arith.constant 0 : i32
    %c0_i32_0 = arith.constant 0 : i32
    %c0_i32_1 = arith.constant 0 : i32
    %c0_i32_2 = arith.constant 0 : i32
    return %c0_i32, %c0_i32_0, %c0_i32_1 : i32, i32, i32
  }
  func.func @transform_15(%arg0: i32) -> (i32, i32, i32) {
    %c0_i32 = arith.constant 0 : i32
    %c0_i32_0 = arith.constant 0 : i32
    %c0_i32_1 = arith.constant 0 : i32
    %c0_i32_2 = arith.constant 0 : i32
    return %c0_i32, %c0_i32_0, %c0_i32_1 : i32, i32, i32
  }
  func.func @transform_16(%arg0: i32) -> (i32, i32, i32) {
    %c0_i32 = arith.constant 0 : i32
    %c0_i32_0 = arith.constant 0 : i32
    %c0_i32_1 = arith.constant 0 : i32
    %c0_i32_2 = arith.constant 0 : i32
    return %c0_i32, %c0_i32_0, %c0_i32_1 : i32, i32, i32
  }
  func.func @transform_17(%arg0: i32) -> (i32, i32) {
    %c0_i32 = arith.constant 0 : i32
    %c0_i32_0 = arith.constant 0 : i32
    %c0_i32_1 = arith.constant 0 : i32
    return %c0_i32, %c0_i32_0 : i32, i32
  }
}

</mosaic_0001>

<bundles_post_ra>
// kernel: univitar_encoder_forward.1
= control target key start
LH: loop header
LB: loop body
LE: loop exit
PB: predicated region body
PF: predicated region fallthrough
CT: control target
= control target key end

     0   :  { %s7829_s0 = inlined_call_operand.vmem [shape: f32[16,128], index: 0, kind: input, shape index: {}]   ;;  %s7830_s1 = inlined_call_operand.vmem [shape: f32[16,512], index: 1, kind: input, shape index: {}]   ;;  %s7831_s2 = inlined_call_operand.vmem [shape: f32[16,512], index: 2, kind: input, shape index: {}]   ;;  %s7832_s3 = inlined_call_operand.vmem [shape: f32[2,1,128], index: 3, kind: input, shape index: {}]   ;;  %s7833_s4 = inlined_call_operand.hbm [shape: bf16[2,128,1536], index: 4, kind: input, shape index: {}]   ;;  %s7834_s5 = inlined_call_operand.hbm [shape: f32[2,1,512], index: 5, kind: input, shape index: {}]   ;;  %s7835_s6 = inlined_call_operand.hbm [shape: f32[2,1,512], index: 6, kind: input, shape index: {}]   ;;  %s7836_s7 = inlined_call_operand.hbm [shape: bf16[2,512,128], index: 7, kind: input, shape index: {}]   ;;  %s7837_s8 = inlined_call_operand.hbm [shape: f32[2,1,128], index: 8, kind: input, shape index: {}]   ;;  %s7838_s9 = inlined_call_operand.hbm [shape: f32[2,1,128], index: 9, kind: input, shape index: {}]   ;;  %s7839_s10 = inlined_call_operand.hbm [shape: f32[2,1,128], index: 10, kind: input, shape index: {}]   ;;  %s7840_s11 = inlined_call_operand.hbm [shape: bf16[2,128,256], index: 11, kind: input, shape index: {}]   ;;  %s7841_s12 = inlined_call_operand.hbm [shape: f32[2,1,256], index: 12, kind: input, shape index: {}]   ;;  %s7842_s13 = inlined_call_operand.hbm [shape: f32[2,1,128], index: 13, kind: input, shape index: {}]   ;;  %s7843_s14 = inlined_call_operand.hbm [shape: bf16[2,128,128], index: 14, kind: input, shape index: {}]   ;;  %s7844_s15 = inlined_call_operand.hbm [shape: f32[2,1,128], index: 15, kind: input, shape index: {}]   ;;  %s7845_s16 = inlined_call_operand.hbm [shape: f32[2,1,128], index: 16, kind: input, shape index: {}]   ;;  %s7846_s17 = inlined_call_operand.vmem [shape: f32[16,128], index: 17, kind: output, shape index: {}]  }
   0x1   :  { %7877 = sst [smem:[#allocation39_spill]] %s7829_s0 }
   0x2   :  { %7878 = sst [smem:[#allocation40_spill]] %s7830_s1 }
   0x3   :  { %22 = vsyncpa [#allocation3], 0 }
   0x4   :  { %23 = vsyncpa [#allocation5], 0 }
   0x5   :  { %24 = vsyncpa [#allocation8], 0 }
   0x6   :  { %25 = vsyncpa [#allocation11], 0 }
   0x7   :  { %26 = vsyncpa [#allocation14], 0 }
   0x8   :  { %27 = vsyncpa [#allocation17], 0 }
   0x9   :  { %28 = vsyncpa [#allocation20], 0  ;;  %s6353_s24 = smov [#allocation4]   ;;  %s6053_s28 = scalar_lea.hbm %s7834_s5, 128 }
   0xa   :  { %s54_s25 = sshll.u32 %s6353_s24, 4  ;;  %p6054_p0 = scmp.ne.s32.totalorder %s7834_s5, %s6053_s28  ;;  %s55_s25 = int_to_ptr.vmem [resolvable:$true] %s54_s25 }
   0xb   :  { %p6057_p1 = scmp.lt.u32.totalorder %s6053_s28, %s7834_s5 }
   0xd   :  { %p6059_p2 = pnand %p6057_p1, %p6054_p0 }
   0xf   :  { %6062 = shalt.err (!%p6059_p2)
}
  0x10   :  { %s6063_s19 = scalar_lea.vmem %s55_s25, 128  ;;  %p6068_p4 = scmp.lt.s32.totalorder %s55_s25, %s55_s25 }
  0x11   :  { %p6064_p3 = scmp.ne.s32.totalorder %s55_s25, %s6063_s19  ;;  %p6069_p5 = scmp.lt.s32.totalorder %s6063_s19, %s6063_s19 }
  0x13   :  { %p6070_p6 = por %p6069_p5, %p6068_p4 }
  0x15   :  { %p6071_p7 = pnand %p6070_p6, %p6064_p3 }
  0x17   :  { %6074 = shalt.err (!%p6071_p7)
}
  0x18   :  { %s7849_s1 = smov 64   ;;  %s7851_s20 = smov 4  }
  0x19   :  { %60 = dma.hbm_to_vmem [thread:$0]  %s7834_s5, 128, %s55_s25, [#allocation5], %s7849_s1, %s7849_s1, %s7851_s20  }
  0x1a   :  { %s6356_s23 = smov [#allocation7]   ;;  %s6075_s28 = scalar_lea.hbm %s7836_s7, 8192 }
  0x1b   :  { %s78_s24 = sshll.u32 %s6356_s23, 4  ;;  %p6076_p8 = scmp.ne.s32.totalorder %s7836_s7, %s6075_s28  ;;  %s79_s24 = int_to_ptr.vmem [resolvable:$true] %s78_s24 }
  0x1c   :  { %p6079_p9 = scmp.lt.u32.totalorder %s6075_s28, %s7836_s7 }
  0x1e   :  { %p6081_p10 = pnand %p6079_p9, %p6076_p8 }
  0x20   :  { %6084 = shalt.err (!%p6081_p10)
}
  0x21   :  { %s6085_s19 = scalar_lea.vmem %s79_s24, 8192  ;;  %p6090_p12 = scmp.lt.s32.totalorder %s79_s24, %s79_s24 }
  0x22   :  { %p6086_p11 = scmp.ne.s32.totalorder %s79_s24, %s6085_s19  ;;  %p6091_p13 = scmp.lt.s32.totalorder %s6085_s19, %s6085_s19 }
  0x24   :  { %p6092_p0 = por %p6091_p13, %p6090_p12 }
  0x26   :  { %p6093_p1 = pnand %p6092_p0, %p6086_p11 }
  0x28   :  { %6096 = shalt.err (!%p6093_p1)
}
  0x29   :  { %84 = dma.hbm_to_vmem [thread:$0]  %s7836_s7, 8192, %s79_s24, [#allocation8], %s7849_s1, %s7849_s1, %s7851_s20  }
  0x2a   :  { %s6357_s21 = smov [#allocation10]   ;;  %s6358_s23 = smov [#allocation13]  }
  0x2b   :  { %s102_s22 = sshll.u32 %s6357_s21, 4  ;;  %s126_s26 = sshll.u32 %s6358_s23, 4  ;;  %s103_s22 = int_to_ptr.vmem [resolvable:$true] %s102_s22  ;;  %s6500_s26 = int_to_ptr.vmem [resolvable:$true] %s126_s26 }
  0x2c   :  { %s6097_s29 = scalar_lea.hbm %s7838_s9, 32 }
  0x2d   :  { %p6098_p2 = scmp.ne.s32.totalorder %s7838_s9, %s6097_s29  ;;  %p6101_p3 = scmp.lt.u32.totalorder %s6097_s29, %s7838_s9 }
  0x2f   :  { %p6103_p4 = pnand %p6101_p3, %p6098_p2 }
  0x31   :  { %6106 = shalt.err (!%p6103_p4)
}
  0x32   :  { %s6107_s7 = scalar_lea.vmem %s103_s22, 32  ;;  %p6112_p6 = scmp.lt.s32.totalorder %s103_s22, %s103_s22 }
  0x33   :  { %p6108_p5 = scmp.ne.s32.totalorder %s103_s22, %s6107_s7  ;;  %p6113_p7 = scmp.lt.s32.totalorder %s6107_s7, %s6107_s7 }
  0x35   :  { %p6114_p8 = por %p6113_p7, %p6112_p6 }
  0x37   :  { %p6115_p9 = pnand %p6114_p8, %p6108_p5 }
  0x39   :  { %6118 = shalt.err (!%p6115_p9)
}
  0x3a   :  { %s6359_s24 = smov 16   ;;  %s6360_s5 = smov 1  }
  0x3b   :  { %108 = dma.hbm_to_vmem [thread:$0]  %s7838_s9, 32, %s103_s22, [#allocation11], %s6359_s24, %s6359_s24, %s6360_s5  }
  0x3c   :  { %s6119_s28 = scalar_lea.hbm %s7840_s11, 4096 }
  0x3d   :  { %p6120_p10 = scmp.ne.s32.totalorder %s7840_s11, %s6119_s28  ;;  %p6123_p11 = scmp.lt.u32.totalorder %s6119_s28, %s7840_s11 }
  0x3f   :  { %p6125_p12 = pnand %p6123_p11, %p6120_p10 }
  0x41   :  { %6128 = shalt.err (!%p6125_p12)
}
  0x42   :  { %s6129_s19 = scalar_lea.vmem %s6500_s26, 4096  ;;  %p6134_p0 = scmp.lt.s32.totalorder %s6500_s26, %s6500_s26 }
  0x43   :  { %p6130_p13 = scmp.ne.s32.totalorder %s6500_s26, %s6129_s19  ;;  %p6135_p1 = scmp.lt.s32.totalorder %s6129_s19, %s6129_s19 }
  0x45   :  { %p6136_p2 = por %p6135_p1, %p6134_p0 }
  0x47   :  { %p6137_p3 = pnand %p6136_p2, %p6130_p13 }
  0x49   :  { %6140 = shalt.err (!%p6137_p3)
}
  0x4a   :  { %s6361_s9 = smov 128   ;;  %s6362_s22 = smov 8  }
  0x4b   :  { %132 = dma.hbm_to_vmem [thread:$0]  %s7840_s11, 4096, %s6500_s26, [#allocation14], %s6361_s9, %s6361_s9, %s6362_s22  }
  0x4c   :  { %s6363_s21 = smov [#allocation16]   ;;  %s6364_s27 = smov [#allocation19]  }
  0x4d   :  { %s150_s23 = sshll.u32 %s6363_s21, 4  ;;  %s174_s28 = sshll.u32 %s6364_s27, 4  ;;  %s151_s23 = int_to_ptr.vmem [resolvable:$true] %s150_s23  ;;  %s6534_s28 = int_to_ptr.vmem [resolvable:$true] %s174_s28 }
  0x4e   :  { %s6141_s30 = scalar_lea.hbm %s7842_s13, 32 }
  0x4f   :  { %p6142_p4 = scmp.ne.s32.totalorder %s7842_s13, %s6141_s30  ;;  %p6145_p5 = scmp.lt.u32.totalorder %s6141_s30, %s7842_s13 }
  0x51   :  { %p6147_p6 = pnand %p6145_p5, %p6142_p4 }
  0x53   :  { %6150 = shalt.err (!%p6147_p6)
}
  0x54   :  { %s6151_s11 = scalar_lea.vmem %s151_s23, 32  ;;  %p6156_p8 = scmp.lt.s32.totalorder %s151_s23, %s151_s23 }
  0x55   :  { %p6152_p7 = scmp.ne.s32.totalorder %s151_s23, %s6151_s11  ;;  %p6157_p9 = scmp.lt.s32.totalorder %s6151_s11, %s6151_s11 }
  0x57   :  { %p6158_p10 = por %p6157_p9, %p6156_p8 }
  0x59   :  { %p6159_p11 = pnand %p6158_p10, %p6152_p7 }
  0x5b   :  { %6162 = shalt.err (!%p6159_p11)
}
  0x5c   :  { %156 = dma.hbm_to_vmem [thread:$0]  %s7842_s13, 32, %s151_s23, [#allocation17], %s6359_s24, %s6359_s24, %s6360_s5  }
  0x5d   :  { %s6163_s1 = scalar_lea.hbm %s7844_s15, 32 }
  0x5e   :  { %p6164_p12 = scmp.ne.s32.totalorder %s7844_s15, %s6163_s1  ;;  %p6167_p13 = scmp.lt.u32.totalorder %s6163_s1, %s7844_s15 }
  0x60   :  { %p6169_p0 = pnand %p6167_p13, %p6164_p12 }
  0x62   :  { %6172 = shalt.err (!%p6169_p0)
}
  0x63   :  { %s6173_s29 = scalar_lea.vmem %s6534_s28, 32  ;;  %p6178_p2 = scmp.lt.s32.totalorder %s6534_s28, %s6534_s28 }
  0x64   :  { %p6174_p1 = scmp.ne.s32.totalorder %s6534_s28, %s6173_s29  ;;  %p6179_p3 = scmp.lt.s32.totalorder %s6173_s29, %s6173_s29 }
  0x66   :  { %p6180_p4 = por %p6179_p3, %p6178_p2 }
  0x68   :  { %p6181_p5 = pnand %p6180_p4, %p6174_p1 }
  0x6a   :  { %6184 = shalt.err (!%p6181_p5)
}
  0x6b   :  { %180 = dma.hbm_to_vmem [thread:$0]  %s7844_s15, 32, %s6534_s28, [#allocation20], %s6359_s24, %s6359_s24, %s6360_s5  }
  0x6c   :  { %s6365_s0 = smov [#allocation2]   ;;  %s6185_s11 = scalar_lea.hbm %s7833_s4, 24576 }
  0x6d   :  { %s42_s30 = sshll.u32 %s6365_s0, 4  ;;  %p6186_p6 = scmp.ne.s32.totalorder %s7833_s4, %s6185_s11  ;;  %s43_s30 = int_to_ptr.vmem [resolvable:$true] %s42_s30 }
  0x6e   :  { %p6189_p7 = scmp.lt.u32.totalorder %s6185_s11, %s7833_s4 }
  0x70   :  { %p6191_p8 = pnand %p6189_p7, %p6186_p6 }
  0x72   :  { %6194 = shalt.err (!%p6191_p8)
}
  0x73   :  { %s6195_s1 = scalar_lea.vmem %s43_s30, 24576  ;;  %p6200_p10 = scmp.lt.s32.totalorder %s43_s30, %s43_s30 }
  0x74   :  { %p6196_p9 = scmp.ne.s32.totalorder %s43_s30, %s6195_s1  ;;  %p6201_p11 = scmp.lt.s32.totalorder %s6195_s1, %s6195_s1 }
  0x76   :  { %p6202_p12 = por %p6201_p11, %p6200_p10 }
  0x78   :  { %p6203_p13 = pnand %p6202_p12, %p6196_p9 }
  0x7a   :  { %6206 = shalt.err (!%p6203_p13)
}
  0x7b   :  { %s6366_s15 = smov 768   ;;  %s6367_s28 = smov 48  }
  0x7c   :  { %48 = dma.hbm_to_vmem [thread:$0]  %s7833_s4, 24576, %s43_s30, [#allocation3], %s6366_s15, %s6366_s15, %s6367_s28  }
  0x7d   :  { %s6368_s21 = smov [#allocation6]   ;;  %s6369_s29 = smov [#allocation9]  }
  0x7e   :  { %s66_s27 = sshll.u32 %s6368_s21, 4  ;;  %s90_s13 = sshll.u32 %s6369_s29, 4  ;;  %s67_s27 = int_to_ptr.vmem [resolvable:$true] %s66_s27  ;;  %s91_s13 = int_to_ptr.vmem [resolvable:$true] %s90_s13 }
  0x7f   :  { %s6207_s18 = scalar_lea.hbm %s7835_s6, 128 }
  0x80   :  { %p6208_p0 = scmp.ne.s32.totalorder %s7835_s6, %s6207_s18  ;;  %p6211_p1 = scmp.lt.u32.totalorder %s6207_s18, %s7835_s6 }
  0x82   :  { %p6213_p2 = pnand %p6211_p1, %p6208_p0 }
  0x84   :  { %6216 = shalt.err (!%p6213_p2)
}
  0x85   :  { %s6217_s4 = scalar_lea.vmem %s67_s27, 128  ;;  %p6222_p4 = scmp.lt.s32.totalorder %s67_s27, %s67_s27 }
  0x86   :  { %p6218_p3 = scmp.ne.s32.totalorder %s67_s27, %s6217_s4  ;;  %p6223_p5 = scmp.lt.s32.totalorder %s6217_s4, %s6217_s4 }
  0x88   :  { %p6224_p6 = por %p6223_p5, %p6222_p4 }
  0x8a   :  { %p6225_p7 = pnand %p6224_p6, %p6218_p3 }
  0x8c   :  { %6228 = shalt.err (!%p6225_p7)
}
  0x8d   :  { %s7879_s30 = smov 4   ;;  %s7880_s22 = smov 64  }
  0x8e   :  { %72 = dma.hbm_to_vmem [thread:$0]  %s7835_s6, 128, %s67_s27, [#allocation5], %s7880_s22, %s7880_s22, %s7879_s30  }
  0x8f   :  { %s6229_s20 = scalar_lea.hbm %s7837_s8, 32 }
  0x90   :  { %p6230_p8 = scmp.ne.s32.totalorder %s7837_s8, %s6229_s20  ;;  %p6233_p9 = scmp.lt.u32.totalorder %s6229_s20, %s7837_s8 }
  0x92   :  { %p6235_p10 = pnand %p6233_p9, %p6230_p8 }
  0x94   :  { %6238 = shalt.err (!%p6235_p10)
}
  0x95   :  { %s6239_s0 = scalar_lea.vmem %s91_s13, 32  ;;  %p6244_p12 = scmp.lt.s32.totalorder %s91_s13, %s91_s13 }
  0x96   :  { %p6240_p11 = scmp.ne.s32.totalorder %s91_s13, %s6239_s0  ;;  %p6245_p13 = scmp.lt.s32.totalorder %s6239_s0, %s6239_s0 }
  0x98   :  { %p6246_p0 = por %p6245_p13, %p6244_p12 }
  0x9a   :  { %p6247_p1 = pnand %p6246_p0, %p6240_p11 }
  0x9c   :  { %6250 = shalt.err (!%p6247_p1)
}
  0x9d   :  { %96 = dma.hbm_to_vmem [thread:$0]  %s7837_s8, 32, %s91_s13, [#allocation8], %s6359_s24, %s6359_s24, %s6360_s5  }
  0x9e   :  { %s6370_s18 = smov [#allocation12]   ;;  %s6371_s11 = smov [#allocation15]  }
  0x9f   :  { %s114_s19 = sshll.u32 %s6370_s18, 4  ;;  %s138_s26 = sshll.u32 %s6371_s11, 4  ;;  %s115_s19 = int_to_ptr.vmem [resolvable:$true] %s114_s19  ;;  %s139_s26 = int_to_ptr.vmem [resolvable:$true] %s138_s26 }
  0xa0   :  { %s6251_s7 = scalar_lea.hbm %s7839_s10, 32 }
  0xa1   :  { %p6252_p2 = scmp.ne.s32.totalorder %s7839_s10, %s6251_s7  ;;  %p6255_p3 = scmp.lt.u32.totalorder %s6251_s7, %s7839_s10 }
  0xa3   :  { %p6257_p4 = pnand %p6255_p3, %p6252_p2 }
  0xa5   :  { %6260 = shalt.err (!%p6257_p4)
}
  0xa6   :  { %s6261_s8 = scalar_lea.vmem %s115_s19, 32  ;;  %p6266_p6 = scmp.lt.s32.totalorder %s115_s19, %s115_s19 }
  0xa7   :  { %p6262_p5 = scmp.ne.s32.totalorder %s115_s19, %s6261_s8  ;;  %p6267_p7 = scmp.lt.s32.totalorder %s6261_s8, %s6261_s8 }
  0xa9   :  { %p6268_p8 = por %p6267_p7, %p6266_p6 }
  0xab   :  { %p6269_p9 = pnand %p6268_p8, %p6262_p5 }
  0xad   :  { %6272 = shalt.err (!%p6269_p9)
}
  0xae   :  { %120 = dma.hbm_to_vmem [thread:$0]  %s7839_s10, 32, %s115_s19, [#allocation11], %s6359_s24, %s6359_s24, %s6360_s5  }
  0xaf   :  { %s6273_s23 = scalar_lea.hbm %s7841_s12, 64 }
  0xb0   :  { %p6274_p10 = scmp.ne.s32.totalorder %s7841_s12, %s6273_s23  ;;  %p6277_p11 = scmp.lt.u32.totalorder %s6273_s23, %s7841_s12 }
  0xb2   :  { %p6279_p12 = pnand %p6277_p11, %p6274_p10 }
  0xb4   :  { %6282 = shalt.err (!%p6279_p12)
}
  0xb5   :  { %s6283_s11 = scalar_lea.vmem %s139_s26, 64  ;;  %p6288_p0 = scmp.lt.s32.totalorder %s139_s26, %s139_s26 }
  0xb6   :  { %p6284_p13 = scmp.ne.s32.totalorder %s139_s26, %s6283_s11  ;;  %p6289_p1 = scmp.lt.s32.totalorder %s6283_s11, %s6283_s11 }
  0xb8   :  { %p6290_p2 = por %p6289_p1, %p6288_p0 }
  0xba   :  { %p6291_p3 = pnand %p6290_p2, %p6284_p13 }
  0xbc   :  { %6294 = shalt.err (!%p6291_p3)
}
  0xbd   :  { %s6372_s10 = smov 32   ;;  %s6373_s19 = smov 2  }
  0xbe   :  { %144 = dma.hbm_to_vmem [thread:$0]  %s7841_s12, 64, %s139_s26, [#allocation14], %s6372_s10, %s6372_s10, %s6373_s19  }
  0xbf   :  { %s6374_s7 = smov [#allocation18]   ;;  %s6375_s15 = smov [#allocation21]  }
  0xc0   :  { %s162_s1 = sshll.u32 %s6374_s7, 4  ;;  %s186_s28 = sshll.u32 %s6375_s15, 4  ;;  %s163_s1 = int_to_ptr.vmem [resolvable:$true] %s162_s1  ;;  %s187_s28 = int_to_ptr.vmem [resolvable:$true] %s186_s28 }
  0xc1   :  { %s6295_s13 = scalar_lea.hbm %s7843_s14, 2048 }
  0xc2   :  { %p6296_p4 = scmp.ne.s32.totalorder %s7843_s14, %s6295_s13  ;;  %p6299_p5 = scmp.lt.u32.totalorder %s6295_s13, %s7843_s14 }
  0xc4   :  { %p6301_p6 = pnand %p6299_p5, %p6296_p4 }
  0xc6   :  { %6304 = shalt.err (!%p6301_p6)
}
  0xc7   :  { %s6305_s12 = scalar_lea.vmem %s163_s1, 2048  ;;  %p6310_p8 = scmp.lt.s32.totalorder %s163_s1, %s163_s1 }
  0xc8   :  { %p6306_p7 = scmp.ne.s32.totalorder %s163_s1, %s6305_s12  ;;  %p6311_p9 = scmp.lt.s32.totalorder %s6305_s12, %s6305_s12 }
  0xca   :  { %p6312_p10 = por %p6311_p9, %p6310_p8 }
  0xcc   :  { %p6313_p11 = pnand %p6312_p10, %p6306_p7 }
  0xce   :  { %6316 = shalt.err (!%p6313_p11)
}
  0xcf   :  { %168 = dma.hbm_to_vmem [thread:$0]  %s7843_s14, 2048, %s163_s1, [#allocation17], %s7880_s22, %s7880_s22, %s7879_s30  }
  0xd0   :  { %s6317_s18 = scalar_lea.hbm %s7845_s16, 32 }
  0xd1   :  { %p6318_p12 = scmp.ne.s32.totalorder %s7845_s16, %s6317_s18  ;;  %p6321_p13 = scmp.lt.u32.totalorder %s6317_s18, %s7845_s16 }
  0xd3   :  { %p6323_p0 = pnand %p6321_p13, %p6318_p12 }
  0xd5   :  { %6326 = shalt.err (!%p6323_p0)
}
  0xd6   :  { %s6327_s4 = scalar_lea.vmem %s187_s28, 32  ;;  %p6332_p2 = scmp.lt.s32.totalorder %s187_s28, %s187_s28 }
  0xd7   :  { %p6328_p1 = scmp.ne.s32.totalorder %s187_s28, %s6327_s4  ;;  %p6333_p3 = scmp.lt.s32.totalorder %s6327_s4, %s6327_s4 }
  0xd9   :  { %p6334_p4 = por %p6333_p3, %p6332_p2 }
  0xdb   :  { %p6335_p5 = pnand %p6334_p4, %p6328_p1 }
  0xdd   :  { %6338 = shalt.err (!%p6335_p5)
}
  0xde   :  { %192 = dma.hbm_to_vmem [thread:$0]  %s7845_s16, 32, %s187_s28, [#allocation20], %s6359_s24, %s6359_s24, %s6360_s5  }
  0xdf   :  { %6339 = dma.done.wait [#allocation3], 24576  }
  0xe0   :  { %6340 = vsyncadd [#allocation3], 4294942720 }
  0xe1   :  { %6341 = dma.done.wait [#allocation5], 256  }
  0xe2   :  { %6342 = vsyncadd [#allocation5], 4294967040 }
  0xe3   :  { %6343 = dma.done.wait [#allocation8], 8224  }
  0xe4   :  { %6344 = vsyncadd [#allocation8], 4294959072 }
  0xe5   :  { %6345 = dma.done.wait [#allocation11], 64  }
  0xe6   :  { %6346 = vsyncadd [#allocation11], 4294967232 }
  0xe7   :  { %6347 = dma.done.wait [#allocation14], 4160  }
  0xe8   :  { %6348 = vsyncadd [#allocation14], 4294963136 }
  0xe9   :  { %6349 = dma.done.wait [#allocation17], 2080  }
  0xea   :  { %6350 = vsyncadd [#allocation17], 4294965216 }
  0xeb   :  { %6351 = dma.done.wait [#allocation20], 64  }
  0xec   :  { %6352 = vsyncadd [#allocation20], 4294967232  ;;  %s7881_s15 = sld [smem:[#allocation39_spill]]  ;;  %v5499_v3 = vld [vmem:[#allocation2 + $0x4] ss:$48 sps:$4 sm:$0xff]   ;;  %v7853_v37 = vmov 0  }
  0xed   :  { %v5501_v4 = vld [vmem:[#allocation2 + $0xc] ss:$48 sps:$4 sm:$0xff]   ;;  %v5503_v5 = vld [vmem:[#allocation2] ss:$48 sps:$4 sm:$0xff]   ;;  %851 = vmatprep.subr.bf16.mxu0 %v5499_v3  ;;  %v5504_v7 = vld [vmem:[#allocation2 + $0x8] ss:$48 sps:$4 sm:$0xff]   ;;  %883 = vmatprep.mubr.bf16.mxu0 %v7853_v37 }
  0xee   :  { %894 = vmatprep.subr.bf16.mxu1 %v5501_v4  ;;  %852 = vmatpush1.bf16.msra.mxu0 %v5503_v5  ;;  %v5505_v8 = vld [vmem:[#allocation2 + $0x64] ss:$48 sps:$4 sm:$0xff]   ;;  %v5507_v9 = vld [vmem:[#allocation2 + $0x6c] ss:$48 sps:$4 sm:$0xff]   ;;  %v5509_v10 = vld [vmem:[#allocation2 + $0x60] ss:$48 sps:$4 sm:$0xff]  }
  0xef   :  { %895 = vmatpush1.bf16.msra.mxu1 %v5504_v7  ;;  %v5510_v11 = vld [vmem:[#allocation2 + $0x68] ss:$48 sps:$4 sm:$0xff]   ;;  %853 = vmatprep.subr.bf16.mxu0 %v5505_v8  ;;  %v5511_v12 = vld [vmem:[#allocation2 + $0xc4] ss:$48 sps:$4 sm:$0xff]   ;;  %v5513_v13 = vld [vmem:[#allocation2 + $0xcc] ss:$48 sps:$4 sm:$0xff]  }
  0xf0   :  { %896 = vmatprep.subr.bf16.mxu1 %v5507_v9  ;;  %v5515_v14 = vld [vmem:[#allocation2 + $0xc0] ss:$48 sps:$4 sm:$0xff]   ;;  %v5516_v15 = vld [vmem:[#allocation2 + $0xc8] ss:$48 sps:$4 sm:$0xff]   ;;  %v5517_v16 = vld [vmem:[#allocation2 + $0x124] ss:$48 sps:$4 sm:$0xff]   ;;  %926 = vmatprep.mubr.bf16.mxu1 %v7853_v37 }
  0xf1   :  { %v5519_v17 = vld [vmem:[#allocation2 + $0x12c] ss:$48 sps:$4 sm:$0xff]   ;;  %v5521_v18 = vld [vmem:[#allocation2 + $0x120] ss:$48 sps:$4 sm:$0xff]   ;;  %v5522_v19 = vld [vmem:[#allocation2 + $0x128] ss:$48 sps:$4 sm:$0xff]  }
  0xf2   :  { %v6673_v0 = vld [vmem:[%s7881_s15] sm:$0xff]  ;;  %v6678_v1 = vld [vmem:[%s7881_s15 + $0x8] sm:$0xff]  ;;  %854 = vmatpush1.bf16.msra.mxu0 %v5509_v10  ;;  %s6378_s20 = smov 124   ;;  %s7888_s25 = sld [smem:[#allocation40_spill]]  ;;  %vm6379_vm2 = vmmov 0   ;;  %vm1458_vm3 = vcmask 130048  }
  0xf3   :  { %v252_v2 = vmul.f32 %v6673_v0, %v6673_v0  ;;  %v253_v6 = vmul.f32 %v6678_v1, %v6678_v1  ;;  %897 = vmatpush1.bf16.msra.mxu1 %v5510_v11  ;;  %855 = vmatprep.subr.bf16.mxu0 %v5511_v12  ;;  %v5523_v20 = vld [vmem:[#allocation2 + $0x184] ss:$48 sps:$4 sm:$0xff]   ;;  %v5525_v21 = vld [vmem:[#allocation2 + $0x18c] ss:$48 sps:$4 sm:$0xff]   ;;  %v5527_v22 = vld [vmem:[#allocation2 + $0x180] ss:$48 sps:$4 sm:$0xff]  }
  0xf4   :  { %898 = vmatprep.subr.bf16.mxu1 %v5513_v13  ;;  %v5528_v23 = vld [vmem:[#allocation2 + $0x188] ss:$48 sps:$4 sm:$0xff]   ;;  %v5529_v24 = vld [vmem:[#allocation2 + $0x1e4] ss:$48 sps:$4 sm:$0xff]   ;;  %v5531_v25 = vld [vmem:[#allocation2 + $0x1ec] ss:$48 sps:$4 sm:$0xff]  }
  0xf5   :  { %254 = vadd.xlane.f32.xlu0 %v252_v2  ;;  %v5533_v26 = vld [vmem:[#allocation2 + $0x1e0] ss:$48 sps:$4 sm:$0xff]   ;;  %v5534_v27 = vld [vmem:[#allocation2 + $0x1e8] ss:$48 sps:$4 sm:$0xff]   ;;  %v5535_v28 = vld [vmem:[#allocation2 + $0x244] ss:$48 sps:$4 sm:$0xff]  }
  0xf6   :  { %856 = vmatpush1.bf16.msra.mxu0 %v5515_v14  ;;  %v5537_v29 = vld [vmem:[#allocation2 + $0x24c] ss:$48 sps:$4 sm:$0xff]   ;;  %v5539_v30 = vld [vmem:[#allocation2 + $0x240] ss:$48 sps:$4 sm:$0xff]   ;;  %v5540_v31 = vld [vmem:[#allocation2 + $0x248] ss:$48 sps:$4 sm:$0xff]  }
  0xf7   :  { %899 = vmatpush1.bf16.msra.mxu1 %v5516_v15  ;;  %857 = vmatprep.subr.bf16.mxu0 %v5517_v16  ;;  %v5541_v32 = vld [vmem:[#allocation2 + $0x2a4] ss:$48 sps:$4 sm:$0xff]   ;;  %v5543_v33 = vld [vmem:[#allocation2 + $0x2ac] ss:$48 sps:$4 sm:$0xff]   ;;  %v5545_v34 = vld [vmem:[#allocation2 + $0x2a0] ss:$48 sps:$4 sm:$0xff]  }
  0xf8   :  { %900 = vmatprep.subr.bf16.mxu1 %v5519_v17  ;;  %v5546_v35 = vld [vmem:[#allocation2 + $0x2a8] ss:$48 sps:$4 sm:$0xff]   ;;  %v5549_v36 = vld [vmem:[#allocation2 + $0x14] ss:$48 sps:$4 sm:$0xff]   ;;  %v5552_v38 = vld [vmem:[#allocation2 + $0x1c] ss:$48 sps:$4 sm:$0xff]  }
  0xf9   :  { %256 = vadd.xlane.f32.xlu0 %v253_v6  ;;  %v4867_v48 = vld [vmem:[%s7832_s3] ss:$0 sm:$0xff]  ;;  %v5550_v53 = vld [vmem:[#allocation2 + $0x18] ss:$48 sps:$4 sm:$0xff]   ;;  %v5555_v55 = vld [vmem:[#allocation2 + $0x74] ss:$48 sps:$4 sm:$0xff]  }
  0xfa   :  { %858 = vmatpush1.bf16.msra.mxu0 %v5521_v18  ;;  %v5547_v52 = vld [vmem:[#allocation2 + $0x10] ss:$48 sps:$4 sm:$0xff]   ;;  %v5558_v56 = vld [vmem:[#allocation2 + $0x7c] ss:$48 sps:$4 sm:$0xff]   ;;  %v5556_v58 = vld [vmem:[#allocation2 + $0x78] ss:$48 sps:$4 sm:$0xff]  }
  0xfb   :  { %901 = vmatpush1.bf16.msra.mxu1 %v5522_v19  ;;  %859 = vmatprep.subr.bf16.mxu0 %v5523_v20  ;;  %v5553_v57 = vld [vmem:[#allocation2 + $0x70] ss:$48 sps:$4 sm:$0xff]   ;;  %v5561_v59 = vld [vmem:[#allocation2 + $0xd4] ss:$48 sps:$4 sm:$0xff]   ;;  %v5564_v60 = vld [vmem:[#allocation2 + $0xdc] ss:$48 sps:$4 sm:$0xff]  }
  0xfc   :  { %902 = vmatprep.subr.bf16.mxu1 %v5525_v21  ;;  %v5559_v61 = vld [vmem:[#allocation2 + $0xd0] ss:$48 sps:$4 sm:$0xff]   ;;  %v5562_v62 = vld [vmem:[#allocation2 + $0xd8] ss:$48 sps:$4 sm:$0xff]   ;;  %v5567_v63 = vld [vmem:[#allocation2 + $0x134] ss:$48 sps:$4 sm:$0xff]  }
  0xfd   :  { %v5568_v2 = vld [vmem:[#allocation2 + $0x138] ss:$48 sps:$4 sm:$0xff]   ;;  %v5573_v3 = vld [vmem:[#allocation2 + $0x194] ss:$48 sps:$4 sm:$0xff]   ;;  %v5576_v4 = vld [vmem:[#allocation2 + $0x19c] ss:$48 sps:$4 sm:$0xff]  }
  0xfe   :  { %860 = vmatpush1.bf16.msra.mxu0 %v5527_v22  ;;  %v5571_v5 = vld [vmem:[#allocation2 + $0x190] ss:$48 sps:$4 sm:$0xff]   ;;  %v5574_v6 = vld [vmem:[#allocation2 + $0x198] ss:$48 sps:$4 sm:$0xff]   ;;  %v5579_v7 = vld [vmem:[#allocation2 + $0x1f4] ss:$48 sps:$4 sm:$0xff]  }
  0xff   :  { %903 = vmatpush1.bf16.msra.mxu1 %v5528_v23  ;;  %861 = vmatprep.subr.bf16.mxu0 %v5529_v24  ;;  %v5582_v8 = vld [vmem:[#allocation2 + $0x1fc] ss:$48 sps:$4 sm:$0xff]   ;;  %v5577_v9 = vld [vmem:[#allocation2 + $0x1f0] ss:$48 sps:$4 sm:$0xff]   ;;  %v5580_v10 = vld [vmem:[#allocation2 + $0x1f8] ss:$48 sps:$4 sm:$0xff]  }
 0x100   :  { %904 = vmatprep.subr.bf16.mxu1 %v5531_v25  ;;  %v5585_v11 = vld [vmem:[#allocation2 + $0x254] ss:$48 sps:$4 sm:$0xff]   ;;  %v5588_v12 = vld [vmem:[#allocation2 + $0x25c] ss:$48 sps:$4 sm:$0xff]   ;;  %v5583_v13 = vld [vmem:[#allocation2 + $0x250] ss:$48 sps:$4 sm:$0xff]  }
 0x101   :  { %v5586_v14 = vld [vmem:[#allocation2 + $0x258] ss:$48 sps:$4 sm:$0xff]   ;;  %v5591_v15 = vld [vmem:[#allocation2 + $0x2b4] ss:$48 sps:$4 sm:$0xff]   ;;  %v5594_v16 = vld [vmem:[#allocation2 + $0x2bc] ss:$48 sps:$4 sm:$0xff]  }
 0x102   :  { %862 = vmatpush1.bf16.msra.mxu0 %v5533_v26  ;;  %v5589_v17 = vld [vmem:[#allocation2 + $0x2b0] ss:$48 sps:$4 sm:$0xff]   ;;  %v5592_v18 = vld [vmem:[#allocation2 + $0x2b8] ss:$48 sps:$4 sm:$0xff]   ;;  %v5597_v19 = vld [vmem:[#allocation2 + $0x24] ss:$48 sps:$4 sm:$0xff]  }
 0x103   :  { %905 = vmatpush1.bf16.msra.mxu1 %v5534_v27  ;;  %863 = vmatprep.subr.bf16.mxu0 %v5535_v28  ;;  %v5600_v20 = vld [vmem:[#allocation2 + $0x2c] ss:$48 sps:$4 sm:$0xff]   ;;  %v5595_v21 = vld [vmem:[#allocation2 + $0x20] ss:$48 sps:$4 sm:$0xff]   ;;  %v5598_v22 = vld [vmem:[#allocation2 + $0x28] ss:$48 sps:$4 sm:$0xff]  }
 0x104   :  { %906 = vmatprep.subr.bf16.mxu1 %v5537_v29  ;;  %v5603_v23 = vld [vmem:[#allocation2 + $0x84] ss:$48 sps:$4 sm:$0xff]   ;;  %v5606_v24 = vld [vmem:[#allocation2 + $0x8c] ss:$48 sps:$4 sm:$0xff]   ;;  %v5601_v25 = vld [vmem:[#allocation2 + $0x80] ss:$48 sps:$4 sm:$0xff]  }
 0x105   :  { %v5604_v26 = vld [vmem:[#allocation2 + $0x88] ss:$48 sps:$4 sm:$0xff]   ;;  %v5609_v27 = vld [vmem:[#allocation2 + $0xe4] ss:$48 sps:$4 sm:$0xff]   ;;  %v5612_v28 = vld [vmem:[#allocation2 + $0xec] ss:$48 sps:$4 sm:$0xff]  }
 0x106   :  { %864 = vmatpush1.bf16.msra.mxu0 %v5539_v30  ;;  %v5607_v29 = vld [vmem:[#allocation2 + $0xe0] ss:$48 sps:$4 sm:$0xff]   ;;  %v5610_v30 = vld [vmem:[#allocation2 + $0xe8] ss:$48 sps:$4 sm:$0xff]  }
 0x107   :  { %907 = vmatpush1.bf16.msra.mxu1 %v5540_v31  ;;  %865 = vmatprep.subr.bf16.mxu0 %v5541_v32  ;;  %v5615_v31 = vld [vmem:[#allocation2 + $0x144] ss:$48 sps:$4 sm:$0xff]   ;;  %v5618_v32 = vld [vmem:[#allocation2 + $0x14c] ss:$48 sps:$4 sm:$0xff]  }
 0x108   :  { %908 = vmatprep.subr.bf16.mxu1 %v5543_v33  ;;  %v5613_v33 = vld [vmem:[#allocation2 + $0x140] ss:$48 sps:$4 sm:$0xff]  }
 0x10a   :  { %866 = vmatpush1.bf16.msra.mxu0 %v5545_v34  ;;  %v5616_v34 = vld [vmem:[#allocation2 + $0x148] ss:$48 sps:$4 sm:$0xff]  }
 0x10b   :  { %909 = vmatpush1.bf16.msra.mxu1 %v5546_v35  ;;  %937 = vmatprep.subr.bf16.mxu0 %v5549_v36  ;;  %v5621_v35 = vld [vmem:[#allocation2 + $0x1a4] ss:$48 sps:$4 sm:$0xff]   ;;  %v5624_v36 = vld [vmem:[#allocation2 + $0x1ac] ss:$48 sps:$4 sm:$0xff]  }
 0x10c   :  { %980 = vmatprep.subr.bf16.mxu1 %v5552_v38  ;;  %v5619_v38 = vld [vmem:[#allocation2 + $0x1a0] ss:$48 sps:$4 sm:$0xff]  }
 0x182   :  { %v255_v39 = vpop.xlane.xlu0 %254 }
 0x183   :  { %v258_v40 = vmul.f32 0.03125, %v255_v39  ;;  %v5622_v39 = vld [vmem:[#allocation2 + $0x1a8] ss:$48 sps:$4 sm:$0xff]  }
 0x185   :  { %v260_v41 = vadd.f32 1e-06, %v258_v40  ;;  %v5627_v40 = vld [vmem:[#allocation2 + $0x204] ss:$48 sps:$4 sm:$0xff]  }
 0x186   :  { %v257_v42 = vpop.xlane.xlu0 %256 }
 0x187   :  { %5915 = vrsqrt.f32 %v260_v41  ;;  %v259_v43 = vmul.f32 0.03125, %v257_v42  ;;  %v5630_v41 = vld [vmem:[#allocation2 + $0x20c] ss:$48 sps:$4 sm:$0xff]   ;;  %v5625_v42 = vld [vmem:[#allocation2 + $0x200] ss:$48 sps:$4 sm:$0xff]  }
 0x189   :  { %v261_v44 = vadd.f32 1e-06, %v259_v43  ;;  %v5628_v43 = vld [vmem:[#allocation2 + $0x208] ss:$48 sps:$4 sm:$0xff]  }
 0x18b   :  { %5917 = vrsqrt.f32 %v261_v44  ;;  %v5633_v44 = vld [vmem:[#allocation2 + $0x264] ss:$48 sps:$4 sm:$0xff]  }
 0x191   :  { %v5916_v45 = vpop.eup %5915 }
 0x192   :  { %v264_v46 = vmul.f32 %v5916_v45, %v6673_v0  ;;  %v5570_v0 = vld [vmem:[#allocation2 + $0x13c] ss:$48 sps:$4 sm:$0xff]  }
 0x193   :  { %v5636_v45 = vld [vmem:[#allocation2 + $0x26c] ss:$48 sps:$4 sm:$0xff]  }
 0x194   :  { %v272_v50 = vmul.f32 %v4867_v48, %v264_v46  ;;  %v5631_v46 = vld [vmem:[#allocation2 + $0x260] ss:$48 sps:$4 sm:$0xff]  }
 0x195   :  { %v5918_v47 = vpop.eup %5917 }
 0x196   :  { %v265_v49 = vmul.f32 %v5918_v47, %v6678_v1  ;;  %v5565_v1 = vld [vmem:[#allocation2 + $0x130] ss:$48 sps:$4 sm:$0xff]   ;;  %v5634_v47 = vld [vmem:[#allocation2 + $0x268] ss:$48 sps:$4 sm:$0xff]  }
 0x198   :  { %v273_v51 = vmul.f32 %v4867_v48, %v265_v49  ;;  %v5639_v48 = vld [vmem:[#allocation2 + $0x2c4] ss:$48 sps:$4 sm:$0xff]   ;;  %v5642_v49 = vld [vmem:[#allocation2 + $0x2cc] ss:$48 sps:$4 sm:$0xff]  }
 0x19a   :  { %v6691_v54 = vpack.c.bf16 %v273_v51, %v272_v50  ;;  %v5637_v50 = vld [vmem:[#allocation2 + $0x2c0] ss:$48 sps:$4 sm:$0xff]   ;;  %v5640_v51 = vld [vmem:[#allocation2 + $0x2c8] ss:$48 sps:$4 sm:$0xff]  }
 0x19c   :  { %884 = vmatmul.mubr.bf16.vlgmr.msra.gmra.mrb[0].mxu0 %v6691_v54  ;;  %927 = vmatmul.mubr.bf16.vlgmr.msra.gmra.mrb[0].mxu1 %v6691_v54 }
 0x19d   :  { %938 = vmatpush1.bf16.msra.mxu0 %v5547_v52  ;;  %981 = vmatpush1.bf16.msra.mxu1 %v5550_v53  ;;  %v7856_v52 = vmov 0.0  }
 0x19e   :  { %939 = vmatprep.subr.bf16.mxu0 %v5555_v55  ;;  %982 = vmatprep.subr.bf16.mxu1 %v5558_v56 }
 0x19f   :  { %969 = vmatprep.mubr.bf16.mxu0 %v7853_v37  ;;  %1012 = vmatprep.mubr.bf16.mxu1 %v7853_v37 }
 0x1a1   :  { %940 = vmatpush1.bf16.msra.mxu0 %v5553_v57  ;;  %983 = vmatpush1.bf16.msra.mxu1 %v5556_v58 }
 0x1a2   :  { %941 = vmatprep.subr.bf16.mxu0 %v5561_v59  ;;  %984 = vmatprep.subr.bf16.mxu1 %v5564_v60 }
 0x1a5   :  { %942 = vmatpush1.bf16.msra.mxu0 %v5559_v61  ;;  %985 = vmatpush1.bf16.msra.mxu1 %v5562_v62 }
 0x1a6   :  { %943 = vmatprep.subr.bf16.mxu0 %v5567_v63  ;;  %986 = vmatprep.subr.bf16.mxu1 %v5570_v0 }
 0x1a9   :  { %944 = vmatpush1.bf16.msra.mxu0 %v5565_v1  ;;  %987 = vmatpush1.bf16.msra.mxu1 %v5568_v2 }
 0x1aa   :  { %945 = vmatprep.subr.bf16.mxu0 %v5573_v3  ;;  %988 = vmatprep.subr.bf16.mxu1 %v5576_v4 }
 0x1ad   :  { %946 = vmatpush1.bf16.msra.mxu0 %v5571_v5  ;;  %989 = vmatpush1.bf16.msra.mxu1 %v5574_v6 }
 0x1ae   :  { %947 = vmatprep.subr.bf16.mxu0 %v5579_v7  ;;  %990 = vmatprep.subr.bf16.mxu1 %v5582_v8 }
 0x1b1   :  { %948 = vmatpush1.bf16.msra.mxu0 %v5577_v9  ;;  %991 = vmatpush1.bf16.msra.mxu1 %v5580_v10 }
 0x1b2   :  { %949 = vmatprep.subr.bf16.mxu0 %v5585_v11  ;;  %992 = vmatprep.subr.bf16.mxu1 %v5588_v12 }
 0x1b5   :  { %950 = vmatpush1.bf16.msra.mxu0 %v5583_v13  ;;  %993 = vmatpush1.bf16.msra.mxu1 %v5586_v14 }
 0x1b6   :  { %951 = vmatprep.subr.bf16.mxu0 %v5591_v15  ;;  %994 = vmatprep.subr.bf16.mxu1 %v5594_v16 }
 0x1b9   :  { %952 = vmatpush1.bf16.msra.mxu0 %v5589_v17  ;;  %995 = vmatpush1.bf16.msra.mxu1 %v5592_v18 }
 0x1ba   :  { %1023 = vmatprep.subr.bf16.mxu0 %v5597_v19  ;;  %1066 = vmatprep.subr.bf16.mxu1 %v5600_v20 }
 0x1bc   :  { %970 = vmatmul.mubr.bf16.vlgmr.msra.gmra.mrb[4].mxu0 %v6691_v54  ;;  %1013 = vmatmul.mubr.bf16.vlgmr.msra.gmra.mrb[4].mxu1 %v6691_v54 }
 0x1bd   :  { %1024 = vmatpush1.bf16.msra.mxu0 %v5595_v21  ;;  %1067 = vmatpush1.bf16.msra.mxu1 %v5598_v22 }
 0x1be   :  { %1025 = vmatprep.subr.bf16.mxu0 %v5603_v23  ;;  %1068 = vmatprep.subr.bf16.mxu1 %v5606_v24 }
 0x1bf   :  { %1055 = vmatprep.mubr.bf16.mxu0 %v7853_v37  ;;  %1098 = vmatprep.mubr.bf16.mxu1 %v7853_v37  ;;  %v6915_v37 = vld [vmem:[%s7888_s25 + $0x18] sm:$0xff] }
 0x1c1   :  { %1026 = vmatpush1.bf16.msra.mxu0 %v5601_v25  ;;  %1069 = vmatpush1.bf16.msra.mxu1 %v5604_v26 }
 0x1c2   :  { %1027 = vmatprep.subr.bf16.mxu0 %v5609_v27  ;;  %1070 = vmatprep.subr.bf16.mxu1 %v5612_v28 }
 0x1c5   :  { %1028 = vmatpush1.bf16.msra.mxu0 %v5607_v29  ;;  %1071 = vmatpush1.bf16.msra.mxu1 %v5610_v30 }
 0x1c6   :  { %1029 = vmatprep.subr.bf16.mxu0 %v5615_v31  ;;  %1072 = vmatprep.subr.bf16.mxu1 %v5618_v32 }
 0x1c9   :  { %1030 = vmatpush1.bf16.msra.mxu0 %v5613_v33  ;;  %1073 = vmatpush1.bf16.msra.mxu1 %v5616_v34  ;;  %v7855_v33 = vlaneseq }
 0x1ca   :  { %1031 = vmatprep.subr.bf16.mxu0 %v5621_v35  ;;  %1074 = vmatprep.subr.bf16.mxu1 %v5624_v36 }
 0x1cb   :  { %v6845_v36 = vand.u32 127, %v7855_v33 }
 0x1cd   :  { %1032 = vmatpush1.bf16.msra.mxu0 %v5619_v38  ;;  %1075 = vmatpush1.bf16.msra.mxu1 %v5622_v39  ;;  %vm1152_vm0 = vcmp.lt.s32.totalorder %v6845_v36, 124  ;;  %vm1127_vm1 = vcmp.lt.s32.totalorder %v6845_v36, 4 }
 0x1ce   :  { %1033 = vmatprep.subr.bf16.mxu0 %v5627_v40  ;;  %1076 = vmatprep.subr.bf16.mxu1 %v5630_v41 }
 0x1d1   :  { %1034 = vmatpush1.bf16.msra.mxu0 %v5625_v42  ;;  %1077 = vmatpush1.bf16.msra.mxu1 %v5628_v43 }
 0x1d2   :  { %1035 = vmatprep.subr.bf16.mxu0 %v5633_v44  ;;  %1078 = vmatprep.subr.bf16.mxu1 %v5636_v45 }
 0x1d5   :  { %1036 = vmatpush1.bf16.msra.mxu0 %v5631_v46  ;;  %1079 = vmatpush1.bf16.msra.mxu1 %v5634_v47  ;;  %v6866_v47 = vld [vmem:[%s7888_s25 + $0x20] sm:$0xff] }
 0x1d6   :  { %1037 = vmatprep.subr.bf16.mxu0 %v5639_v48  ;;  %1080 = vmatprep.subr.bf16.mxu1 %v5642_v49  ;;  %v6871_v48 = vld [vmem:[%s7831_s2 + $0x20] sm:$0xff]  ;;  %v6876_v49 = vld [vmem:[%s7831_s2 + $0x28] sm:$0xff] }
 0x1d9   :  { %1038 = vmatpush1.bf16.msra.mxu0 %v5637_v50  ;;  %1081 = vmatpush1.bf16.msra.mxu1 %v5640_v51  ;;  %v6883_v51 = vld [vmem:[%s7888_s25 + $0x30] sm:$0xff] }
 0x1da   :  { %5342 = vmatprep.subr.bf16.mxu1 %v7856_v52  ;;  %5336 = vmatprep.subr.bf16.mxu0 %v7856_v52 }
 0x1dc   :  { %1056 = vmatmul.mubr.bf16.vlgmr.msra.gmra.mrb[8].mxu0 %v6691_v54  ;;  %1099 = vmatmul.mubr.bf16.vlgmr.msra.gmra.mrb[8].mxu1 %v6691_v54 }
 0x26f   :  { %v6705_v53 = vpop.f32.mrb[0].mxu0  ;;  %v6707_v55 = vpop.f32.mrb[0].mxu1 }
 0x270   :  { %v6709_v56 = vpop.f32.mrb[1].mxu1  ;;  %1109 = vrot.lane.b32.xlu1 %v6705_v53, %s7879_s30  ;;  %v6713_v57 = vpop.f32.mrb[1].mxu0 }
 0x271   :  { %v6715_v58 = vpop.f32.mrb[2].mxu0  ;;  %v6717_v59 = vpop.f32.mrb[2].mxu1 }
 0x272   :  { %v6719_v54 = vpop.f32.mrb[3].mxu1  ;;  %1111 = vrot.lane.b32.xlu0 %v6715_v58, %s7879_s30  ;;  %v6723_v60 = vpop.f32.mrb[3].mxu0  ;;  %v1175_v16 = vmul.f32 %v6717_v59, %v6883_v51 }
 0x274   :  { %1136 = vrot.lane.b32.xlu1 %v6705_v53, %s6378_s20 }
 0x276   :  { %1138 = vrot.lane.b32.xlu0 %v6715_v58, %s6378_s20 }
 0x278   :  { %1144 = vrot.lane.b32.xlu1 %v6707_v55, %s6378_s20 }
 0x27a   :  { %1146 = vrot.lane.b32.xlu0 %v6717_v59, %s6378_s20 }
 0x27c   :  { %1113 = vrot.lane.b32.xlu1 %v6713_v57, %s7879_s30 }
 0x27e   :  { %1115 = vrot.lane.b32.xlu0 %v6723_v60, %s7879_s30 }
 0x280   :  { %1121 = vrot.lane.b32.xlu1 %v6709_v56, %s7879_s30 }
 0x282   :  { %1123 = vrot.lane.b32.xlu0 %v6719_v54, %s7879_s30 }
 0x284   :  { %1140 = vrot.lane.b32.xlu1 %v6713_v57, %s6378_s20 }
 0x286   :  { %1142 = vrot.lane.b32.xlu0 %v6723_v60, %s6378_s20 }
 0x28f   :  { %v6745_v61 = vpop.f32.mrb[4].mxu0  ;;  %v6747_v62 = vpop.f32.mrb[4].mxu1 }
 0x290   :  { %v6749_v63 = vpop.f32.mrb[5].mxu1  ;;  %1263 = vrot.lane.b32.xlu1 %v6745_v61, %s7879_s30  ;;  %v6753_v0 = vpop.f32.mrb[5].mxu0 }
 0x291   :  { %v6755_v1 = vpop.f32.mrb[6].mxu1  ;;  %1267 = vrot.lane.b32.xlu0 %v6753_v0, %s7879_s30  ;;  %v6759_v2 = vpop.f32.mrb[6].mxu0 }
 0x292   :  { %v6761_v3 = vpop.f32.mrb[7].mxu0  ;;  %v6763_v4 = vpop.f32.mrb[7].mxu1 }
 0x294   :  { %1287 = vrot.lane.b32.xlu1 %v6745_v61, %s6378_s20 }
 0x295   :  { %1297 = vrot.lane.b32.xlu0 %v6755_v1, %s6378_s20 }
 0x298   :  { %1295 = vrot.lane.b32.xlu1 %v6747_v62, %s6378_s20 }
 0x299   :  { %1273 = vrot.lane.b32.xlu0 %v6755_v1, %s7879_s30 }
 0x29c   :  { %1271 = vrot.lane.b32.xlu1 %v6747_v62, %s7879_s30 }
 0x29d   :  { %1293 = vrot.lane.b32.xlu0 %v6761_v3, %s6378_s20 }
 0x2a0   :  { %1275 = vrot.lane.b32.xlu1 %v6749_v63, %s7879_s30 }
 0x2a1   :  { %1301 = vrot.lane.b32.xlu0 %v6763_v4, %s6378_s20 }
 0x2a4   :  { %1291 = vrot.lane.b32.xlu1 %v6753_v0, %s6378_s20 }
 0x2a5   :  { %1119 = vrot.lane.b32.xlu0 %v6717_v59, %s7879_s30  ;;  %v6937_v59 = vld [vmem:[%s7831_s2] sm:$0xff] }
 0x2a8   :  { %1299 = vrot.lane.b32.xlu1 %v6749_v63, %s6378_s20 }
 0x2a9   :  { %1150 = vrot.lane.b32.xlu0 %v6719_v54, %s6378_s20 }
 0x2ac   :  { %1265 = vrot.lane.b32.xlu1 %v6759_v2, %s7879_s30 }
 0x2af   :  { %v1057_v5 = vpop.f32.mrb[8].mxu0  ;;  %v6791_v6 = vpop.f32.mrb[8].mxu1 }
 0x2b0   :  { %7882 = vst [vmem:[#allocation29_spill] sm:$0xff] %v6791_v6  ;;  %v6793_v7 = vpop.f32.mrb[9].mxu1  ;;  %1289 = vrot.lane.b32.xlu1 %v6759_v2, %s6378_s20  ;;  %v6797_v8 = vpop.f32.mrb[9].mxu0 }
 0x2b1   :  { %7883 = vst [vmem:[#allocation30_spill] sm:$0xff] %v6793_v7  ;;  %7884 = vst [vmem:[#allocation31_spill] sm:$0xff] %v6797_v8  ;;  %v1061_v9 = vpop.f32.mrb[10].mxu0  ;;  %v6799_v10 = vpop.f32.mrb[10].mxu1  ;;  %v1322_v7 = vmul.f32 %v6749_v63, %v6915_v37 }
 0x2b2   :  { %7885 = vst [vmem:[#allocation32_spill] sm:$0xff] %v6799_v10  ;;  %v1413_v11 = vpack.c.bf16 %v1061_v9, %v1057_v5  ;;  %v6803_v13 = vpop.f32.mrb[11].mxu0  ;;  %v6805_v14 = vpop.f32.mrb[11].mxu1  ;;  %v6888_v5 = vld [vmem:[%s7888_s25 + $0x28] sm:$0xff]  ;;  %v1173_v9 = vmul.f32 %v6715_v58, %v6866_v47 }
 0x2b3   :  { %7886 = vst [vmem:[#allocation33_spill] sm:$0xff] %v6803_v13  ;;  %7887 = vst [vmem:[#allocation34_spill] sm:$0xff] %v6805_v14 }
 0x2b4   :  { %1269 = vrot.lane.b32.xlu1 %v6761_v3, %s7879_s30  ;;  %5343 = vmatpush3.bf16.msra.mxu1 %v1413_v11 }
 0x2b5   :  { %5354 = vmatprep.subr.bf16.mxu1 %v7856_v52 }
 0x2b8   :  { %1277 = vrot.lane.b32.xlu1 %v6763_v4, %s7879_s30 }
 0x2bc   :  { %1117 = vrot.lane.b32.xlu1 %v6707_v55, %s7879_s30 }
 0x2c0   :  { %1148 = vrot.lane.b32.xlu1 %v6709_v56, %s6378_s20 }
 0x2e2   :  { %v6820_v17 = vpop.permute.xlu1 %1109 }
 0x2e4   :  { %v1112_v18 = vpop.permute.xlu0 %1111 }
 0x2e6   :  { %v6822_v19 = vpop.permute.xlu1 %1136 }
 0x2e8   :  { %v6824_v20 = vpop.permute.xlu0 %1138 }
 0x2ea   :  { %v6826_v21 = vpop.permute.xlu1 %1144 }
 0x2ec   :  { %v6828_v22 = vpop.permute.xlu0 %1146 }
 0x2ee   :  { %v6830_v23 = vpop.permute.xlu1 %1113 }
 0x2f0   :  { %v6832_v24 = vpop.permute.xlu0 %1115 }
 0x2f1   :  { %v1133_v42 = vsel %vm1127_vm1, %v1112_v18, %v6832_v24 }
 0x2f2   :  { %v6834_v25 = vpop.permute.xlu1 %1121 }
 0x2f4   :  { %v6836_v26 = vpop.permute.xlu0 %1123 }
 0x2f5   :  { %v1135_v43 = vsel %vm1127_vm1, %v6836_v26, %v1112_v18 }
 0x2f6   :  { %v6838_v27 = vpop.permute.xlu1 %1140 }
 0x2f8   :  { %v1143_v28 = vpop.permute.xlu0 %1142 }
 0x2f9   :  { %v1156_v39 = vsel %vm1152_vm0, %v1143_v28, %v6828_v22  ;;  %v1158_v40 = vsel %vm1152_vm0, %v6824_v20, %v1143_v28 }
 0x2fa   :  { %v1165_v44 = vadd.f32 %v1158_v40, %v1135_v43  ;;  %v1166_v45 = vadd.f32 %v1156_v39, %v1133_v42  ;;  %v6897_v39 = vld [vmem:[%s7888_s25] sm:$0xff] }
 0x2fb   :  { %v1319_v33 = vmul.f32 %v6745_v61, %v6897_v39 }
 0x2fc   :  { %v1181_v11 = vmul.f32 %v1165_v44, %v6871_v48  ;;  %v1182_v18 = vmul.f32 %v1166_v45, %v6876_v49  ;;  %v6910_v45 = vld [vmem:[%s7888_s25 + $0x10] sm:$0xff] }
 0x2fd   :  { %v1321_v52 = vmul.f32 %v6747_v62, %v6910_v45 }
 0x2fe   :  { %v6944_v61 = vadd.f32 %v1181_v11, %v1173_v9  ;;  %v6962_v9 = vld [vmem:[%s7831_s2 + $0x18] sm:$0xff] }
 0x302   :  { %v1264_v29 = vpop.permute.xlu1 %1263 }
 0x303   :  { %v1268_v30 = vpop.permute.xlu0 %1267 }
 0x304   :  { %v1283_v40 = vsel %vm1127_vm1, %v1264_v29, %v1268_v30 }
 0x306   :  { %v1288_v31 = vpop.permute.xlu1 %1287 }
 0x307   :  { %v6840_v32 = vpop.permute.xlu0 %1297 }
 0x30a   :  { %v1296_v34 = vpop.permute.xlu1 %1295 }
 0x30b   :  { %v6842_v35 = vpop.permute.xlu0 %1273 }
 0x30e   :  { %v1272_v38 = vpop.permute.xlu1 %1271 }
 0x30f   :  { %v6854_v41 = vpop.permute.xlu0 %1293 }
 0x312   :  { %v1276_v46 = vpop.permute.xlu1 %1275 }
 0x313   :  { %v6878_v50 = vpop.permute.xlu0 %1301  ;;  %v1285_v42 = vsel %vm1127_vm1, %v1276_v46, %v1264_v29  ;;  %v6920_v29 = vld [vmem:[%s7888_s25 + $0x8] sm:$0xff] }
 0x314   :  { %v1320_v14 = vmul.f32 %v6753_v0, %v6920_v29  ;;  %v1281_v0 = vsel %vm1127_vm1, %v1268_v30, %v1272_v38 }
 0x316   :  { %v1292_v28 = vpop.permute.xlu1 %1291 }
 0x317   :  { %v1305_v43 = vsel %vm1152_vm0, %v1292_v28, %v1296_v34  ;;  %v1307_v58 = vsel %vm1152_vm0, %v1288_v31, %v1292_v28  ;;  %v1120_v44 = vpop.permute.xlu0 %1119  ;;  %v1174_v28 = vmul.f32 %v6723_v60, %v6888_v5  ;;  %v6942_v60 = vld [vmem:[%s7831_s2 + $0x8] sm:$0xff] }
 0x318   :  { %v1311_v12 = vadd.f32 %v1307_v58, %v1285_v42  ;;  %v1312_v15 = vadd.f32 %v1305_v43, %v1283_v40  ;;  %v1279_v43 = vsel %vm1127_vm1, %v1272_v38, %v1276_v46  ;;  %v6957_v58 = vld [vmem:[%s7831_s2 + $0x10] sm:$0xff]  ;;  %v1131_v6 = vsel %vm1127_vm1, %v6832_v24, %v1120_v44 }
 0x319   :  { %v6946_v40 = vadd.f32 %v1182_v18, %v1174_v28  ;;  %v1129_v28 = vsel %vm1127_vm1, %v1120_v44, %v6836_v26 }
 0x31a   :  { %v1327_v62 = vmul.f32 %v1311_v12, %v6937_v59  ;;  %v1328_v63 = vmul.f32 %v1312_v15, %v6942_v60  ;;  %v1300_v42 = vpop.permute.xlu1 %1299 }
 0x31b   :  { %v1303_v12 = vsel %vm1152_vm0, %v1296_v34, %v1300_v42  ;;  %v1309_v15 = vsel %vm1152_vm0, %v1300_v42, %v1288_v31  ;;  %v1151_v30 = vpop.permute.xlu0 %1150  ;;  %v249_v34 = vld [vmem:[%s7831_s2 + $0x30] sm:$0xff]  ;;  %v250_v31 = vld [vmem:[%s7831_s2 + $0x38] sm:$0xff] }
 0x31c   :  { %v6968_v11 = vadd.f32 %v1327_v62, %v1319_v33  ;;  %v6970_v38 = vadd.f32 %v1328_v63, %v1320_v14  ;;  %v1313_v46 = vadd.f32 %v1303_v12, %v1281_v0  ;;  %v1314_v18 = vadd.f32 %v1309_v15, %v1279_v43  ;;  %v242_v42 = vld [vmem:[%s7888_s25 + $0x38] sm:$0xff] }
 0x31d   :  { %v1154_v14 = vsel %vm1152_vm0, %v6828_v22, %v1151_v30  ;;  %v1160_v26 = vsel %vm1152_vm0, %v1151_v30, %v6824_v20  ;;  %v1198_v20 = vmul.f32 %v6944_v61, %v6944_v61  ;;  %v1199_v43 = vmul.f32 %v6946_v40, %v6946_v40 }
 0x31e   :  { %v1329_v33 = vmul.f32 %v1313_v46, %v6957_v58  ;;  %v1330_v24 = vmul.f32 %v1314_v18, %v6962_v9  ;;  %v1167_v44 = vadd.f32 %v1154_v14, %v1131_v6  ;;  %v1168_v62 = vadd.f32 %v1160_v26, %v1129_v28  ;;  %v1266_v63 = vpop.permute.xlu1 %1265 }
 0x31f   :  { %v1344_v0 = vmul.f32 %v6968_v11, %v6968_v11  ;;  %v1345_v22 = vmul.f32 %v6970_v38, %v6970_v38  ;;  %v1176_v46 = vmul.f32 %v6719_v54, %v242_v42  ;;  %v1207_v10 = vadd.f32 %v1199_v43, %v1198_v20 }
 0x320   :  { %v7003_v12 = vadd.f32 %v1329_v33, %v1321_v52  ;;  %v1183_v6 = vmul.f32 %v1167_v44, %v249_v34  ;;  %v1184_v15 = vmul.f32 %v1168_v62, %v250_v31  ;;  %v7005_v30 = vadd.f32 %v1330_v24, %v1322_v7 }
 0x321   :  { %v1352_v26 = vadd.f32 %v1345_v22, %v1344_v0  ;;  %v1132_v54 = vsel %vm1127_vm1, %v6820_v17, %v6830_v23  ;;  %v1157_v33 = vsel %vm1152_vm0, %v6822_v19, %v6838_v27  ;;  %v1306_v0 = vsel %vm1152_vm0, %v6854_v41, %v6840_v32 }
 0x322   :  { %v7008_v18 = vadd.f32 %v1183_v6, %v1175_v16  ;;  %v1290_v28 = vpop.permute.xlu1 %1289  ;;  %v1346_v14 = vmul.f32 %v7003_v12, %v7003_v12  ;;  %v1347_v8 = vmul.f32 %v7005_v30, %v7005_v30  ;;  %v7014_v52 = vadd.f32 %v1184_v15, %v1176_v46 }
 0x323   :  { %v1155_v16 = vsel %vm1152_vm0, %v6838_v27, %v6826_v21  ;;  %v1304_v22 = vsel %vm1152_vm0, %v6840_v32, %v6878_v50 }
 0x324   :  { %v1353_v13 = vadd.f32 %v1352_v26, %v1346_v14  ;;  %v1200_v7 = vmul.f32 %v7008_v18, %v7008_v18  ;;  %v1201_v43 = vmul.f32 %v7014_v52, %v7014_v52  ;;  %v1162_v32 = vadd.f32 %v1155_v16, %v1132_v54 }
 0x325   :  { %v1308_v26 = vsel %vm1152_vm0, %v1290_v28, %v6854_v41  ;;  %v1325_v41 = vmul.f32 %v6755_v1, %v6883_v51  ;;  %v1326_v1 = vmul.f32 %v6763_v4, %v242_v42 }
 0x326   :  { %v1270_v24 = vpop.permute.xlu1 %1269  ;;  %v1354_v44 = vadd.f32 %v1353_v13, %v1347_v8  ;;  %v1208_v62 = vadd.f32 %v1207_v10, %v1200_v7  ;;  %v1134_v8 = vsel %vm1127_vm1, %v6834_v25, %v6820_v17  ;;  %v1310_v17 = vsel %vm1152_vm0, %v6878_v50, %v1290_v28 }
 0x327   :  { %v1282_v20 = vsel %vm1127_vm1, %v1270_v24, %v6842_v35  ;;  %v1284_v27 = vsel %vm1127_vm1, %v1266_v63, %v1270_v24  ;;  %v1161_v6 = vadd.f32 %v1157_v33, %v1134_v8  ;;  %v1178_v50 = vmul.f32 %v1162_v32, %v6942_v60 }
 0x328   :  { %v1316_v10 = vadd.f32 %v1306_v0, %v1284_v27  ;;  %v1317_v13 = vadd.f32 %v1304_v22, %v1282_v20  ;;  %1355 = vadd.xlane.f32.xlu1 %v1354_v44  ;;  %v1209_v14 = vadd.f32 %v1208_v62, %v1201_v43 }
 0x329   :  { %v1177_v44 = vmul.f32 %v1161_v6, %v6937_v59 }
 0x32a   :  { %v1332_v15 = vmul.f32 %v1316_v10, %v6876_v49  ;;  %v1278_v46 = vpop.permute.xlu1 %1277  ;;  %v1324_v49 = vmul.f32 %v6761_v3, %v6888_v5  ;;  %v1333_v54 = vmul.f32 %v1317_v13, %v249_v34  ;;  %v1169_v5 = vmul.f32 %v6705_v53, %v6897_v39 }
 0x32b   :  { %v1280_v7 = vsel %vm1127_vm1, %v6842_v35, %v1278_v46  ;;  %v1286_v33 = vsel %vm1127_vm1, %v1278_v46, %v1266_v63  ;;  %v1323_v35 = vmul.f32 %v6759_v2, %v6866_v47  ;;  %v1170_v34 = vmul.f32 %v6713_v57, %v6920_v29 }
 0x32c   :  { %v1315_v16 = vadd.f32 %v1308_v26, %v1286_v33  ;;  %v1318_v24 = vadd.f32 %v1310_v17, %v1280_v7  ;;  %1210 = vadd.xlane.f32.xlu1 %v1209_v14  ;;  %v7069_v28 = vadd.f32 %v1332_v15, %v1324_v49  ;;  %v7077_v51 = vadd.f32 %v1333_v54, %v1325_v41 }
 0x32d   :  { %v7079_v60 = vadd.f32 %v1177_v44, %v1169_v5  ;;  %v7081_v2 = vadd.f32 %v1178_v50, %v1170_v34 }
 0x32e   :  { %v1331_v63 = vmul.f32 %v1315_v16, %v6871_v48  ;;  %v1334_v62 = vmul.f32 %v1318_v24, %v250_v31  ;;  %v1118_v3 = vpop.permute.xlu1 %1117  ;;  %v1349_v31 = vmul.f32 %v7069_v28, %v7069_v28  ;;  %v1350_v22 = vmul.f32 %v7077_v51, %v7077_v51 }
 0x32f   :  { %v1128_v53 = vsel %vm1127_vm1, %v1118_v3, %v6834_v25  ;;  %v1130_v57 = vsel %vm1127_vm1, %v6830_v23, %v1118_v3  ;;  %v1171_v25 = vmul.f32 %v6707_v55, %v6910_v45  ;;  %v1172_v23 = vmul.f32 %v6709_v56, %v6915_v37 }
 0x330   :  { %v1339_v59 = vadd.f32 %v1331_v63, %v1323_v35  ;;  %v7083_v0 = vadd.f32 %v1334_v62, %v1326_v1  ;;  %v1194_v27 = vmul.f32 %v7079_v60, %v7079_v60  ;;  %v7890_v24 = vlaneseq  ;;  %v1343_v62 = vld [vmem:[#allocation6] sm:$0xf] }
 0x332   :  { %v1149_v47 = vpop.permute.xlu1 %1148  ;;  %v1348_v48 = vmul.f32 %v1339_v59, %v1339_v59  ;;  %v1351_v10 = vmul.f32 %v7083_v0, %v7083_v0  ;;  %v1228_v41 = vshrl.u32 %v7890_v24, 7 }
 0x333   :  { %v1153_v4 = vsel %vm1152_vm0, %v6826_v21, %v1149_v47  ;;  %v1159_v39 = vsel %vm1152_vm0, %v1149_v47, %v6822_v19  ;;  %v1195_v21 = vmul.f32 %v7081_v2, %v7081_v2  ;;  %v1193_v47 = vld [vmem:[#allocation4] sm:$0xf] }
 0x334   :  { %v1163_v29 = vadd.f32 %v1153_v4, %v1130_v57  ;;  %v1164_v42 = vadd.f32 %v1159_v39, %v1128_v53  ;;  %v1357_v20 = vadd.f32 %v1349_v31, %v1348_v48  ;;  %v7126_v35 = vsub.s32 0, %v1228_v41 }
 0x335   :  { %v1202_v56 = vadd.f32 %v1195_v21, %v1194_v27  ;;  %v7135_v39 = vsub.s32 1, %v1228_v41 }
 0x336   :  { %v1179_v19 = vmul.f32 %v1163_v29, %v6957_v58  ;;  %v1180_v8 = vmul.f32 %v1164_v42, %v6962_v9  ;;  %v1358_v13 = vadd.f32 %v1357_v20, %v1350_v22  ;;  %v7889_v9 = vmov 0.0  }
 0x337   :  { %5338 = vmatprep.mubr.msk.bf16.mxu0 %vm6379_vm2, %v7889_v9  ;;  %5344 = vmatprep.mubr.msk.bf16.mxu1 %vm6379_vm2, %v7889_v9  ;;  %v1380_v34 = vrot.slane %v1343_v62, %v7126_v35  ;;  %v1230_v4 = vrot.slane %v1193_v47, %v7126_v35 }
 0x338   :  { %v7113_v43 = vadd.f32 %v1179_v19, %v1171_v25  ;;  %v1359_v55 = vadd.f32 %v1358_v13, %v1351_v10  ;;  %v7115_v45 = vadd.f32 %v1180_v8, %v1172_v23  ;;  %v1384_v25 = vrot.slane %v1343_v62, %v7135_v39 }
 0x33a   :  { %1360 = vadd.xlane.f32.xlu0 %v1359_v55  ;;  %v1196_v37 = vmul.f32 %v7113_v43, %v7113_v43  ;;  %v1197_v6 = vmul.f32 %v7115_v45, %v7115_v45 }
 0x33c   :  { %v1203_v58 = vadd.f32 %v1202_v56, %v1196_v37 }
 0x33e   :  { %v1204_v32 = vadd.f32 %v1203_v58, %v1197_v6 }
 0x340   :  { %1205 = vadd.xlane.f32.xlu0 %v1204_v32 }
 0x3b5   :  { %v1356_v15 = vpop.xlane.xlu1 %1355 }
 0x3b6   :  { %v1362_v46 = vmul.f32 0.03125, %v1356_v15 }
 0x3b8   :  { %v1364_v17 = vadd.f32 1e-06, %v1362_v46 }
 0x3b9   :  { %v1211_v14 = vpop.xlane.xlu1 %1210 }
 0x3ba   :  { %v1213_v26 = vmul.f32 0.03125, %v1211_v14  ;;  %5919 = vrsqrt.f32 %v1364_v17 }
 0x3bc   :  { %v1215_v7 = vadd.f32 1e-06, %v1213_v26  ;;  %v7158_v26 = vsub.s32 3, %v1228_v41 }
 0x3be   :  { %5921 = vrsqrt.f32 %v1215_v7  ;;  %7892 = vst [vmem:[#allocation36_spill] sm:$0xff] %v7158_v26 }
 0x3c4   :  { %v5920_v63 = vpop.eup %5919 }
 0x3c5   :  { %v1368_v5 = vmul.f32 %v5920_v63, %v6968_v11 }
 0x3c7   :  { %v1361_v33 = vpop.xlane.xlu0 %1360  ;;  %v1397_v31 = vmul.f32 %v1380_v34, %v1368_v5 }
 0x3c8   :  { %v1363_v49 = vmul.f32 0.03125, %v1361_v33  ;;  %v7128_v3 = vpop.eup %5921 }
 0x3c9   :  { %v1222_v57 = vmul.f32 %v7128_v3, %v6944_v61  ;;  %v1223_v8 = vmul.f32 %v7128_v3, %v6946_v40 }
 0x3ca   :  { %v1365_v54 = vadd.f32 1e-06, %v1363_v49 }
 0x3cb   :  { %v1251_v20 = vmul.f32 %v1230_v4, %v1222_v57 }
 0x3cc   :  { %5923 = vrsqrt.f32 %v1365_v54 }
 0x3cd   :  { %v1206_v16 = vpop.xlane.xlu0 %1205  ;;  %v1259_v19 = vmul.f32 0.35355338, %v1251_v20 }
 0x3ce   :  { %v1212_v44 = vmul.f32 0.03125, %v1206_v16 }
 0x3d0   :  { %v1214_v50 = vadd.f32 1e-06, %v1212_v44  ;;  %v1242_v44 = vrot.slane %v1193_v47, %v7158_v26 }
 0x3d2   :  { %5925 = vrsqrt.f32 %v1214_v50 }
 0x3d6   :  { %v5924_v1 = vpop.eup %5923 }
 0x3d7   :  { %v1372_v48 = vmul.f32 %v5924_v1, %v1339_v59  ;;  %v1373_v22 = vmul.f32 %v5924_v1, %v7069_v28  ;;  %v1369_v59 = vmul.f32 %v5920_v63, %v6970_v38  ;;  %v1234_v28 = vrot.slane %v1193_v47, %v7135_v39 }
 0x3d8   :  { %v1374_v38 = vmul.f32 %v5924_v1, %v7077_v51  ;;  %v1224_v51 = vmul.f32 %v7128_v3, %v7008_v18  ;;  %v1375_v33 = vmul.f32 %v5924_v1, %v7083_v0  ;;  %v1392_v18 = vrot.slane %v1343_v62, %v7158_v26 }
 0x3d9   :  { %v1401_v53 = vmul.f32 %v1380_v34, %v1372_v48  ;;  %v1402_v27 = vmul.f32 %v1384_v25, %v1373_v22  ;;  %v1398_v10 = vmul.f32 %v1384_v25, %v1369_v59  ;;  %v1252_v56 = vmul.f32 %v1234_v28, %v1223_v8 }
 0x3da   :  { %v1404_v24 = vmul.f32 %v1392_v18, %v1375_v33  ;;  %v1225_v0 = vmul.f32 %v7128_v3, %v7014_v52 }
 0x3db   :  { %v1409_v29 = vpack.c.bf16 %v1401_v53, %v1397_v31  ;;  %v1410_v37 = vpack.c.bf16 %v1402_v27, %v1398_v10  ;;  %v1260_v15 = vmul.f32 0.35355338, %v1252_v56 }
 0x3dc   :  { %v5926_v42 = vpop.eup %5925 }
 0x3dd   :  { %5337 = vmatpush3.bf16.xpose.msra.mxu0 %v1409_v29  ;;  %v1218_v11 = vmul.f32 %v5926_v42, %v7079_v60  ;;  %v1219_v61 = vmul.f32 %v5926_v42, %v7081_v2  ;;  %v7146_v60 = vsub.s32 2, %v1228_v41  ;;  %v1370_v2 = vmul.f32 %v5920_v63, %v7003_v12 }
 0x3de   :  { %5348 = vmatprep.subr.bf16.mxu0 %v7889_v9  ;;  %v1220_v58 = vmul.f32 %v5926_v42, %v7113_v43  ;;  %v1371_v43 = vmul.f32 %v5920_v63, %v7005_v30  ;;  %v1221_v16 = vmul.f32 %v5926_v42, %v7115_v45  ;;  %v1254_v30 = vmul.f32 %v1242_v44, %v1225_v0 }
 0x3df   :  { %v1247_v23 = vmul.f32 %v1230_v4, %v1218_v11  ;;  %7891 = vst [vmem:[#allocation35_spill] sm:$0xff] %v7146_v60  ;;  %v1248_v55 = vmul.f32 %v1234_v28, %v1219_v61  ;;  %v1388_v40 = vrot.slane %v1343_v62, %v7146_v60  ;;  %v1238_v46 = vrot.slane %v1193_v47, %v7146_v60 }
 0x3e0   :  { %v1400_v50 = vmul.f32 %v1392_v18, %v1371_v43  ;;  %v1250_v34 = vmul.f32 %v1242_v44, %v1221_v16  ;;  %v1262_v62 = vmul.f32 0.35355338, %v1254_v30 }
 0x3e1   :  { %v1255_v21 = vmul.f32 0.35355338, %v1247_v23  ;;  %v1256_v6 = vmul.f32 0.35355338, %v1248_v55  ;;  %v1403_v32 = vmul.f32 %v1388_v40, %v1374_v38  ;;  %v1399_v14 = vmul.f32 %v1388_v40, %v1370_v2 }
 0x3e2   :  { %v1249_v7 = vmul.f32 %v1238_v46, %v1220_v58  ;;  %v1253_v49 = vmul.f32 %v1238_v46, %v1224_v51  ;;  %v1412_v1 = vpack.c.bf16 %v1404_v24, %v1400_v50  ;;  %v1258_v63 = vmul.f32 0.35355338, %v1250_v34 }
 0x3e3   :  { %v1405_v13 = vpack.c.bf16 %v1259_v19, %v1255_v21  ;;  %v1406_v17 = vpack.c.bf16 %v1260_v15, %v1256_v6  ;;  %v1411_v12 = vpack.c.bf16 %v1403_v32, %v1399_v14 }
 0x3e4   :  { %v1257_v54 = vmul.f32 0.35355338, %v1249_v7  ;;  %v1261_v41 = vmul.f32 0.35355338, %v1253_v49  ;;  %v1408_v45 = vpack.c.bf16 %v1262_v62, %v1258_v63 }
 0x3e5   :  { %5339 = vmatmul.mubr.bf16.vlgmr.msra.gmra.mrb[12].mxu0 %v1405_v13 }
 0x3e6   :  { %5349 = vmatpush3.bf16.xpose.msra.mxu0 %v1410_v37  ;;  %5350 = vmatprep.mubr.msk.bf16.mxu0 %vm6379_vm2, %v7889_v9  ;;  %v1407_v5 = vpack.c.bf16 %v1261_v41, %v1257_v54 }
 0x3e7   :  { %5360 = vmatprep.subr.bf16.mxu0 %v7889_v9 }
 0x3ed   :  { %5351 = vmatmul.mubr.bf16.vlgmr.msra.gmra.mrb[16].mxu0 %v1406_v17 }
 0x3ee   :  { %5361 = vmatpush3.bf16.xpose.msra.mxu0 %v1411_v12  ;;  %5362 = vmatprep.mubr.msk.bf16.mxu0 %vm6379_vm2, %v7889_v9 }
 0x3ef   :  { %5372 = vmatprep.subr.bf16.mxu0 %v7889_v9 }
 0x3f5   :  { %5363 = vmatmul.mubr.bf16.vlgmr.msra.gmra.mrb[20].mxu0 %v1407_v5 }
 0x3f6   :  { %5373 = vmatpush3.bf16.xpose.msra.mxu0 %v1412_v1  ;;  %5374 = vmatprep.mubr.msk.bf16.mxu0 %vm6379_vm2, %v7889_v9 }
 0x3fd   :  { %5375 = vmatmul.mubr.bf16.vlgmr.msra.gmra.mrb[24].mxu0 %v1408_v45 }
 0x4b8   :  { %v1451_v48 = vpop.f32.mrb[12].mxu0 }
 0x4b9   :  { %v5340_v31 = vpop.f32.mrb[13].mxu0  ;;  %v1459_v52 = vsel %vm1458_vm3, %v1451_v48, -inf }
 0x4ba   :  { %1460 = vmax.xlane.f32.xlu0 %v1459_v52  ;;  %v1454_v3 = vpop.f32.mrb[14].mxu0 }
 0x4bb   :  { %v5341_v47 = vpop.f32.mrb[15].mxu0  ;;  %v1462_v53 = vsel %vm1458_vm3, %v1454_v3, -inf }
 0x4bc   :  { %1463 = vmax.xlane.f32.xlu1 %v1462_v53 }
 0x4c0   :  { %v1560_v57 = vpop.f32.mrb[16].mxu0 }
 0x4c1   :  { %v5352_v4 = vpop.f32.mrb[17].mxu0  ;;  %v1567_v29 = vsel %vm1458_vm3, %v1560_v57, -inf }
 0x4c2   :  { %1568 = vmax.xlane.f32.xlu0 %v1567_v29  ;;  %v1563_v42 = vpop.f32.mrb[18].mxu0  ;;  %v5644_v4 = vld [vmem:[#allocation7] sm:$0xff]   ;;  %v5645_v29 = vld [vmem:[#allocation7 + $0x48] sm:$0xff]  }
 0x4c3   :  { %v5353_v22 = vpop.f32.mrb[19].mxu0  ;;  %v1570_v11 = vsel %vm1458_vm3, %v1563_v42, -inf }
 0x4c4   :  { %1571 = vmax.xlane.f32.xlu1 %v1570_v11  ;;  %v5647_v22 = vld [vmem:[#allocation7 + $0x50] sm:$0xff]  }
 0x4c5   :  { %v5648_v11 = vld [vmem:[#allocation7 + $0x10] sm:$0xff]  }
 0x4c8   :  { %v1668_v20 = vpop.f32.mrb[20].mxu0 }
 0x4c9   :  { %v5364_v59 = vpop.f32.mrb[21].mxu0  ;;  %v1675_v25 = vsel %vm1458_vm3, %v1668_v20, -inf }
 0x4ca   :  { %1676 = vmax.xlane.f32.xlu0 %v1675_v25  ;;  %v1671_v23 = vpop.f32.mrb[22].mxu0  ;;  %v5650_v59 = vld [vmem:[#allocation7 + $0x18] sm:$0xff]   ;;  %v5651_v25 = vld [vmem:[#allocation7 + $0x60] sm:$0xff]  }
 0x4cb   :  { %v5365_v61 = vpop.f32.mrb[23].mxu0  ;;  %v1678_v27 = vsel %vm1458_vm3, %v1671_v23, -inf }
 0x4cc   :  { %1679 = vmax.xlane.f32.xlu1 %v1678_v27 }
 0x4d0   :  { %v1776_v21 = vpop.f32.mrb[24].mxu0 }
 0x4d1   :  { %v5376_v19 = vpop.f32.mrb[25].mxu0  ;;  %v1783_v8 = vsel %vm1458_vm3, %v1776_v21, -inf }
 0x4d2   :  { %1784 = vmax.xlane.f32.xlu0 %v1783_v8  ;;  %v1779_v28 = vpop.f32.mrb[26].mxu0 }
 0x4d3   :  { %v5377_v10 = vpop.f32.mrb[27].mxu0  ;;  %v1786_v13 = vsel %vm1458_vm3, %v1779_v28, -inf }
 0x4d4   :  { %1787 = vmax.xlane.f32.xlu1 %v1786_v13 }
 0x547   :  { %v1461_v55 = vpop.xlane.xlu0 %1460 }
 0x548   :  { %v1465_v37 = vsub.f32 %v1451_v48, %v1461_v55 }
 0x549   :  { %v1464_v38 = vpop.xlane.xlu1 %1463 }
 0x54a   :  { %v1467_v56 = vmul.f32 1.442695, %v1465_v37  ;;  %v1466_v2 = vsub.f32 %v1454_v3, %v1464_v38 }
 0x54c   :  { %5927 = vpow2.f32 %v1467_v56  ;;  %v1469_v40 = vmul.f32 1.442695, %v1466_v2  ;;  %v7893_v2 = vld [vmem:[#allocation33_spill] sm:$0xff] }
 0x54e   :  { %5929 = vpow2.f32 %v1469_v40  ;;  %v7894_v40 = vld [vmem:[#allocation31_spill] sm:$0xff] }
 0x54f   :  { %v1569_v6 = vpop.xlane.xlu0 %1568 }
 0x550   :  { %v1573_v58 = vsub.f32 %v1560_v57, %v1569_v6  ;;  %v5643_v57 = vld [vmem:[#allocation7 + $0x40] sm:$0xff]   ;;  %v7895_v6 = vpack.c.bf16 %v7893_v2, %v7894_v40 }
 0x551   :  { %v1572_v32 = vpop.xlane.xlu1 %1571  ;;  %5214 = vmatprep.subr.bf16.mxu0 %v5643_v57  ;;  %v5662_v57 = vld [vmem:[#allocation7 + $0x90] sm:$0xff]  }
 0x552   :  { %v1575_v15 = vmul.f32 1.442695, %v1573_v58  ;;  %v1574_v51 = vsub.f32 %v1563_v42, %v1572_v32  ;;  %5215 = vmatpush3.bf16.msra.mxu0 %v5644_v4  ;;  %v5646_v42 = vld [vmem:[#allocation7 + $0x8] sm:$0xff]   ;;  %v5665_v4 = vld [vmem:[#allocation7 + $0x38] sm:$0xff]  }
 0x553   :  { %5216 = vmatprep.subr.bf16.mxu0 %v5645_v29  ;;  %v5666_v29 = vld [vmem:[#allocation7 + $0x98] sm:$0xff]  }
 0x554   :  { %5931 = vpow2.f32 %v1575_v15  ;;  %v1577_v46 = vmul.f32 1.442695, %v1574_v51 }
 0x556   :  { %v7180_v14 = vpop.eup %5927  ;;  %5933 = vpow2.f32 %v1577_v46  ;;  %5217 = vmatpush3.bf16.msra.mxu0 %v5646_v42  ;;  %v5667_v42 = vld [vmem:[#allocation7 + $0xe0] sm:$0xff]  }
 0x557   :  { %v1677_v17 = vpop.xlane.xlu0 %1676  ;;  %v1471_v7 = vsel %vm1458_vm3, %v7180_v14, 0.0  ;;  %5218 = vmatprep.subr.bf16.mxu0 %v5647_v22  ;;  %v5668_v22 = vld [vmem:[#allocation7 + $0xa0] sm:$0xff]  }
 0x558   :  { %v7184_v12 = vpop.eup %5929  ;;  %v1681_v33 = vsub.f32 %v1668_v20, %v1677_v17  ;;  %1472 = vadd.xlane.f32.xlu0 %v1471_v7  ;;  %v5649_v20 = vld [vmem:[#allocation7 + $0x58] sm:$0xff]   ;;  %v7896_v7 = vld [vmem:[#allocation32_spill] sm:$0xff] }
 0x559   :  { %v1680_v49 = vpop.xlane.xlu1 %1679  ;;  %v1474_v43 = vsel %vm1458_vm3, %v7184_v12, 0.0 }
 0x55a   :  { %v1683_v18 = vmul.f32 1.442695, %v1681_v33  ;;  %v1682_v54 = vsub.f32 %v1671_v23, %v1680_v49  ;;  %1475 = vadd.xlane.f32.xlu1 %v1474_v43  ;;  %5219 = vmatpush3.bf16.msra.mxu0 %v5648_v11  ;;  %v5653_v23 = vld [vmem:[#allocation7 + $0x20] sm:$0xff]   ;;  %v5669_v11 = vld [vmem:[#allocation7 + $0xe8] sm:$0xff]  }
 0x55b   :  { %5220 = vmatprep.subr.bf16.mxu0 %v5649_v20  ;;  %v5670_v20 = vld [vmem:[#allocation7 + $0xa8] sm:$0xff]  }
 0x55c   :  { %5935 = vpow2.f32 %v1683_v18  ;;  %v1685_v16 = vmul.f32 1.442695, %v1682_v54 }
 0x55e   :  { %v7188_v24 = vpop.eup %5931  ;;  %5937 = vpow2.f32 %v1685_v16  ;;  %5221 = vmatpush3.bf16.msra.mxu0 %v5650_v59  ;;  %v5652_v16 = vld [vmem:[#allocation7 + $0xc0] sm:$0xff]   ;;  %v5671_v59 = vld [vmem:[#allocation7 + $0xf0] sm:$0xff]  }
 0x55f   :  { %v1785_v41 = vpop.xlane.xlu0 %1784  ;;  %v1579_v0 = vsel %vm1458_vm3, %v7188_v24, 0.0  ;;  %5222 = vmatprep.subr.bf16.mxu0 %v5651_v25  ;;  %v5672_v25 = vld [vmem:[#allocation7 + $0xb0] sm:$0xff]  }
 0x560   :  { %v7192_v44 = vpop.eup %5933  ;;  %v1789_v50 = vsub.f32 %v1776_v21, %v1785_v41  ;;  %1580 = vadd.xlane.f32.xlu0 %v1579_v0  ;;  %v7899_v41 = vld [vmem:[#allocation34_spill] sm:$0xff] }
 0x561   :  { %v1788_v5 = vpop.xlane.xlu1 %1787  ;;  %v1582_v34 = vsel %vm1458_vm3, %v7192_v44, 0.0  ;;  %v7900_v0 = vld [vmem:[#allocation30_spill] sm:$0xff] }
 0x562   :  { %v1791_v1 = vmul.f32 1.442695, %v1789_v50  ;;  %v1790_v30 = vsub.f32 %v1779_v28, %v1788_v5  ;;  %1583 = vadd.xlane.f32.xlu1 %v1582_v34  ;;  %5223 = vmatpush3.bf16.msra.mxu0 %v5653_v23  ;;  %v5673_v23 = vld [vmem:[#allocation7 + $0xf8] sm:$0xff]  }
 0x564   :  { %5939 = vpow2.f32 %v1791_v1  ;;  %v1793_v63 = vmul.f32 1.442695, %v1790_v30  ;;  %v5654_v1 = vld [vmem:[#allocation7 + $0x80] sm:$0xff]  }
 0x566   :  { %v7196_v62 = vpop.eup %5935  ;;  %5941 = vpow2.f32 %v1793_v63  ;;  %v5655_v63 = vld [vmem:[#allocation7 + $0x68] sm:$0xff]  }
 0x567   :  { %v1687_v45 = vsel %vm1458_vm3, %v7196_v62, 0.0  ;;  %5224 = vmatprep.subr.bf16.mxu0 %v5655_v63 }
 0x568   :  { %v7200_v48 = vpop.eup %5937  ;;  %1688 = vadd.xlane.f32.xlu0 %v1687_v45  ;;  %v5657_v45 = vld [vmem:[#allocation7 + $0x28] sm:$0xff]  }
 0x569   :  { %v1690_v31 = vsel %vm1458_vm3, %v7200_v48, 0.0  ;;  %5225 = vmatpush3.bf16.msra.mxu0 %v5657_v45 }
 0x56a   :  { %1691 = vadd.xlane.f32.xlu1 %v1690_v31  ;;  %v5659_v31 = vld [vmem:[#allocation7 + $0x70] sm:$0xff]  }
 0x56b   :  { %5226 = vmatprep.subr.bf16.mxu0 %v5659_v31 }
 0x56e   :  { %v7204_v52 = vpop.eup %5939 }
 0x56f   :  { %v1795_v3 = vsel %vm1458_vm3, %v7204_v52, 0.0 }
 0x570   :  { %v7208_v47 = vpop.eup %5941  ;;  %1796 = vadd.xlane.f32.xlu0 %v1795_v3  ;;  %v5660_v3 = vld [vmem:[#allocation7 + $0xd0] sm:$0xff]  }
 0x571   :  { %v1798_v53 = vsel %vm1458_vm3, %v7208_v47, 0.0 }
 0x572   :  { %1799 = vadd.xlane.f32.xlu1 %v1798_v53  ;;  %v5661_v53 = vld [vmem:[#allocation7 + $0x30] sm:$0xff]  }
 0x573   :  { %5227 = vmatpush3.bf16.msra.mxu0 %v5661_v53 }
 0x5e5   :  { %v1473_v61 = vpop.xlane.xlu0 %1472 }
 0x5e6   :  { %5943 = vrcp.f32 %v1473_v61  ;;  %v5674_v61 = vld [vmem:[#allocation7 + $0xb8] sm:$0xff]  }
 0x5e7   :  { %v1476_v27 = vpop.xlane.xlu1 %1475 }
 0x5e8   :  { %5945 = vrcp.f32 %v1476_v27 }
 0x5ed   :  { %v1581_v21 = vpop.xlane.xlu0 %1580 }
 0x5ee   :  { %5947 = vrcp.f32 %v1581_v21 }
 0x5ef   :  { %v1584_v19 = vpop.xlane.xlu1 %1583 }
 0x5f0   :  { %v5944_v8 = vpop.eup %5943  ;;  %5949 = vrcp.f32 %v1584_v19 }
 0x5f1   :  { %v1479_v10 = vmul.f32 %v5944_v8, %v7180_v14 }
 0x5f2   :  { %v5946_v28 = vpop.eup %5945 }
 0x5f3   :  { %v1480_v13 = vmul.f32 %v5946_v28, %v7184_v12  ;;  %v7897_v12 = vld [vmem:[#allocation29_spill] sm:$0xff] }
 0x5f4   :  { %v7898_v33 = vpack.c.bf16 %v7896_v7, %v7897_v12  ;;  %v5675_v7 = vld [vmem:[#allocation13] ss:$8 sps:$4 sm:$0xff]   ;;  %v5677_v12 = vld [vmem:[#allocation13 + $0x4] ss:$8 sps:$4 sm:$0xff]  }
 0x5f5   :  { %v1689_v55 = vpop.xlane.xlu0 %1688  ;;  %v1481_v37 = vpack.c.bf16 %v1480_v13, %v1479_v10 }
 0x5f6   :  { %5951 = vrcp.f32 %v1689_v55 }
 0x5f7   :  { %5345 = vmatmul.mubr.msk.bf16.vlgmr.msra.gmra.mrb[12].mxu1 %vm1458_vm3, %v1481_v37  ;;  %v1692_v38 = vpop.xlane.xlu1 %1691 }
 0x5f8   :  { %v5948_v56 = vpop.eup %5947  ;;  %5953 = vrcp.f32 %v1692_v38  ;;  %5355 = vmatpush3.bf16.msra.mxu1 %v7895_v6  ;;  %5356 = vmatprep.mubr.msk.bf16.mxu1 %vm6379_vm2, %v7889_v9 }
 0x5f9   :  { %5366 = vmatprep.subr.bf16.mxu1 %v7889_v9  ;;  %v1587_v32 = vmul.f32 %v5948_v56, %v7188_v24  ;;  %v7902_v56 = vmov 0  }
 0x5fa   :  { %v5950_v58 = vpop.eup %5949 }
 0x5fb   :  { %v1588_v15 = vmul.f32 %v5950_v58, %v7192_v44  ;;  %v7901_v44 = vpack.c.bf16 %v7899_v41, %v7900_v0 }
 0x5fd   :  { %v1797_v51 = vpop.xlane.xlu0 %1796  ;;  %v1589_v46 = vpack.c.bf16 %v1588_v15, %v1587_v32 }
 0x5fe   :  { %5955 = vrcp.f32 %v1797_v51 }
 0x5ff   :  { %v1800_v14 = vpop.xlane.xlu1 %1799  ;;  %5357 = vmatmul.mubr.msk.bf16.vlgmr.msra.gmra.mrb[16].mxu1 %vm1458_vm3, %v1589_v46 }
 0x600   :  { %v5952_v17 = vpop.eup %5951  ;;  %5957 = vrcp.f32 %v1800_v14  ;;  %5367 = vmatpush3.bf16.msra.mxu1 %v7898_v33  ;;  %5368 = vmatprep.mubr.msk.bf16.mxu1 %vm6379_vm2, %v7889_v9  ;;  %v5680_v33 = vld [vmem:[#allocation13 + $0x14] ss:$8 sps:$4 sm:$0xff]  }
 0x601   :  { %5378 = vmatprep.subr.bf16.mxu1 %v7889_v9  ;;  %v1695_v43 = vmul.f32 %v5952_v17, %v7196_v62  ;;  %v5656_v62 = vld [vmem:[#allocation7 + $0xc8] sm:$0xff]  }
 0x602   :  { %v5954_v49 = vpop.eup %5953 }
 0x603   :  { %v1696_v18 = vmul.f32 %v5954_v49, %v7200_v48  ;;  %v5658_v48 = vld [vmem:[#allocation7 + $0x88] sm:$0xff]   ;;  %v5678_v49 = vld [vmem:[#allocation13 + $0x10] ss:$8 sps:$4 sm:$0xff]  }
 0x605   :  { %v1697_v54 = vpack.c.bf16 %v1696_v18, %v1695_v43  ;;  %v5683_v43 = vld [vmem:[#allocation13 + $0x24] ss:$8 sps:$4 sm:$0xff]   ;;  %v5681_v18 = vld [vmem:[#allocation13 + $0x20] ss:$8 sps:$4 sm:$0xff]  }
 0x607   :  { %5369 = vmatmul.mubr.msk.bf16.vlgmr.msra.gmra.mrb[20].mxu1 %vm1458_vm3, %v1697_v54 }
 0x608   :  { %v5956_v24 = vpop.eup %5955  ;;  %5379 = vmatpush3.bf16.msra.mxu1 %v7901_v44  ;;  %5380 = vmatprep.mubr.msk.bf16.mxu1 %vm6379_vm2, %v7889_v9 }
 0x609   :  { %5236 = vmatprep.subr.bf16.mxu1 %v5652_v16  ;;  %v1803_v5 = vmul.f32 %v5956_v24, %v7204_v52  ;;  %v5663_v52 = vld [vmem:[#allocation7 + $0x78] sm:$0xff]  }
 0x60a   :  { %v5958_v50 = vpop.eup %5957  ;;  %5228 = vmatprep.subr.bf16.mxu0 %v5663_v52 }
 0x60b   :  { %v1804_v34 = vmul.f32 %v5958_v50, %v7208_v47  ;;  %v5664_v47 = vld [vmem:[#allocation7 + $0xd8] sm:$0xff]   ;;  %5229 = vmatpush3.bf16.msra.mxu0 %v5665_v4  ;;  %v4968_v50 = vld [vmem:[#allocation9] ss:$0 sm:$0xff] }
 0x60c   :  { %2342 = vmatprep.subr.bf16.mxu0 %v5677_v12  ;;  %v2250_v12 = vld [vmem:[#allocation15] sm:$0x3] }
 0x60d   :  { %v1805_v30 = vpack.c.bf16 %v1804_v34, %v1803_v5 }
 0x60f   :  { %5381 = vmatmul.mubr.msk.bf16.vlgmr.msra.gmra.mrb[24].mxu1 %vm1458_vm3, %v1805_v30 }
 0x610   :  { %5237 = vmatpush3.bf16.msra.mxu1 %v5654_v1 }
 0x611   :  { %5238 = vmatprep.subr.bf16.mxu1 %v5656_v62  ;;  %v5001_v62 = vld [vmem:[#allocation10] ss:$0 sm:$0xff] }
 0x614   :  { %5239 = vmatpush3.bf16.msra.mxu1 %v5658_v48 }
 0x615   :  { %5240 = vmatprep.subr.bf16.mxu1 %v5660_v3 }
 0x618   :  { %5241 = vmatpush3.bf16.msra.mxu1 %v5662_v57 }
 0x619   :  { %5242 = vmatprep.subr.bf16.mxu1 %v5664_v47  ;;  %v6035_v47 = vld [vmem:[%s7881_s15] sm:$0xff] }
 0x61c   :  { %5243 = vmatpush3.bf16.msra.mxu1 %v5666_v29 }
 0x61d   :  { %5244 = vmatprep.subr.bf16.mxu1 %v5667_v42  ;;  %v6036_v42 = vld [vmem:[%s7881_s15 + $0x8] sm:$0xff] }
 0x620   :  { %5245 = vmatpush3.bf16.msra.mxu1 %v5668_v22 }
 0x621   :  { %5246 = vmatprep.subr.bf16.mxu1 %v5669_v11 }
 0x624   :  { %5247 = vmatpush3.bf16.msra.mxu1 %v5670_v20  ;;  %v5686_v20 = vld [vmem:[#allocation13 + $0x34] ss:$8 sps:$4 sm:$0xff]  }
 0x625   :  { %5248 = vmatprep.subr.bf16.mxu1 %v5671_v59  ;;  %v5684_v59 = vld [vmem:[#allocation13 + $0x30] ss:$8 sps:$4 sm:$0xff]  }
 0x628   :  { %5249 = vmatpush3.bf16.msra.mxu1 %v5672_v25  ;;  %v5687_v25 = vld [vmem:[#allocation13 + $0x40] ss:$8 sps:$4 sm:$0xff]  }
 0x629   :  { %5250 = vmatprep.subr.bf16.mxu1 %v5673_v23  ;;  %v5689_v23 = vld [vmem:[#allocation13 + $0x44] ss:$8 sps:$4 sm:$0xff]  }
 0x62c   :  { %5251 = vmatpush3.bf16.msra.mxu1 %v5674_v61  ;;  %v5692_v61 = vld [vmem:[#allocation13 + $0x54] ss:$8 sps:$4 sm:$0xff]  }
 0x62d   :  { %5384 = vmatprep.subr.bf16.mxu1 %v7889_v9 }
 0x6ca   :  { %v1519_v27 = vpop.f32.mrb[12].mxu1 }
 0x6cb   :  { %v5346_v21 = vpop.f32.mrb[13].mxu1 }
 0x6cc   :  { %v1522_v19 = vpop.f32.mrb[14].mxu1  ;;  %v5695_v21 = vld [vmem:[#allocation13 + $0x64] ss:$8 sps:$4 sm:$0xff]  }
 0x6cd   :  { %v1850_v8 = vpack.c.bf16 %v1522_v19, %v1519_v27  ;;  %v5347_v28 = vpop.f32.mrb[15].mxu1  ;;  %v5690_v27 = vld [vmem:[#allocation13 + $0x50] ss:$8 sps:$4 sm:$0xff]   ;;  %v5693_v19 = vld [vmem:[#allocation13 + $0x60] ss:$8 sps:$4 sm:$0xff]  }
 0x6ce   :  { %v5696_v28 = vld [vmem:[#allocation13 + $0x70] ss:$8 sps:$4 sm:$0xff]  }
 0x6d2   :  { %v1627_v10 = vpop.f32.mrb[16].mxu1 }
 0x6d3   :  { %v5358_v13 = vpop.f32.mrb[17].mxu1 }
 0x6d4   :  { %v1630_v55 = vpop.f32.mrb[18].mxu1 }
 0x6d5   :  { %v1851_v37 = vpack.c.bf16 %v1630_v55, %v1627_v10  ;;  %v5359_v38 = vpop.f32.mrb[19].mxu1 }
 0x6d7   :  { %2149 = vmatprep.mubr.bf16.mxu0 %v1851_v37 }
 0x6d8   :  { %2150 = vmatmul.mubr.bf16.vlgmr.msra.gmra.mrb[28].mxu0 %v1850_v8  ;;  %v5698_v8 = vld [vmem:[#allocation13 + $0x74] ss:$8 sps:$4 sm:$0xff]  }
 0x6d9   :  { %2374 = vmatprep.mubr.bf16.mxu0 %v7902_v56  ;;  %2343 = vmatpush1.bf16.msra.mxu0 %v5675_v7  ;;  %v5700_v7 = vld [vmem:[#allocation18 + $0x8] sm:$0xff]  }
 0x6da   :  { %v1735_v2 = vpop.f32.mrb[20].mxu1  ;;  %2344 = vmatprep.subr.bf16.mxu0 %v5680_v33  ;;  %v2255_v33 = vrot.slane %v2250_v12, %v7126_v35 }
 0x6db   :  { %v5370_v40 = vpop.f32.mrb[21].mxu1 }
 0x6dc   :  { %v1738_v6 = vpop.f32.mrb[22].mxu1 }
 0x6dd   :  { %v1852_v58 = vpack.c.bf16 %v1738_v6, %v1735_v2  ;;  %v5371_v32 = vpop.f32.mrb[23].mxu1  ;;  %2345 = vmatpush1.bf16.msra.mxu0 %v5678_v49 }
 0x6de   :  { %2346 = vmatprep.subr.bf16.mxu0 %v5683_v43  ;;  %v5002_v32 = vld [vmem:[#allocation12] ss:$0 sm:$0xff] }
 0x6e1   :  { %2347 = vmatpush1.bf16.msra.mxu0 %v5681_v18 }
 0x6e2   :  { %v1843_v15 = vpop.f32.mrb[24].mxu1  ;;  %2348 = vmatprep.subr.bf16.mxu0 %v5686_v20  ;;  %v5705_v20 = vld [vmem:[#allocation18 + $0x30] sm:$0xff]  }
 0x6e3   :  { %v5382_v51 = vpop.f32.mrb[25].mxu1 }
 0x6e4   :  { %v1846_v46 = vpop.f32.mrb[26].mxu1 }
 0x6e5   :  { %v1853_v14 = vpack.c.bf16 %v1846_v46, %v1843_v15  ;;  %v5383_v17 = vpop.f32.mrb[27].mxu1  ;;  %2349 = vmatpush1.bf16.msra.mxu0 %v5684_v59  ;;  %v5706_v59 = vld [vmem:[#allocation18 + $0x38] sm:$0xff]  }
 0x6e6   :  { %2350 = vmatprep.subr.bf16.mxu0 %v5689_v23  ;;  %v5699_v17 = vld [vmem:[#allocation18] sm:$0xff]  }
 0x6e7   :  { %2190 = vmatprep.mubr.bf16.mxu1 %v1853_v14 }
 0x6e8   :  { %2191 = vmatmul.mubr.bf16.vlgmr.msra.gmra.mrb[28].mxu1 %v1852_v58 }
 0x6e9   :  { %5400 = vmatprep.mubr.msk.bf16.mxu1 %vm6379_vm2, %v7889_v9  ;;  %2351 = vmatpush1.bf16.msra.mxu0 %v5687_v25 }
 0x6ea   :  { %2352 = vmatprep.subr.bf16.mxu0 %v5692_v61  ;;  %5385 = vmatpush3.bf16.msra.mxu1 %v5699_v17  ;;  %v5721_v17 = vld [vmem:[#allocation2 + $0x3c4] ss:$48 sps:$4 sm:$0xff]  }
 0x6eb   :  { %5386 = vmatprep.subr.bf16.mxu1 %v7889_v9 }
 0x6ed   :  { %2353 = vmatpush1.bf16.msra.mxu0 %v5690_v27 }
 0x6ee   :  { %2354 = vmatprep.subr.bf16.mxu0 %v5695_v21  ;;  %5387 = vmatpush3.bf16.msra.mxu1 %v5700_v7  ;;  %v5724_v7 = vld [vmem:[#allocation2 + $0x3cc] ss:$48 sps:$4 sm:$0xff]  }
 0x6ef   :  { %5388 = vmatprep.subr.bf16.mxu1 %v7889_v9 }
 0x6f1   :  { %2355 = vmatpush1.bf16.msra.mxu0 %v5693_v19 }
 0x6f2   :  { %2356 = vmatprep.subr.bf16.mxu0 %v5698_v8 }
 0x6f5   :  { %2357 = vmatpush1.bf16.msra.mxu0 %v5696_v28 }
 0x7ab   :  { %v5230_v54 = vpop.f32.mrb[28].mxu0 }
 0x7ac   :  { %v5231_v16 = vpop.f32.mrb[29].mxu0 }
 0x7ad   :  { %v5232_v24 = vadd.f32 %v5231_v16, %v5230_v54  ;;  %v5233_v41 = vpop.f32.mrb[30].mxu0 }
 0x7ae   :  { %v5234_v0 = vpop.f32.mrb[31].mxu0 }
 0x7af   :  { %v5235_v44 = vadd.f32 %v5234_v0, %v5233_v41  ;;  %v2152_v1 = vadd.f32 %v5232_v24, %v4968_v50 }
 0x7b1   :  { %v2155_v48 = vadd.f32 %v5235_v44, %v4968_v50 }
 0x7bb   :  { %v5252_v5 = vpop.f32.mrb[28].mxu1 }
 0x7bc   :  { %v5253_v34 = vpop.f32.mrb[29].mxu1 }
 0x7bd   :  { %v5254_v30 = vadd.f32 %v5253_v34, %v5252_v5  ;;  %v5255_v63 = vpop.f32.mrb[30].mxu1 }
 0x7be   :  { %v5256_v45 = vpop.f32.mrb[31].mxu1 }
 0x7bf   :  { %v2193_v31 = vadd.f32 %v5254_v30, %v2152_v1  ;;  %v5257_v3 = vadd.f32 %v5256_v45, %v5255_v63  ;;  %v2259_v1 = vrot.slane %v2250_v12, %v7135_v39  ;;  %v5719_v12 = vld [vmem:[#allocation2 + $0x3c0] ss:$48 sps:$4 sm:$0xff]  }
 0x7c1   :  { %v2206_v53 = vmul.f32 %v5001_v62, %v2193_v31  ;;  %v2196_v57 = vadd.f32 %v5257_v3, %v2155_v48 }
 0x7c3   :  { %v2207_v52 = vmul.f32 %v5001_v62, %v2196_v57  ;;  %v7248_v4 = vadd.f32 %v6035_v47, %v2206_v53  ;;  %v5701_v47 = vld [vmem:[#allocation18 + $0x10] sm:$0xff]  }
 0x7c4   :  { %5389 = vmatpush3.bf16.msra.mxu1 %v5701_v47  ;;  %v5740_v47 = vld [vmem:[#allocation2 + $0x4e8] ss:$48 sps:$4 sm:$0xff]  }
 0x7c5   :  { %v2211_v29 = vmul.f32 %v7248_v4, %v7248_v4  ;;  %v7255_v22 = vadd.f32 %v6036_v42, %v2207_v52  ;;  %5390 = vmatprep.subr.bf16.mxu1 %v7889_v9  ;;  %v5703_v42 = vld [vmem:[#allocation18 + $0x20] sm:$0xff]  }
 0x7c7   :  { %2213 = vadd.xlane.f32.xlu0 %v2211_v29  ;;  %v2212_v11 = vmul.f32 %v7255_v22, %v7255_v22  ;;  %v5702_v29 = vld [vmem:[#allocation18 + $0x18] sm:$0xff]  }
 0x7c8   :  { %5391 = vmatpush3.bf16.msra.mxu1 %v5702_v29  ;;  %v5745_v29 = vld [vmem:[#allocation2 + $0x544] ss:$48 sps:$4 sm:$0xff]  }
 0x7c9   :  { %2215 = vadd.xlane.f32.xlu1 %v2212_v11  ;;  %5392 = vmatprep.subr.bf16.mxu1 %v7889_v9  ;;  %v5704_v11 = vld [vmem:[#allocation18 + $0x28] sm:$0xff]  }
 0x7cc   :  { %5393 = vmatpush3.bf16.msra.mxu1 %v5703_v42  ;;  %v5748_v42 = vld [vmem:[#allocation2 + $0x54c] ss:$48 sps:$4 sm:$0xff]  }
 0x7cd   :  { %5394 = vmatprep.subr.bf16.mxu1 %v7889_v9 }
 0x7d0   :  { %5395 = vmatpush3.bf16.msra.mxu1 %v5704_v11  ;;  %v5743_v11 = vld [vmem:[#allocation2 + $0x540] ss:$48 sps:$4 sm:$0xff]  }
 0x7d1   :  { %5396 = vmatprep.subr.bf16.mxu1 %v7889_v9 }
 0x7d4   :  { %5397 = vmatpush3.bf16.msra.mxu1 %v5705_v20  ;;  %v5746_v20 = vld [vmem:[#allocation2 + $0x548] ss:$48 sps:$4 sm:$0xff]  }
 0x7d5   :  { %5398 = vmatprep.subr.bf16.mxu1 %v7889_v9 }
 0x7d8   :  { %5399 = vmatpush3.bf16.msra.mxu1 %v5706_v59  ;;  %v5751_v59 = vld [vmem:[#allocation2 + $0x5a4] ss:$48 sps:$4 sm:$0xff]  }
 0x854   :  { %v2214_v10 = vpop.xlane.xlu0 %2213 }
 0x855   :  { %v2217_v13 = vmul.f32 0.03125, %v2214_v10 }
 0x856   :  { %v2216_v55 = vpop.xlane.xlu1 %2215 }
 0x857   :  { %v2219_v37 = vadd.f32 1e-06, %v2217_v13  ;;  %v2218_v38 = vmul.f32 0.03125, %v2216_v55  ;;  %v5021_v13 = vld [vmem:[#allocation16] ss:$0 sm:$0xff] }
 0x859   :  { %5959 = vrsqrt.f32 %v2219_v37  ;;  %v2220_v2 = vadd.f32 1e-06, %v2218_v38 }
 0x85b   :  { %5961 = vrsqrt.f32 %v2220_v2 }
 0x863   :  { %v5960_v40 = vpop.eup %5959 }
 0x864   :  { %v2223_v6 = vmul.f32 %v5960_v40, %v7248_v4  ;;  %v5707_v40 = vld [vmem:[#allocation2 + $0x300] ss:$48 sps:$4 sm:$0xff]  }
 0x865   :  { %v5962_v58 = vpop.eup %5961 }
 0x866   :  { %v2224_v15 = vmul.f32 %v5962_v58, %v7255_v22  ;;  %v2231_v51 = vmul.f32 %v5002_v32, %v2223_v6  ;;  %v5709_v6 = vld [vmem:[#allocation2 + $0x304] ss:$48 sps:$4 sm:$0xff]   ;;  %v5710_v58 = vld [vmem:[#allocation2 + $0x308] ss:$48 sps:$4 sm:$0xff]  }
 0x867   :  { %3150 = vmatprep.subr.bf16.mxu0 %v5709_v6 }
 0x868   :  { %v2232_v46 = vmul.f32 %v5002_v32, %v2224_v15  ;;  %v5712_v32 = vld [vmem:[#allocation2 + $0x30c] ss:$48 sps:$4 sm:$0xff]   ;;  %v5715_v15 = vld [vmem:[#allocation2 + $0x364] ss:$48 sps:$4 sm:$0xff]  }
 0x869   :  { %3193 = vmatprep.subr.bf16.mxu1 %v5712_v32 }
 0x86a   :  { %v2233_v14 = vpack.c.bf16 %v2232_v46, %v2231_v51  ;;  %v5718_v51 = vld [vmem:[#allocation2 + $0x36c] ss:$48 sps:$4 sm:$0xff]   ;;  %v5713_v46 = vld [vmem:[#allocation2 + $0x360] ss:$48 sps:$4 sm:$0xff]  }
 0x86c   :  { %2375 = vmatmul.mubr.bf16.vlgmr.msra.gmra.mrb[32].mxu0 %v2233_v14  ;;  %v5716_v14 = vld [vmem:[#allocation2 + $0x368] ss:$48 sps:$4 sm:$0xff]  }
 0x86d   :  { %3182 = vmatprep.mubr.bf16.mxu0 %v7902_v56  ;;  %3151 = vmatpush1.bf16.msra.mxu0 %v5707_v40  ;;  %v5033_v40 = vld [vmem:[%s7832_s3 + $0x1] ss:$0 sm:$0xff] }
 0x86e   :  { %3152 = vmatprep.subr.bf16.mxu0 %v5715_v15  ;;  %v5755_v15 = vld [vmem:[#allocation2 + $0x310] ss:$48 sps:$4 sm:$0xff]  }
 0x871   :  { %3153 = vmatpush1.bf16.msra.mxu0 %v5713_v46 }
 0x872   :  { %3154 = vmatprep.subr.bf16.mxu0 %v5721_v17  ;;  %v5766_v17 = vld [vmem:[#allocation2 + $0x37c] ss:$48 sps:$4 sm:$0xff]  }
 0x875   :  { %3155 = vmatpush1.bf16.msra.mxu0 %v5719_v12  ;;  %v5764_v12 = vld [vmem:[#allocation2 + $0x378] ss:$48 sps:$4 sm:$0xff]  }
 0x93f   :  { %v2376_v49 = vpop.f32.mrb[32].mxu0 }
 0x940   :  { %v2377_v43 = vadd.f32 %v2376_v49, %v2255_v33  ;;  %v2378_v18 = vpop.f32.mrb[33].mxu0  ;;  %v5022_v49 = vld [vmem:[#allocation19] ss:$0 sm:$0xff] }
 0x941   :  { %v2380_v54 = vpop.f32.mrb[34].mxu0  ;;  %v2379_v62 = vadd.f32 %v2378_v18, %v2259_v1  ;;  %v5031_v18 = vld [vmem:[#allocation21] ss:$0 sm:$0xff] }
 0x942   :  { %v5019_v16 = vmul.f32 -1.442695, %v2377_v43  ;;  %v2381_v24 = vadd.f32 %v2380_v54, %v2255_v33  ;;  %v2382_v41 = vpop.f32.mrb[35].mxu0  ;;  %v5722_v33 = vld [vmem:[#allocation2 + $0x3c8] ss:$48 sps:$4 sm:$0xff]  }
 0x943   :  { %v2383_v3 = vadd.f32 %v2382_v41, %v2259_v1 }
 0x944   :  { %5963 = vpow2.f32 %v5019_v16  ;;  %v5020_v0 = vmul.f32 -1.442695, %v2381_v24 }
 0x946   :  { %5965 = vpow2.f32 %v5020_v0 }
 0x94e   :  { %v5964_v44 = vpop.eup %5963 }
 0x94f   :  { %v2391_v50 = vadd.f32 1.0, %v5964_v44 }
 0x950   :  { %v5966_v5 = vpop.eup %5965 }
 0x951   :  { %5967 = vrcp.f32 %v2391_v50  ;;  %v2392_v34 = vadd.f32 1.0, %v5966_v5 }
 0x953   :  { %5969 = vrcp.f32 %v2392_v34 }
 0x95b   :  { %v5968_v30 = vpop.eup %5967 }
 0x95c   :  { %v2397_v63 = vmul.f32 %v5968_v30, %v2377_v43 }
 0x95d   :  { %v5970_v45 = vpop.eup %5969 }
 0x95e   :  { %v2399_v48 = vmul.f32 %v2397_v63, %v2379_v62  ;;  %v2398_v31 = vmul.f32 %v5970_v45, %v2381_v24  ;;  %v5727_v63 = vld [vmem:[#allocation2 + $0x424] ss:$48 sps:$4 sm:$0xff]   ;;  %v5730_v62 = vld [vmem:[#allocation2 + $0x42c] ss:$48 sps:$4 sm:$0xff]   ;;  %v5725_v45 = vld [vmem:[#allocation2 + $0x420] ss:$48 sps:$4 sm:$0xff]  }
 0x95f   :  { %3156 = vmatprep.subr.bf16.mxu0 %v5727_v63  ;;  %v5790_v63 = vld [vmem:[#allocation2 + $0x4fc] ss:$48 sps:$4 sm:$0xff]  }
 0x960   :  { %v2400_v53 = vmul.f32 %v2398_v31, %v2383_v3  ;;  %v2402_v57 = vmul.f32 %v2399_v48, %v2399_v48  ;;  %3157 = vmatpush1.bf16.msra.mxu0 %v5725_v45  ;;  %v5736_v31 = vld [vmem:[#allocation2 + $0x48c] ss:$48 sps:$4 sm:$0xff]   ;;  %v5734_v3 = vld [vmem:[#allocation2 + $0x488] ss:$48 sps:$4 sm:$0xff]  }
 0x961   :  { %v5788_v45 = vld [vmem:[#allocation2 + $0x4f8] ss:$48 sps:$4 sm:$0xff]  }
 0x962   :  { %2404 = vadd.xlane.f32.xlu0 %v2402_v57  ;;  %v2403_v52 = vmul.f32 %v2400_v53, %v2400_v53  ;;  %v5742_v57 = vld [vmem:[#allocation2 + $0x4ec] ss:$48 sps:$4 sm:$0xff]  }
 0x964   :  { %2406 = vadd.xlane.f32.xlu1 %v2403_v52  ;;  %v5737_v52 = vld [vmem:[#allocation2 + $0x4e0] ss:$48 sps:$4 sm:$0xff]  }
 0x9ef   :  { %v2405_v25 = vpop.xlane.xlu0 %2404 }
 0x9f0   :  { %v2408_v23 = vmul.f32 0.03125, %v2405_v25  ;;  %v5754_v25 = vld [vmem:[#allocation2 + $0x5ac] ss:$48 sps:$4 sm:$0xff]  }
 0x9f1   :  { %v2407_v61 = vpop.xlane.xlu1 %2406 }
 0x9f2   :  { %v2410_v27 = vadd.f32 1e-06, %v2408_v23  ;;  %v2409_v21 = vmul.f32 0.03125, %v2407_v61  ;;  %v5749_v23 = vld [vmem:[#allocation2 + $0x5a0] ss:$48 sps:$4 sm:$0xff]  }
 0x9f3   :  { %v5752_v61 = vld [vmem:[#allocation2 + $0x5a8] ss:$48 sps:$4 sm:$0xff]  }
 0x9f4   :  { %5971 = vrsqrt.f32 %v2410_v27  ;;  %v2411_v19 = vadd.f32 1e-06, %v2409_v21  ;;  %v5757_v27 = vld [vmem:[#allocation2 + $0x314] ss:$48 sps:$4 sm:$0xff]   ;;  %v5760_v21 = vld [vmem:[#allocation2 + $0x31c] ss:$48 sps:$4 sm:$0xff]  }
 0x9f6   :  { %5973 = vrsqrt.f32 %v2411_v19 }
 0x9fe   :  { %v5972_v8 = vpop.eup %5971 }
 0x9ff   :  { %v2414_v28 = vmul.f32 %v5972_v8, %v2399_v48  ;;  %v5728_v48 = vld [vmem:[#allocation2 + $0x428] ss:$48 sps:$4 sm:$0xff]  }
 0xa00   :  { %v5974_v10 = vpop.eup %5973 }
 0xa01   :  { %v2415_v55 = vmul.f32 %v5974_v10, %v2400_v53  ;;  %v2422_v37 = vmul.f32 %v5021_v13, %v2414_v28  ;;  %v5739_v53 = vld [vmem:[#allocation2 + $0x4e4] ss:$48 sps:$4 sm:$0xff]  }
 0xa03   :  { %v2423_v38 = vmul.f32 %v5021_v13, %v2415_v55 }
 0xa05   :  { %v2424_v2 = vpack.c.bf16 %v2423_v38, %v2422_v37 }
 0xa07   :  { %5401 = vmatmul.mubr.bf16.vlgmr.msra.gmra.mrb[32].mxu1 %v2424_v2 }
 0xa08   :  { %3225 = vmatprep.mubr.bf16.mxu1 %v7902_v56  ;;  %3194 = vmatpush1.bf16.msra.mxu1 %v5710_v58 }
 0xa09   :  { %3195 = vmatprep.subr.bf16.mxu1 %v5718_v51  ;;  %v5758_v51 = vld [vmem:[#allocation2 + $0x318] ss:$48 sps:$4 sm:$0xff]  }
 0xa0c   :  { %3196 = vmatpush1.bf16.msra.mxu1 %v5716_v14  ;;  %v5763_v14 = vld [vmem:[#allocation2 + $0x374] ss:$48 sps:$4 sm:$0xff]  }
 0xa0d   :  { %3197 = vmatprep.subr.bf16.mxu1 %v5724_v7  ;;  %v5761_v7 = vld [vmem:[#allocation2 + $0x370] ss:$48 sps:$4 sm:$0xff]  }
 0xa10   :  { %3198 = vmatpush1.bf16.msra.mxu1 %v5722_v33  ;;  %v5769_v33 = vld [vmem:[#allocation2 + $0x3d4] ss:$48 sps:$4 sm:$0xff]  }
 0xa11   :  { %3199 = vmatprep.subr.bf16.mxu1 %v5730_v62  ;;  %v5785_v62 = vld [vmem:[#allocation2 + $0x4f0] ss:$48 sps:$4 sm:$0xff]  }
 0xa14   :  { %3200 = vmatpush1.bf16.msra.mxu1 %v5728_v48  ;;  %v5793_v48 = vld [vmem:[#allocation2 + $0x554] ss:$48 sps:$4 sm:$0xff]  }
 0xa15   :  { %3201 = vmatprep.subr.bf16.mxu1 %v5736_v31  ;;  %v5791_v31 = vld [vmem:[#allocation2 + $0x550] ss:$48 sps:$4 sm:$0xff]  }
 0xa18   :  { %3202 = vmatpush1.bf16.msra.mxu1 %v5734_v3  ;;  %v5799_v3 = vld [vmem:[#allocation2 + $0x5b4] ss:$48 sps:$4 sm:$0xff]  }
 0xa19   :  { %3203 = vmatprep.subr.bf16.mxu1 %v5742_v57  ;;  %v5797_v57 = vld [vmem:[#allocation2 + $0x5b0] ss:$48 sps:$4 sm:$0xff]  }
 0xa1c   :  { %3204 = vmatpush1.bf16.msra.mxu1 %v5740_v47  ;;  %v5805_v47 = vld [vmem:[#allocation2 + $0x324] ss:$48 sps:$4 sm:$0xff]  }
 0xa1d   :  { %3205 = vmatprep.subr.bf16.mxu1 %v5748_v42  ;;  %v5803_v42 = vld [vmem:[#allocation2 + $0x320] ss:$48 sps:$4 sm:$0xff]  }
 0xa20   :  { %3206 = vmatpush1.bf16.msra.mxu1 %v5746_v20  ;;  %v5811_v20 = vld [vmem:[#allocation2 + $0x384] ss:$48 sps:$4 sm:$0xff]  }
 0xa21   :  { %3207 = vmatprep.subr.bf16.mxu1 %v5754_v25  ;;  %v5809_v25 = vld [vmem:[#allocation2 + $0x380] ss:$48 sps:$4 sm:$0xff]  }
 0xa24   :  { %3208 = vmatpush1.bf16.msra.mxu1 %v5752_v61  ;;  %v5817_v61 = vld [vmem:[#allocation2 + $0x3e4] ss:$48 sps:$4 sm:$0xff]  }
 0xa25   :  { %3279 = vmatprep.subr.bf16.mxu1 %v5760_v21  ;;  %v5815_v21 = vld [vmem:[#allocation2 + $0x3e0] ss:$48 sps:$4 sm:$0xff]  }
 0xada   :  { %v2530_v43 = vpop.f32.mrb[32].mxu1 }
 0xadb   :  { %v2531_v54 = vadd.f32 %v5022_v49, %v2530_v43  ;;  %v5402_v16 = vpop.f32.mrb[33].mxu1  ;;  %v5767_v43 = vld [vmem:[#allocation2 + $0x3d0] ss:$48 sps:$4 sm:$0xff]  }
 0xadc   :  { %v2533_v24 = vpop.f32.mrb[34].mxu1  ;;  %v5778_v16 = vld [vmem:[#allocation2 + $0x43c] ss:$48 sps:$4 sm:$0xff]  }
 0xadd   :  { %v2544_v41 = vmul.f32 %v5031_v18, %v2531_v54  ;;  %v2534_v0 = vadd.f32 %v5022_v49, %v2533_v24  ;;  %v5403_v44 = vpop.f32.mrb[35].mxu1  ;;  %v5772_v49 = vld [vmem:[#allocation2 + $0x3dc] ss:$48 sps:$4 sm:$0xff]   ;;  %v5775_v54 = vld [vmem:[#allocation2 + $0x434] ss:$48 sps:$4 sm:$0xff]  }
 0xade   :  { %v5773_v24 = vld [vmem:[#allocation2 + $0x430] ss:$48 sps:$4 sm:$0xff]   ;;  %v5784_v44 = vld [vmem:[#allocation2 + $0x49c] ss:$48 sps:$4 sm:$0xff]  }
 0xadf   :  { %v7273_v50 = vadd.f32 %v2544_v41, %v7248_v4  ;;  %v2545_v5 = vmul.f32 %v5031_v18, %v2534_v0  ;;  %v5733_v4 = vld [vmem:[#allocation2 + $0x484] ss:$48 sps:$4 sm:$0xff]   ;;  %v5770_v18 = vld [vmem:[#allocation2 + $0x3d8] ss:$48 sps:$4 sm:$0xff]  }
 0xae0   :  { %3158 = vmatprep.subr.bf16.mxu0 %v5733_v4  ;;  %v5776_v41 = vld [vmem:[#allocation2 + $0x438] ss:$48 sps:$4 sm:$0xff]   ;;  %v5781_v0 = vld [vmem:[#allocation2 + $0x494] ss:$48 sps:$4 sm:$0xff]   ;;  %v5796_v4 = vld [vmem:[#allocation2 + $0x55c] ss:$48 sps:$4 sm:$0xff]  }
 0xae1   :  { %7903 = vst [vmem:[#allocation33_spill] sm:$0xff] %v7273_v50  ;;  %v7276_v34 = vadd.f32 %v2545_v5, %v7255_v22  ;;  %v2550_v1 = vmul.f32 %v7273_v50, %v7273_v50  ;;  %v5731_v22 = vld [vmem:[#allocation2 + $0x480] ss:$48 sps:$4 sm:$0xff]  }
 0xae2   :  { %3159 = vmatpush1.bf16.msra.mxu0 %v5731_v22  ;;  %v5779_v5 = vld [vmem:[#allocation2 + $0x490] ss:$48 sps:$4 sm:$0xff]   ;;  %v5794_v22 = vld [vmem:[#allocation2 + $0x558] ss:$48 sps:$4 sm:$0xff]  }
 0xae3   :  { %7904 = vst [vmem:[#allocation31_spill] sm:$0xff] %v7276_v34  ;;  %2552 = vadd.xlane.f32.xlu0 %v2550_v1  ;;  %v2551_v30 = vmul.f32 %v7276_v34, %v7276_v34  ;;  %3160 = vmatprep.subr.bf16.mxu0 %v5739_v53  ;;  %v5782_v1 = vld [vmem:[#allocation2 + $0x498] ss:$48 sps:$4 sm:$0xff]   ;;  %v5802_v53 = vld [vmem:[#allocation2 + $0x5bc] ss:$48 sps:$4 sm:$0xff]  }
 0xae5   :  { %2554 = vadd.xlane.f32.xlu1 %v2551_v30  ;;  %v5787_v30 = vld [vmem:[#allocation2 + $0x4f4] ss:$48 sps:$4 sm:$0xff]  }
 0xae6   :  { %3161 = vmatpush1.bf16.msra.mxu0 %v5737_v52  ;;  %v5800_v52 = vld [vmem:[#allocation2 + $0x5b8] ss:$48 sps:$4 sm:$0xff]  }
 0xae7   :  { %3162 = vmatprep.subr.bf16.mxu0 %v5745_v29  ;;  %v5808_v29 = vld [vmem:[#allocation2 + $0x32c] ss:$48 sps:$4 sm:$0xff]  }
 0xaea   :  { %3163 = vmatpush1.bf16.msra.mxu0 %v5743_v11  ;;  %v5806_v11 = vld [vmem:[#allocation2 + $0x328] ss:$48 sps:$4 sm:$0xff]  }
 0xaeb   :  { %3164 = vmatprep.subr.bf16.mxu0 %v5751_v59  ;;  %v5814_v59 = vld [vmem:[#allocation2 + $0x38c] ss:$48 sps:$4 sm:$0xff]  }
 0xaee   :  { %3165 = vmatpush1.bf16.msra.mxu0 %v5749_v23  ;;  %v5812_v23 = vld [vmem:[#allocation2 + $0x388] ss:$48 sps:$4 sm:$0xff]  }
 0xaef   :  { %3236 = vmatprep.subr.bf16.mxu0 %v5757_v27  ;;  %v5820_v27 = vld [vmem:[#allocation2 + $0x3ec] ss:$48 sps:$4 sm:$0xff]  }
 0xb70   :  { %v2553_v19 = vpop.xlane.xlu0 %2552 }
 0xb71   :  { %v2556_v8 = vmul.f32 0.03125, %v2553_v19  ;;  %v5818_v19 = vld [vmem:[#allocation2 + $0x3e8] ss:$48 sps:$4 sm:$0xff]  }
 0xb72   :  { %v2555_v28 = vpop.xlane.xlu1 %2554 }
 0xb73   :  { %v2558_v10 = vadd.f32 1e-06, %v2556_v8  ;;  %v2557_v13 = vmul.f32 0.03125, %v2555_v28  ;;  %v5823_v8 = vld [vmem:[#allocation2 + $0x444] ss:$48 sps:$4 sm:$0xff]  }
 0xb74   :  { %v5826_v28 = vld [vmem:[#allocation2 + $0x44c] ss:$48 sps:$4 sm:$0xff]  }
 0xb75   :  { %5975 = vrsqrt.f32 %v2558_v10  ;;  %v2559_v55 = vadd.f32 1e-06, %v2557_v13  ;;  %v5821_v10 = vld [vmem:[#allocation2 + $0x440] ss:$48 sps:$4 sm:$0xff]   ;;  %v5824_v13 = vld [vmem:[#allocation2 + $0x448] ss:$48 sps:$4 sm:$0xff]  }
 0xb77   :  { %5977 = vrsqrt.f32 %v2559_v55  ;;  %v5829_v55 = vld [vmem:[#allocation2 + $0x4a4] ss:$48 sps:$4 sm:$0xff]  }
 0xb7f   :  { %v5976_v37 = vpop.eup %5975 }
 0xb80   :  { %v2562_v38 = vmul.f32 %v5976_v37, %v7273_v50  ;;  %v5832_v37 = vld [vmem:[#allocation2 + $0x4ac] ss:$48 sps:$4 sm:$0xff]  }
 0xb81   :  { %v5978_v2 = vpop.eup %5977 }
 0xb82   :  { %v2563_v6 = vmul.f32 %v5978_v2, %v7276_v34  ;;  %v2570_v58 = vmul.f32 %v5033_v40, %v2562_v38  ;;  %v5827_v38 = vld [vmem:[#allocation2 + $0x4a0] ss:$48 sps:$4 sm:$0xff]   ;;  %v5830_v2 = vld [vmem:[#allocation2 + $0x4a8] ss:$48 sps:$4 sm:$0xff]  }
 0xb83   :  { %v7509_v34 = vld [vmem:[%s7888_s25 + $0x38] sm:$0xff] }
 0xb84   :  { %v2571_v32 = vmul.f32 %v5033_v40, %v2563_v6  ;;  %v5835_v40 = vld [vmem:[#allocation2 + $0x504] ss:$48 sps:$4 sm:$0xff]   ;;  %v5838_v6 = vld [vmem:[#allocation2 + $0x50c] ss:$48 sps:$4 sm:$0xff]  }
 0xb86   :  { %v7287_v46 = vpack.c.bf16 %v2571_v32, %v2570_v58  ;;  %v5833_v58 = vld [vmem:[#allocation2 + $0x500] ss:$48 sps:$4 sm:$0xff]   ;;  %v5836_v32 = vld [vmem:[#allocation2 + $0x508] ss:$48 sps:$4 sm:$0xff]  }
 0xb88   :  { %3183 = vmatmul.mubr.bf16.vlgmr.msra.gmra.mrb[36].mxu0 %v7287_v46  ;;  %3226 = vmatmul.mubr.bf16.vlgmr.msra.gmra.mrb[36].mxu1 %v7287_v46 }
 0xb89   :  { %3237 = vmatpush1.bf16.msra.mxu0 %v5755_v15  ;;  %3280 = vmatpush1.bf16.msra.mxu1 %v5758_v51  ;;  %v5841_v15 = vld [vmem:[#allocation2 + $0x564] ss:$48 sps:$4 sm:$0xff]   ;;  %v5844_v51 = vld [vmem:[#allocation2 + $0x56c] ss:$48 sps:$4 sm:$0xff]  }
 0xb8a   :  { %3238 = vmatprep.subr.bf16.mxu0 %v5763_v14  ;;  %3281 = vmatprep.subr.bf16.mxu1 %v5766_v17  ;;  %v5839_v14 = vld [vmem:[#allocation2 + $0x560] ss:$48 sps:$4 sm:$0xff]   ;;  %v5842_v17 = vld [vmem:[#allocation2 + $0x568] ss:$48 sps:$4 sm:$0xff]  }
 0xb8b   :  { %3268 = vmatprep.mubr.bf16.mxu0 %v7902_v56  ;;  %3311 = vmatprep.mubr.bf16.mxu1 %v7902_v56 }
 0xb8d   :  { %3239 = vmatpush1.bf16.msra.mxu0 %v5761_v7  ;;  %3282 = vmatpush1.bf16.msra.mxu1 %v5764_v12  ;;  %v5847_v7 = vld [vmem:[#allocation2 + $0x5c4] ss:$48 sps:$4 sm:$0xff]   ;;  %v5850_v12 = vld [vmem:[#allocation2 + $0x5cc] ss:$48 sps:$4 sm:$0xff]  }
 0xb8e   :  { %3240 = vmatprep.subr.bf16.mxu0 %v5769_v33  ;;  %3283 = vmatprep.subr.bf16.mxu1 %v5772_v49  ;;  %v5845_v33 = vld [vmem:[#allocation2 + $0x5c0] ss:$48 sps:$4 sm:$0xff]   ;;  %v5848_v49 = vld [vmem:[#allocation2 + $0x5c8] ss:$48 sps:$4 sm:$0xff]  }
 0xb91   :  { %3241 = vmatpush1.bf16.msra.mxu0 %v5767_v43  ;;  %3284 = vmatpush1.bf16.msra.mxu1 %v5770_v18 }
 0xb92   :  { %3242 = vmatprep.subr.bf16.mxu0 %v5775_v54  ;;  %3285 = vmatprep.subr.bf16.mxu1 %v5778_v16 }
 0xb95   :  { %3243 = vmatpush1.bf16.msra.mxu0 %v5773_v24  ;;  %3286 = vmatpush1.bf16.msra.mxu1 %v5776_v41 }
 0xb96   :  { %3244 = vmatprep.subr.bf16.mxu0 %v5781_v0  ;;  %3287 = vmatprep.subr.bf16.mxu1 %v5784_v44 }
 0xb99   :  { %3245 = vmatpush1.bf16.msra.mxu0 %v5779_v5  ;;  %3288 = vmatpush1.bf16.msra.mxu1 %v5782_v1 }
 0xb9a   :  { %3246 = vmatprep.subr.bf16.mxu0 %v5787_v30  ;;  %3289 = vmatprep.subr.bf16.mxu1 %v5790_v63 }
 0xb9d   :  { %3247 = vmatpush1.bf16.msra.mxu0 %v5785_v62  ;;  %3290 = vmatpush1.bf16.msra.mxu1 %v5788_v45 }
 0xb9e   :  { %3248 = vmatprep.subr.bf16.mxu0 %v5793_v48  ;;  %3291 = vmatprep.subr.bf16.mxu1 %v5796_v4 }
 0xba1   :  { %3249 = vmatpush1.bf16.msra.mxu0 %v5791_v31  ;;  %3292 = vmatpush1.bf16.msra.mxu1 %v5794_v22 }
 0xba2   :  { %3250 = vmatprep.subr.bf16.mxu0 %v5799_v3  ;;  %3293 = vmatprep.subr.bf16.mxu1 %v5802_v53 }
 0xba5   :  { %3251 = vmatpush1.bf16.msra.mxu0 %v5797_v57  ;;  %3294 = vmatpush1.bf16.msra.mxu1 %v5800_v52 }
 0xba6   :  { %3322 = vmatprep.subr.bf16.mxu0 %v5805_v47  ;;  %3365 = vmatprep.subr.bf16.mxu1 %v5808_v29 }
 0xba8   :  { %3269 = vmatmul.mubr.bf16.vlgmr.msra.gmra.mrb[40].mxu0 %v7287_v46  ;;  %3312 = vmatmul.mubr.bf16.vlgmr.msra.gmra.mrb[40].mxu1 %v7287_v46 }
 0xba9   :  { %3323 = vmatpush1.bf16.msra.mxu0 %v5803_v42  ;;  %3366 = vmatpush1.bf16.msra.mxu1 %v5806_v11 }
 0xbaa   :  { %3324 = vmatprep.subr.bf16.mxu0 %v5811_v20  ;;  %3367 = vmatprep.subr.bf16.mxu1 %v5814_v59 }
 0xbab   :  { %3354 = vmatprep.mubr.bf16.mxu0 %v7902_v56  ;;  %3397 = vmatprep.mubr.bf16.mxu1 %v7902_v56  ;;  %v6045_v56 = vld [vmem:[%s7831_s2] sm:$0xff] }
 0xbad   :  { %3325 = vmatpush1.bf16.msra.mxu0 %v5809_v25  ;;  %3368 = vmatpush1.bf16.msra.mxu1 %v5812_v23 }
 0xbae   :  { %3326 = vmatprep.subr.bf16.mxu0 %v5817_v61  ;;  %3369 = vmatprep.subr.bf16.mxu1 %v5820_v27 }
 0xbb1   :  { %3327 = vmatpush1.bf16.msra.mxu0 %v5815_v21  ;;  %3370 = vmatpush1.bf16.msra.mxu1 %v5818_v19 }
 0xbb2   :  { %3328 = vmatprep.subr.bf16.mxu0 %v5823_v8  ;;  %3371 = vmatprep.subr.bf16.mxu1 %v5826_v28 }
 0xbb5   :  { %3329 = vmatpush1.bf16.msra.mxu0 %v5821_v10  ;;  %3372 = vmatpush1.bf16.msra.mxu1 %v5824_v13 }
 0xbb6   :  { %3330 = vmatprep.subr.bf16.mxu0 %v5829_v55  ;;  %3373 = vmatprep.subr.bf16.mxu1 %v5832_v37 }
 0xbb9   :  { %3331 = vmatpush1.bf16.msra.mxu0 %v5827_v38  ;;  %3374 = vmatpush1.bf16.msra.mxu1 %v5830_v2 }
 0xbba   :  { %3332 = vmatprep.subr.bf16.mxu0 %v5835_v40  ;;  %3375 = vmatprep.subr.bf16.mxu1 %v5838_v6 }
 0xbbd   :  { %3333 = vmatpush1.bf16.msra.mxu0 %v5833_v58  ;;  %3376 = vmatpush1.bf16.msra.mxu1 %v5836_v32 }
 0xbbe   :  { %3334 = vmatprep.subr.bf16.mxu0 %v5841_v15  ;;  %3377 = vmatprep.subr.bf16.mxu1 %v5844_v51 }
 0xbc1   :  { %3335 = vmatpush1.bf16.msra.mxu0 %v5839_v14  ;;  %3378 = vmatpush1.bf16.msra.mxu1 %v5842_v17 }
 0xbc2   :  { %3336 = vmatprep.subr.bf16.mxu0 %v5847_v7  ;;  %3379 = vmatprep.subr.bf16.mxu1 %v5850_v12 }
 0xbc5   :  { %3337 = vmatpush1.bf16.msra.mxu0 %v5845_v33  ;;  %3380 = vmatpush1.bf16.msra.mxu1 %v5848_v49  ;;  %v6037_v49 = vld [vmem:[%s7888_s25] sm:$0xff] }
 0xbc6   :  { %5410 = vmatprep.subr.bf16.mxu1 %v7889_v9  ;;  %5404 = vmatprep.subr.bf16.mxu0 %v7889_v9 }
 0xbc8   :  { %3355 = vmatmul.mubr.bf16.vlgmr.msra.gmra.mrb[44].mxu0 %v7287_v46  ;;  %3398 = vmatmul.mubr.bf16.vlgmr.msra.gmra.mrb[44].mxu1 %v7287_v46 }
 0xbc9   :  { %5406 = vmatprep.mubr.msk.bf16.mxu0 %vm6379_vm2, %v7889_v9  ;;  %5412 = vmatprep.mubr.msk.bf16.mxu1 %vm6379_vm2, %v7889_v9 }
 0xc5b   :  { %v7305_v43 = vpop.f32.mrb[36].mxu0  ;;  %v7307_v18 = vpop.f32.mrb[36].mxu1 }
 0xc5c   :  { %3408 = vrot.lane.b32.xlu1 %v7305_v43, %s7879_s30  ;;  %v7311_v54 = vpop.f32.mrb[37].mxu0  ;;  %v7313_v16 = vpop.f32.mrb[37].mxu1 }
 0xc5d   :  { %v7315_v24 = vpop.f32.mrb[38].mxu0  ;;  %v7317_v46 = vpop.f32.mrb[38].mxu1 }
 0xc5e   :  { %3410 = vrot.lane.b32.xlu0 %v7315_v24, %s7879_s30  ;;  %v7321_v41 = vpop.f32.mrb[39].mxu0  ;;  %v7323_v0 = vpop.f32.mrb[39].mxu1 }
 0xc60   :  { %3432 = vrot.lane.b32.xlu1 %v7305_v43, %s6378_s20 }
 0xc62   :  { %3434 = vrot.lane.b32.xlu0 %v7315_v24, %s6378_s20 }
 0xc64   :  { %3440 = vrot.lane.b32.xlu1 %v7307_v18, %s6378_s20 }
 0xc66   :  { %3442 = vrot.lane.b32.xlu0 %v7317_v46, %s6378_s20 }
 0xc68   :  { %3412 = vrot.lane.b32.xlu1 %v7311_v54, %s7879_s30 }
 0xc6a   :  { %3414 = vrot.lane.b32.xlu0 %v7321_v41, %s7879_s30 }
 0xc6c   :  { %3420 = vrot.lane.b32.xlu1 %v7313_v16, %s7879_s30 }
 0xc6e   :  { %3422 = vrot.lane.b32.xlu0 %v7323_v0, %s7879_s30 }
 0xc70   :  { %3436 = vrot.lane.b32.xlu1 %v7311_v54, %s6378_s20 }
 0xc72   :  { %3438 = vrot.lane.b32.xlu0 %v7321_v41, %s6378_s20 }
 0xc7b   :  { %v7345_v44 = vpop.f32.mrb[40].mxu0  ;;  %v7347_v5 = vpop.f32.mrb[40].mxu1 }
 0xc7c   :  { %v7349_v1 = vpop.f32.mrb[41].mxu0  ;;  %3583 = vrot.lane.b32.xlu1 %v7345_v44, %s6378_s20  ;;  %3559 = vrot.lane.b32.xlu0 %v7345_v44, %s7879_s30  ;;  %v7355_v30 = vpop.f32.mrb[41].mxu1  ;;  %v3615_v50 = vmul.f32 %v6037_v49, %v7345_v44 }
 0xc7d   :  { %v7357_v63 = vpop.f32.mrb[42].mxu0  ;;  %v7359_v62 = vpop.f32.mrb[42].mxu1 }
 0xc7e   :  { %v7361_v45 = vpop.f32.mrb[43].mxu0  ;;  %v7363_v48 = vpop.f32.mrb[43].mxu1 }
 0xc80   :  { %3585 = vrot.lane.b32.xlu0 %v7357_v63, %s6378_s20  ;;  %3591 = vrot.lane.b32.xlu1 %v7347_v5, %s6378_s20 }
 0xc84   :  { %3567 = vrot.lane.b32.xlu1 %v7347_v5, %s7879_s30  ;;  %3593 = vrot.lane.b32.xlu0 %v7359_v62, %s6378_s20 }
 0xc88   :  { %3563 = vrot.lane.b32.xlu1 %v7349_v1, %s7879_s30  ;;  %3569 = vrot.lane.b32.xlu0 %v7359_v62, %s7879_s30 }
 0xc8c   :  { %3571 = vrot.lane.b32.xlu1 %v7355_v30, %s7879_s30  ;;  %3565 = vrot.lane.b32.xlu0 %v7361_v45, %s7879_s30 }
 0xc90   :  { %3587 = vrot.lane.b32.xlu1 %v7349_v1, %s6378_s20  ;;  %3573 = vrot.lane.b32.xlu0 %v7363_v48, %s7879_s30 }
 0xc94   :  { %3595 = vrot.lane.b32.xlu1 %v7355_v30, %s6378_s20  ;;  %3589 = vrot.lane.b32.xlu0 %v7361_v45, %s6378_s20 }
 0xc98   :  { %3561 = vrot.lane.b32.xlu1 %v7357_v63, %s7879_s30  ;;  %3597 = vrot.lane.b32.xlu0 %v7363_v48, %s6378_s20 }
 0xc9b   :  { %v3356_v4 = vpop.f32.mrb[44].mxu0  ;;  %v7393_v31 = vpop.f32.mrb[44].mxu1 }
 0xc9c   :  { %7905 = vst [vmem:[#allocation32_spill] sm:$0xff] %v7393_v31  ;;  %v7395_v22 = vpop.f32.mrb[45].mxu0  ;;  %3416 = vrot.lane.b32.xlu1 %v7307_v18, %s7879_s30  ;;  %3418 = vrot.lane.b32.xlu0 %v7317_v46, %s7879_s30  ;;  %v7401_v3 = vpop.f32.mrb[45].mxu1 }
 0xc9d   :  { %7906 = vst [vmem:[#allocation29_spill] sm:$0xff] %v7395_v22  ;;  %7907 = vst [vmem:[#allocation34_spill] sm:$0xff] %v7401_v3  ;;  %v3360_v53 = vpop.f32.mrb[46].mxu0  ;;  %v7403_v57 = vpop.f32.mrb[46].mxu1 }
 0xc9e   :  { %7908 = vst [vmem:[#allocation30_spill] sm:$0xff] %v7403_v57  ;;  %v3710_v52 = vpack.c.bf16 %v3360_v53, %v3356_v4  ;;  %v7407_v29 = vpop.f32.mrb[47].mxu0  ;;  %v7409_v42 = vpop.f32.mrb[47].mxu1  ;;  %v3464_v4 = vmul.f32 %v6037_v49, %v7305_v43  ;;  %v6038_v53 = vld [vmem:[%s7888_s25 + $0x10] sm:$0xff]  ;;  %v6040_v43 = vld [vmem:[%s7888_s25 + $0x18] sm:$0xff] }
 0xc9f   :  { %7909 = vst [vmem:[#allocation37_spill] sm:$0xff] %v7407_v29  ;;  %7910 = vst [vmem:[#allocation38_spill] sm:$0xff] %v7409_v42  ;;  %v3617_v44 = vmul.f32 %v6038_v53, %v7347_v5 }
 0xca0   :  { %5411 = vmatpush3.bf16.msra.mxu1 %v3710_v52  ;;  %3444 = vrot.lane.b32.xlu1 %v7313_v16, %s6378_s20  ;;  %v7468_v52 = vmul.f32 %v6038_v53, %v7307_v18  ;;  %v6041_v18 = vld [vmem:[%s7888_s25 + $0x20] sm:$0xff] }
 0xca1   :  { %3446 = vrot.lane.b32.xlu0 %v7323_v0, %s6378_s20  ;;  %5422 = vmatprep.subr.bf16.mxu1 %v7889_v9 }
 0xcce   :  { %v3409_v59 = vpop.permute.xlu1 %3408 }
 0xcd0   :  { %v3411_v25 = vpop.permute.xlu0 %3410 }
 0xcd2   :  { %v7420_v23 = vpop.permute.xlu1 %3432 }
 0xcd4   :  { %v7422_v61 = vpop.permute.xlu0 %3434 }
 0xcd6   :  { %v7424_v27 = vpop.permute.xlu1 %3440 }
 0xcd8   :  { %v7426_v21 = vpop.permute.xlu0 %3442 }
 0xcda   :  { %v7428_v19 = vpop.permute.xlu1 %3412 }
 0xcdb   :  { %v3428_v17 = vsel %vm1127_vm1, %v3409_v59, %v7428_v19 }
 0xcdc   :  { %v7430_v8 = vpop.permute.xlu0 %3414 }
 0xcde   :  { %v7432_v28 = vpop.permute.xlu1 %3420 }
 0xcdf   :  { %v3430_v7 = vsel %vm1127_vm1, %v7432_v28, %v3409_v59 }
 0xce0   :  { %v7434_v10 = vpop.permute.xlu0 %3422 }
 0xce2   :  { %v3437_v13 = vpop.permute.xlu1 %3436 }
 0xce3   :  { %v3450_v32 = vsel %vm1152_vm0, %v3437_v13, %v7424_v27  ;;  %v3452_v15 = vsel %vm1152_vm0, %v7420_v23, %v3437_v13  ;;  %v6039_v13 = vld [vmem:[%s7888_s25 + $0x8] sm:$0xff] }
 0xce4   :  { %v3439_v55 = vpop.permute.xlu0 %3438  ;;  %v3456_v12 = vadd.f32 %v3452_v15, %v3430_v7  ;;  %v3457_v33 = vadd.f32 %v3450_v32, %v3428_v17  ;;  %v3465_v59 = vmul.f32 %v6039_v13, %v7311_v54  ;;  %v7480_v17 = vmul.f32 %v6040_v43, %v7313_v16  ;;  %v6042_v16 = vld [vmem:[%s7888_s25 + $0x30] sm:$0xff] }
 0xce5   :  { %v7486_v7 = vmul.f32 %v6041_v18, %v7315_v24  ;;  %v3451_v54 = vsel %vm1152_vm0, %v3439_v55, %v7426_v21  ;;  %v3453_v20 = vsel %vm1152_vm0, %v7422_v61, %v3439_v55  ;;  %v7498_v47 = vmul.f32 %v6042_v16, %v7317_v46  ;;  %v6043_v24 = vld [vmem:[%s7888_s25 + $0x28] sm:$0xff] }
 0xce6   :  { %v7504_v11 = vmul.f32 %v6043_v24, %v7321_v41  ;;  %v7513_v55 = vmul.f32 %v7509_v34, %v7323_v0  ;;  %v3429_v46 = vsel %vm1127_vm1, %v3411_v25, %v7430_v8  ;;  %v3431_v41 = vsel %vm1127_vm1, %v7434_v10, %v3411_v25  ;;  %v6046_v0 = vld [vmem:[%s7831_s2 + $0x8] sm:$0xff] }
 0xce7   :  { %v3472_v3 = vmul.f32 %v6045_v56, %v3456_v12  ;;  %v3473_v42 = vmul.f32 %v6046_v0, %v3457_v33  ;;  %v3616_v49 = vmul.f32 %v6039_v13, %v7349_v1  ;;  %v3460_v31 = vadd.f32 %v3453_v20, %v3431_v41  ;;  %v6047_v41 = vld [vmem:[%s7831_s2 + $0x20] sm:$0xff] }
 0xce8   :  { %v3461_v57 = vadd.f32 %v3451_v54, %v3429_v46  ;;  %v3618_v1 = vmul.f32 %v6040_v43, %v7355_v30  ;;  %v3619_v20 = vmul.f32 %v6041_v18, %v7357_v63  ;;  %v3621_v13 = vmul.f32 %v6042_v16, %v7359_v62  ;;  %v6048_v30 = vld [vmem:[%s7831_s2 + $0x28] sm:$0xff]  ;;  %v6050_v18 = vld [vmem:[%s7831_s2 + $0x18] sm:$0xff] }
 0xce9   :  { %v3620_v54 = vmul.f32 %v6043_v24, %v7361_v45  ;;  %v7544_v46 = vadd.f32 %v3472_v3, %v3464_v4  ;;  %v3476_v60 = vmul.f32 %v6047_v41, %v3460_v31 }
 0xcea   :  { %v3477_v63 = vmul.f32 %v6048_v30, %v3461_v57 }
 0xcee   :  { %v7436_v37 = vpop.permute.xlu1 %3583  ;;  %v3560_v38 = vpop.permute.xlu0 %3559 }
 0xcf2   :  { %v7438_v2 = vpop.permute.xlu0 %3585  ;;  %v7440_v40 = vpop.permute.xlu1 %3591 }
 0xcf6   :  { %v7442_v6 = vpop.permute.xlu1 %3567  ;;  %v7444_v58 = vpop.permute.xlu0 %3593 }
 0xcfa   :  { %v3564_v51 = vpop.permute.xlu1 %3563  ;;  %v7452_v14 = vpop.permute.xlu0 %3569 }
 0xcfb   :  { %v3579_v25 = vsel %vm1127_vm1, %v3560_v38, %v3564_v51  ;;  %v3577_v45 = vsel %vm1127_vm1, %v3564_v51, %v7442_v6 }
 0xcfe   :  { %v3572_v32 = vpop.permute.xlu1 %3571  ;;  %v7474_v15 = vpop.permute.xlu0 %3565 }
 0xcff   :  { %v3581_v26 = vsel %vm1127_vm1, %v3572_v32, %v3560_v38  ;;  %v7546_v38 = vadd.f32 %v3473_v42, %v3465_v59  ;;  %v3575_v3 = vsel %vm1127_vm1, %v7442_v6, %v3572_v32  ;;  %v3578_v51 = vsel %vm1127_vm1, %v7474_v15, %v7452_v14 }
 0xd02   :  { %v3588_v22 = vpop.permute.xlu1 %3587  ;;  %v3574_v29 = vpop.permute.xlu0 %3573 }
 0xd03   :  { %v3601_v12 = vsel %vm1152_vm0, %v3588_v22, %v7440_v40  ;;  %v3603_v5 = vsel %vm1152_vm0, %v7436_v37, %v3588_v22  ;;  %v3576_v6 = vsel %vm1127_vm1, %v7452_v14, %v3574_v29 }
 0xd04   :  { %v3607_v33 = vadd.f32 %v3603_v5, %v3581_v26  ;;  %v3608_v53 = vadd.f32 %v3601_v12, %v3579_v25 }
 0xd06   :  { %v3623_v26 = vmul.f32 %v6045_v56, %v3607_v33  ;;  %v3624_v22 = vmul.f32 %v6046_v0, %v3608_v53  ;;  %v3596_v43 = vpop.permute.xlu1 %3595  ;;  %v3590_v62 = vpop.permute.xlu0 %3589 }
 0xd07   :  { %v3599_v31 = vsel %vm1152_vm0, %v7440_v40, %v3596_v43  ;;  %v3605_v57 = vsel %vm1152_vm0, %v3596_v43, %v7436_v37  ;;  %v3602_v40 = vsel %vm1152_vm0, %v3590_v62, %v7444_v58  ;;  %v6049_v37 = vld [vmem:[%s7831_s2 + $0x10] sm:$0xff] }
 0xd08   :  { %v7566_v56 = vadd.f32 %v3623_v26, %v3615_v50  ;;  %v7568_v42 = vadd.f32 %v3624_v22, %v3616_v49  ;;  %v3609_v4 = vadd.f32 %v3599_v31, %v3577_v45  ;;  %v3610_v59 = vadd.f32 %v3605_v57, %v3575_v3 }
 0xd09   :  { %v3604_v50 = vsel %vm1152_vm0, %v7438_v2, %v3590_v62  ;;  %v3622_v62 = vmul.f32 %v7509_v34, %v7363_v48  ;;  %v7619_v34 = vadd.f32 %v3477_v63, %v7504_v11  ;;  %v3491_v11 = vmul.f32 %v7546_v38, %v7546_v38 }
 0xd0a   :  { %v3625_v32 = vmul.f32 %v6049_v37, %v3609_v4  ;;  %v3626_v16 = vmul.f32 %v6050_v18, %v3610_v59  ;;  %v3562_v24 = vpop.permute.xlu1 %3561  ;;  %v3598_v14 = vpop.permute.xlu0 %3597  ;;  %v3641_v0 = vmul.f32 %v7566_v56, %v7566_v56  ;;  %v3642_v49 = vmul.f32 %v7568_v42, %v7568_v42 }
 0xd0b   :  { %v3580_v25 = vsel %vm1127_vm1, %v3562_v24, %v7474_v15  ;;  %v3582_v12 = vsel %vm1127_vm1, %v3574_v29, %v3562_v24  ;;  %v3600_v5 = vsel %vm1152_vm0, %v7444_v58, %v3598_v14  ;;  %v3606_v33 = vsel %vm1152_vm0, %v3598_v14, %v7438_v2  ;;  %v6051_v2 = vld [vmem:[%s7831_s2 + $0x30] sm:$0xff] }
 0xd0c   :  { %v7604_v53 = vadd.f32 %v3625_v32, %v3617_v44  ;;  %v3611_v26 = vadd.f32 %v3604_v50, %v3582_v12  ;;  %v3612_v22 = vadd.f32 %v3602_v40, %v3580_v25  ;;  %v3613_v43 = vadd.f32 %v3600_v5, %v3578_v51 }
 0xd0d   :  { %v7609_v15 = vadd.f32 %v3476_v60, %v7486_v7  ;;  %v3614_v29 = vadd.f32 %v3606_v33, %v3576_v6  ;;  %v7611_v45 = vadd.f32 %v3626_v16, %v3618_v1  ;;  %v6052_v60 = vld [vmem:[%s7831_s2 + $0x38] sm:$0xff]  ;;  %v3649_v7 = vadd.f32 %v3642_v49, %v3641_v0 }
 0xd0e   :  { %v3627_v3 = vmul.f32 %v6047_v41, %v3611_v26  ;;  %v3628_v58 = vmul.f32 %v6048_v30, %v3612_v22  ;;  %v3629_v44 = vmul.f32 %v6051_v2, %v3613_v43  ;;  %v3417_v31 = vpop.permute.xlu1 %3416  ;;  %v3419_v57 = vpop.permute.xlu0 %3418  ;;  %v3643_v4 = vmul.f32 %v7604_v53, %v7604_v53 }
 0xd0f   :  { %v3630_v48 = vmul.f32 %v6052_v60, %v3614_v29  ;;  %v3490_v1 = vmul.f32 %v7544_v46, %v7544_v46  ;;  %v3424_v59 = vsel %vm1127_vm1, %v3417_v31, %v7432_v28  ;;  %v3426_v51 = vsel %vm1127_vm1, %v7428_v19, %v3417_v31 }
 0xd10   :  { %v7626_v41 = vadd.f32 %v3627_v3, %v3619_v20  ;;  %v7628_v30 = vadd.f32 %v3628_v58, %v3620_v54  ;;  %v7635_v63 = vadd.f32 %v3629_v44, %v3621_v13  ;;  %v3644_v6 = vmul.f32 %v7611_v45, %v7611_v45 }
 0xd11   :  { %v3650_v20 = vadd.f32 %v3649_v7, %v3643_v4  ;;  %v3425_v54 = vsel %vm1127_vm1, %v3419_v57, %v7434_v10  ;;  %v3427_v28 = vsel %vm1127_vm1, %v7430_v8, %v3419_v57  ;;  %v7658_v24 = vadd.f32 %v3630_v48, %v3622_v62 }
 0xd12   :  { %v3445_v40 = vpop.permute.xlu1 %3444  ;;  %v3645_v13 = vmul.f32 %v7626_v41, %v7626_v41  ;;  %v3646_v50 = vmul.f32 %v7628_v30, %v7628_v30  ;;  %v3494_v5 = vmul.f32 %v7609_v15, %v7609_v15  ;;  %v3495_v33 = vmul.f32 %v7619_v34, %v7619_v34 }
 0xd13   :  { %v3448_v19 = vsel %vm1152_vm0, %v7424_v27, %v3445_v40  ;;  %v3454_v32 = vsel %vm1152_vm0, %v3445_v40, %v7420_v23  ;;  %v3447_v10 = vpop.permute.xlu0 %3446  ;;  %v3651_v16 = vadd.f32 %v3650_v20, %v3644_v6  ;;  %v3647_v23 = vmul.f32 %v7635_v63, %v7635_v63 }
 0xd14   :  { %v3458_v8 = vadd.f32 %v3448_v19, %v3426_v51  ;;  %v3459_v14 = vadd.f32 %v3454_v32, %v3424_v59  ;;  %v3449_v0 = vsel %vm1152_vm0, %v7426_v21, %v3447_v10  ;;  %v3455_v49 = vsel %vm1152_vm0, %v3447_v10, %v7422_v61 }
 0xd15   :  { %v3462_v25 = vadd.f32 %v3449_v0, %v3427_v28  ;;  %v3463_v27 = vadd.f32 %v3455_v49, %v3425_v54  ;;  %3652 = vadd.xlane.f32.xlu1 %v3651_v16  ;;  %v3654_v12 = vadd.f32 %v3646_v50, %v3645_v13  ;;  %v3648_v36 = vmul.f32 %v7658_v24, %v7658_v24  ;;  %v3640_v50 = vld [vmem:[#allocation6 + $0x4] sm:$0xf] }
 0xd16   :  { %v3474_v26 = vmul.f32 %v6049_v37, %v3458_v8  ;;  %v3475_v22 = vmul.f32 %v6050_v18, %v3459_v14  ;;  %v3677_v32 = vrot.slane %v3640_v50, %v7126_v35  ;;  %v3489_v8 = vld [vmem:[#allocation4 + $0x4] sm:$0xf] }
 0xd17   :  { %v3478_v21 = vmul.f32 %v6051_v2, %v3462_v25  ;;  %v3479_v43 = vmul.f32 %v6052_v60, %v3463_v27  ;;  %v3655_v61 = vadd.f32 %v3654_v12, %v3647_v23  ;;  %v3498_v2 = vadd.f32 %v3491_v11, %v3490_v1 }
 0xd18   :  { %v7675_v62 = vadd.f32 %v3474_v26, %v7468_v52  ;;  %v7678_v29 = vadd.f32 %v3475_v22, %v7480_v17  ;;  %v3503_v52 = vadd.f32 %v3495_v33, %v3494_v5  ;;  %v3526_v49 = vrot.slane %v3489_v8, %v7126_v35 }
 0xd19   :  { %v7681_v3 = vadd.f32 %v3478_v21, %v7498_v47  ;;  %v7684_v58 = vadd.f32 %v3479_v43, %v7513_v55  ;;  %v3656_v37 = vadd.f32 %v3655_v61, %v3648_v36  ;;  %v3681_v26 = vrot.slane %v3640_v50, %v7135_v39 }
 0xd1a   :  { %v3492_v18 = vmul.f32 %v7675_v62, %v7675_v62  ;;  %v3493_v17 = vmul.f32 %v7678_v29, %v7678_v29  ;;  %v3530_v36 = vrot.slane %v3489_v8, %v7135_v39 }
 0xd1b   :  { %3657 = vadd.xlane.f32.xlu0 %v3656_v37  ;;  %v3496_v44 = vmul.f32 %v7681_v3, %v7681_v3  ;;  %v3497_v47 = vmul.f32 %v7684_v58, %v7684_v58 }
 0xd1c   :  { %v3499_v31 = vadd.f32 %v3498_v2, %v3492_v18 }
 0xd1d   :  { %v3504_v57 = vadd.f32 %v3503_v52, %v3496_v44 }
 0xd1e   :  { %v3500_v55 = vadd.f32 %v3499_v31, %v3493_v17 }
 0xd1f   :  { %v3505_v4 = vadd.f32 %v3504_v57, %v3497_v47 }
 0xd20   :  { %3501 = vadd.xlane.f32.xlu0 %v3500_v55 }
 0xd21   :  { %3506 = vadd.xlane.f32.xlu1 %v3505_v4 }
 0xda2   :  { %v3653_v60 = vpop.xlane.xlu1 %3652 }
 0xda3   :  { %v3659_v48 = vmul.f32 0.03125, %v3653_v60 }
 0xda5   :  { %v3661_v7 = vadd.f32 1e-06, %v3659_v48 }
 0xda7   :  { %5979 = vrsqrt.f32 %v3661_v7 }
 0xda8   :  { %v3658_v1 = vpop.xlane.xlu0 %3657 }
 0xda9   :  { %v3660_v59 = vmul.f32 0.03125, %v3658_v1 }
 0xdab   :  { %v3662_v11 = vadd.f32 1e-06, %v3660_v59 }
 0xdad   :  { %5981 = vrsqrt.f32 %v3662_v11  ;;  %v3502_v51 = vpop.xlane.xlu0 %3501  ;;  %v7912_v11 = vld [vmem:[#allocation36_spill] sm:$0xff] }
 0xdae   :  { %v3507_v6 = vpop.xlane.xlu1 %3506  ;;  %v3508_v20 = vmul.f32 0.03125, %v3502_v51  ;;  %v3689_v51 = vrot.slane %v3640_v50, %v7912_v11 }
 0xdaf   :  { %v3509_v54 = vmul.f32 0.03125, %v3507_v6 }
 0xdb0   :  { %v3510_v28 = vadd.f32 1e-06, %v3508_v20 }
 0xdb1   :  { %v3511_v40 = vadd.f32 1e-06, %v3509_v54  ;;  %v5980_v13 = vpop.eup %5979 }
 0xdb2   :  { %5983 = vrsqrt.f32 %v3510_v28  ;;  %v3665_v19 = vmul.f32 %v5980_v13, %v7566_v56  ;;  %v3668_v59 = vmul.f32 %v5980_v13, %v7611_v45 }
 0xdb3   :  { %5985 = vrsqrt.f32 %v3511_v40 }
 0xdb4   :  { %v3694_v14 = vmul.f32 %v3677_v32, %v3665_v19  ;;  %v3697_v28 = vmul.f32 %v3689_v51, %v3668_v59 }
 0xdb7   :  { %v5982_v10 = vpop.eup %5981 }
 0xdb8   :  { %v3669_v16 = vmul.f32 %v5982_v10, %v7626_v41  ;;  %v3670_v5 = vmul.f32 %v5982_v10, %v7628_v30  ;;  %v3666_v41 = vmul.f32 %v5980_v13, %v7568_v42  ;;  %v3671_v52 = vmul.f32 %v5982_v10, %v7635_v63  ;;  %v7911_v42 = vld [vmem:[#allocation35_spill] sm:$0xff] }
 0xdb9   :  { %v3534_v17 = vrot.slane %v3489_v8, %v7911_v42 }
 0xdba   :  { %v3698_v0 = vmul.f32 %v3677_v32, %v3669_v16  ;;  %v3699_v61 = vmul.f32 %v3681_v26, %v3670_v5  ;;  %v3695_v37 = vmul.f32 %v3681_v26, %v3666_v41 }
 0xdbc   :  { %v5984_v25 = vpop.eup %5983  ;;  %v3706_v27 = vpack.c.bf16 %v3698_v0, %v3694_v14  ;;  %v3707_v44 = vpack.c.bf16 %v3699_v61, %v3695_v37 }
 0xdbd   :  { %v5986_v23 = vpop.eup %5985  ;;  %v3514_v12 = vmul.f32 %v5984_v25, %v7544_v46  ;;  %v3515_v21 = vmul.f32 %v5984_v25, %v7546_v38  ;;  %v3667_v38 = vmul.f32 %v5980_v13, %v7604_v53  ;;  %v3516_v57 = vmul.f32 %v5984_v25, %v7675_v62 }
 0xdbe   :  { %5405 = vmatpush3.bf16.xpose.msra.mxu0 %v3706_v27  ;;  %v3518_v56 = vmul.f32 %v5986_v23, %v7609_v15  ;;  %v3519_v43 = vmul.f32 %v5986_v23, %v7619_v34  ;;  %v3685_v34 = vrot.slane %v3640_v50, %v7911_v42  ;;  %v3520_v55 = vmul.f32 %v5986_v23, %v7681_v3 }
 0xdbf   :  { %5416 = vmatprep.subr.bf16.mxu0 %v7889_v9  ;;  %v3543_v33 = vmul.f32 %v3526_v49, %v3514_v12  ;;  %v3544_v15 = vmul.f32 %v3530_v36, %v3515_v21  ;;  %v3545_v48 = vmul.f32 %v3534_v17, %v3516_v57  ;;  %v3672_v53 = vmul.f32 %v5982_v10, %v7658_v24 }
 0xdc0   :  { %v3547_v22 = vmul.f32 %v3526_v49, %v3518_v56  ;;  %v3548_v2 = vmul.f32 %v3530_v36, %v3519_v43  ;;  %v3700_v63 = vmul.f32 %v3685_v34, %v3671_v52  ;;  %v3696_v4 = vmul.f32 %v3685_v34, %v3667_v38 }
 0xdc1   :  { %v3551_v46 = vmul.f32 0.35355338, %v3543_v33  ;;  %v3552_v31 = vmul.f32 0.35355338, %v3544_v15  ;;  %v3549_v7 = vmul.f32 %v3534_v17, %v3520_v55  ;;  %v3538_v62 = vrot.slane %v3489_v8, %v7912_v11 }
 0xdc2   :  { %v3555_v30 = vmul.f32 0.35355338, %v3547_v22  ;;  %v3556_v47 = vmul.f32 0.35355338, %v3548_v2  ;;  %v3708_v1 = vpack.c.bf16 %v3700_v63, %v3696_v4  ;;  %v3553_v3 = vmul.f32 0.35355338, %v3545_v48 }
 0xdc3   :  { %v3557_v6 = vmul.f32 0.35355338, %v3549_v7  ;;  %v3517_v20 = vmul.f32 %v5984_v25, %v7678_v29  ;;  %v3521_v54 = vmul.f32 %v5986_v23, %v7684_v58  ;;  %v3701_v24 = vmul.f32 %v3689_v51, %v3672_v53 }
 0xdc4   :  { %v3702_v18 = vpack.c.bf16 %v3555_v30, %v3551_v46  ;;  %v3703_v60 = vpack.c.bf16 %v3556_v47, %v3552_v31 }
 0xdc5   :  { %v3704_v40 = vpack.c.bf16 %v3557_v6, %v3553_v3  ;;  %v3546_v19 = vmul.f32 %v3538_v62, %v3517_v20  ;;  %v3550_v32 = vmul.f32 %v3538_v62, %v3521_v54  ;;  %v3709_v10 = vpack.c.bf16 %v3701_v24, %v3697_v28 }
 0xdc6   :  { %5407 = vmatmul.mubr.bf16.vlgmr.msra.gmra.mrb[48].mxu0 %v3702_v18 }
 0xdc7   :  { %5417 = vmatpush3.bf16.xpose.msra.mxu0 %v3707_v44  ;;  %5418 = vmatprep.mubr.msk.bf16.mxu0 %vm6379_vm2, %v7889_v9  ;;  %v3554_v45 = vmul.f32 0.35355338, %v3546_v19  ;;  %v3558_v13 = vmul.f32 0.35355338, %v3550_v32 }
 0xdc8   :  { %5428 = vmatprep.subr.bf16.mxu0 %v7889_v9 }
 0xdc9   :  { %v3705_v50 = vpack.c.bf16 %v3558_v13, %v3554_v45 }
 0xdce   :  { %5419 = vmatmul.mubr.bf16.vlgmr.msra.gmra.mrb[52].mxu0 %v3703_v60 }
 0xdcf   :  { %5429 = vmatpush3.bf16.xpose.msra.mxu0 %v3708_v1  ;;  %5430 = vmatprep.mubr.msk.bf16.mxu0 %vm6379_vm2, %v7889_v9 }
 0xdd0   :  { %5440 = vmatprep.subr.bf16.mxu0 %v7889_v9 }
 0xdd6   :  { %5431 = vmatmul.mubr.bf16.vlgmr.msra.gmra.mrb[56].mxu0 %v3704_v40 }
 0xdd7   :  { %5441 = vmatpush3.bf16.xpose.msra.mxu0 %v3709_v10  ;;  %5442 = vmatprep.mubr.msk.bf16.mxu0 %vm6379_vm2, %v7889_v9 }
 0xdde   :  { %5443 = vmatmul.mubr.bf16.vlgmr.msra.gmra.mrb[60].mxu0 %v3705_v50 }
 0xe99   :  { %v3748_v16 = vpop.f32.mrb[48].mxu0 }
 0xe9a   :  { %v5408_v8 = vpop.f32.mrb[49].mxu0  ;;  %v3755_v29 = vsel %vm1458_vm3, %v3748_v16, -inf }
 0xe9b   :  { %3756 = vmax.xlane.f32.xlu0 %v3755_v29  ;;  %v3751_v58 = vpop.f32.mrb[50].mxu0 }
 0xe9c   :  { %v5409_v14 = vpop.f32.mrb[51].mxu0  ;;  %v3758_v0 = vsel %vm1458_vm3, %v3751_v58, -inf }
 0xe9d   :  { %3759 = vmax.xlane.f32.xlu1 %v3758_v0  ;;  %v5852_v14 = vld [vmem:[#allocation7 + $0x100] sm:$0xff]   ;;  %v5853_v0 = vld [vmem:[#allocation7 + $0x148] sm:$0xff]  }
 0xea1   :  { %v3856_v49 = vpop.f32.mrb[52].mxu0 }
 0xea2   :  { %v5420_v25 = vpop.f32.mrb[53].mxu0  ;;  %v3863_v27 = vsel %vm1458_vm3, %v3856_v49, -inf }
 0xea3   :  { %3864 = vmax.xlane.f32.xlu0 %v3863_v27  ;;  %v3859_v23 = vpop.f32.mrb[54].mxu0  ;;  %v5855_v25 = vld [vmem:[#allocation7 + $0x150] sm:$0xff]  }
 0xea4   :  { %v5421_v12 = vpop.f32.mrb[55].mxu0  ;;  %v3866_v5 = vsel %vm1458_vm3, %v3859_v23, -inf  ;;  %v5856_v27 = vld [vmem:[#allocation7 + $0x110] sm:$0xff]  }
 0xea5   :  { %3867 = vmax.xlane.f32.xlu1 %v3866_v5  ;;  %v5858_v12 = vld [vmem:[#allocation7 + $0x118] sm:$0xff]   ;;  %v5859_v5 = vld [vmem:[#allocation7 + $0x160] sm:$0xff]  }
 0xea9   :  { %v3964_v56 = vpop.f32.mrb[56].mxu0 }
 0xeaa   :  { %v5432_v33 = vpop.f32.mrb[57].mxu0  ;;  %v3971_v41 = vsel %vm1458_vm3, %v3964_v56, -inf }
 0xeab   :  { %3972 = vmax.xlane.f32.xlu0 %v3971_v41  ;;  %v3967_v26 = vpop.f32.mrb[58].mxu0 }
 0xeac   :  { %v5433_v22 = vpop.f32.mrb[59].mxu0  ;;  %v3974_v21 = vsel %vm1458_vm3, %v3967_v26, -inf }
 0xead   :  { %3975 = vmax.xlane.f32.xlu1 %v3974_v21 }
 0xeb1   :  { %v4072_v43 = vpop.f32.mrb[60].mxu0 }
 0xeb2   :  { %v5444_v36 = vpop.f32.mrb[61].mxu0  ;;  %v4079_v46 = vsel %vm1458_vm3, %v4072_v43, -inf }
 0xeb3   :  { %4080 = vmax.xlane.f32.xlu0 %v4079_v46  ;;  %v4075_v61 = vpop.f32.mrb[62].mxu0 }
 0xeb4   :  { %v5445_v30 = vpop.f32.mrb[63].mxu0  ;;  %v4082_v37 = vsel %vm1458_vm3, %v4075_v61, -inf }
 0xeb5   :  { %4083 = vmax.xlane.f32.xlu1 %v4082_v37 }
 0xf28   :  { %v3757_v18 = vpop.xlane.xlu0 %3756 }
 0xf29   :  { %v3761_v15 = vsub.f32 %v3748_v16, %v3757_v18 }
 0xf2a   :  { %v3760_v2 = vpop.xlane.xlu1 %3759 }
 0xf2b   :  { %v3763_v44 = vmul.f32 1.442695, %v3761_v15  ;;  %v3762_v52 = vsub.f32 %v3751_v58, %v3760_v2  ;;  %v5851_v58 = vld [vmem:[#allocation7 + $0x140] sm:$0xff]   ;;  %v7913_v15 = vld [vmem:[#allocation37_spill] sm:$0xff] }
 0xf2c   :  { %5283 = vmatprep.subr.bf16.mxu0 %v5851_v58  ;;  %v7914_v2 = vld [vmem:[#allocation29_spill] sm:$0xff]  ;;  %v5875_v58 = vld [vmem:[#allocation7 + $0x1e0] sm:$0xff]  }
 0xf2d   :  { %5987 = vpow2.f32 %v3763_v44  ;;  %v3765_v38 = vmul.f32 1.442695, %v3762_v52  ;;  %5284 = vmatpush3.bf16.msra.mxu0 %v5852_v14  ;;  %v7915_v44 = vpack.c.bf16 %v7913_v15, %v7914_v2  ;;  %v5876_v14 = vld [vmem:[#allocation7 + $0x1a0] sm:$0xff]  }
 0xf2e   :  { %5285 = vmatprep.subr.bf16.mxu0 %v5853_v0  ;;  %v5877_v0 = vld [vmem:[#allocation7 + $0x1e8] sm:$0xff]  }
 0xf2f   :  { %5989 = vpow2.f32 %v3765_v38 }
 0xf30   :  { %v3865_v42 = vpop.xlane.xlu0 %3864 }
 0xf31   :  { %v3869_v34 = vsub.f32 %v3856_v49, %v3865_v42  ;;  %v5854_v49 = vld [vmem:[#allocation7 + $0x108] sm:$0xff]  }
 0xf32   :  { %v3868_v17 = vpop.xlane.xlu1 %3867  ;;  %5286 = vmatpush3.bf16.msra.mxu0 %v5854_v49  ;;  %v5878_v49 = vld [vmem:[#allocation7 + $0x1a8] sm:$0xff]  }
 0xf33   :  { %v3871_v31 = vmul.f32 1.442695, %v3869_v34  ;;  %v3870_v47 = vsub.f32 %v3859_v23, %v3868_v17  ;;  %5287 = vmatprep.subr.bf16.mxu0 %v5855_v25  ;;  %v5857_v23 = vld [vmem:[#allocation7 + $0x158] sm:$0xff]   ;;  %v5879_v25 = vld [vmem:[#allocation7 + $0x1f0] sm:$0xff]  }
 0xf35   :  { %5991 = vpow2.f32 %v3871_v31  ;;  %v3873_v57 = vmul.f32 1.442695, %v3870_v47 }
 0xf36   :  { %5288 = vmatpush3.bf16.msra.mxu0 %v5856_v27  ;;  %v5880_v27 = vld [vmem:[#allocation7 + $0x1b0] sm:$0xff]  }
 0xf37   :  { %v7735_v55 = vpop.eup %5987  ;;  %5993 = vpow2.f32 %v3873_v57  ;;  %5289 = vmatprep.subr.bf16.mxu0 %v5857_v23  ;;  %v7916_v57 = vld [vmem:[#allocation30_spill] sm:$0xff] }
 0xf38   :  { %v3973_v63 = vpop.xlane.xlu0 %3972  ;;  %v3767_v4 = vsel %vm1458_vm3, %v7735_v55, 0.0  ;;  %v5881_v23 = vld [vmem:[#allocation7 + $0x1f8] sm:$0xff]  }
 0xf39   :  { %v7739_v60 = vpop.eup %5989  ;;  %v3977_v48 = vsub.f32 %v3964_v56, %v3973_v63  ;;  %3768 = vadd.xlane.f32.xlu0 %v3767_v4  ;;  %v5861_v56 = vld [vmem:[#allocation7 + $0x120] sm:$0xff]  }
 0xf3a   :  { %v3976_v7 = vpop.xlane.xlu1 %3975  ;;  %v3770_v1 = vsel %vm1458_vm3, %v7739_v60, 0.0  ;;  %5290 = vmatpush3.bf16.msra.mxu0 %v5858_v12  ;;  %v5882_v12 = vld [vmem:[#allocation7 + $0x1b8] sm:$0xff]  }
 0xf3b   :  { %v3979_v53 = vmul.f32 1.442695, %v3977_v48  ;;  %v3978_v59 = vsub.f32 %v3967_v26, %v3976_v7  ;;  %3771 = vadd.xlane.f32.xlu1 %v3770_v1  ;;  %5291 = vmatprep.subr.bf16.mxu0 %v5859_v5  ;;  %v5860_v1 = vld [vmem:[#allocation7 + $0x1c0] sm:$0xff]  }
 0xf3d   :  { %5995 = vpow2.f32 %v3979_v53  ;;  %v3981_v11 = vmul.f32 1.442695, %v3978_v59  ;;  %v7919_v59 = vld [vmem:[#allocation38_spill] sm:$0xff] }
 0xf3e   :  { %5292 = vmatpush3.bf16.msra.mxu0 %v5861_v56 }
 0xf3f   :  { %v7743_v51 = vpop.eup %5991  ;;  %5997 = vpow2.f32 %v3981_v11  ;;  %v7920_v11 = vld [vmem:[#allocation34_spill] sm:$0xff] }
 0xf40   :  { %v4081_v62 = vpop.xlane.xlu0 %4080  ;;  %v3875_v3 = vsel %vm1458_vm3, %v7743_v51, 0.0 }
 0xf41   :  { %v7747_v6 = vpop.eup %5993  ;;  %v4085_v20 = vsub.f32 %v4072_v43, %v4081_v62  ;;  %3876 = vadd.xlane.f32.xlu0 %v3875_v3 }
 0xf42   :  { %v4084_v54 = vpop.xlane.xlu1 %4083  ;;  %v3878_v24 = vsel %vm1458_vm3, %v7747_v6, 0.0 }
 0xf43   :  { %v4087_v28 = vmul.f32 1.442695, %v4085_v20  ;;  %v4086_v40 = vsub.f32 %v4075_v61, %v4084_v54  ;;  %3879 = vadd.xlane.f32.xlu1 %v3878_v24  ;;  %v5862_v20 = vld [vmem:[#allocation7 + $0x180] sm:$0xff]   ;;  %v5863_v24 = vld [vmem:[#allocation7 + $0x168] sm:$0xff]  }
 0xf44   :  { %5293 = vmatprep.subr.bf16.mxu0 %v5863_v24 }
 0xf45   :  { %5999 = vpow2.f32 %v4087_v28  ;;  %v4089_v19 = vmul.f32 1.442695, %v4086_v40  ;;  %v5864_v28 = vld [vmem:[#allocation7 + $0x1c8] sm:$0xff]  }
 0xf46   :  { %v5865_v40 = vld [vmem:[#allocation7 + $0x128] sm:$0xff]  }
 0xf47   :  { %v7751_v32 = vpop.eup %5995  ;;  %6001 = vpow2.f32 %v4089_v19  ;;  %v5866_v19 = vld [vmem:[#allocation7 + $0x188] sm:$0xff]   ;;  %5294 = vmatpush3.bf16.msra.mxu0 %v5865_v40 }
 0xf48   :  { %v3983_v10 = vsel %vm1458_vm3, %v7751_v32, 0.0 }
 0xf49   :  { %v7755_v45 = vpop.eup %5997  ;;  %3984 = vadd.xlane.f32.xlu0 %v3983_v10  ;;  %v5868_v10 = vld [vmem:[#allocation7 + $0x1d0] sm:$0xff]  }
 0xf4a   :  { %v3986_v13 = vsel %vm1458_vm3, %v7755_v45, 0.0 }
 0xf4b   :  { %3987 = vadd.xlane.f32.xlu1 %v3986_v13  ;;  %v5870_v13 = vld [vmem:[#allocation7 + $0x190] sm:$0xff]  }
 0xf4f   :  { %v7759_v50 = vpop.eup %5999 }
 0xf50   :  { %v4091_v16 = vsel %vm1458_vm3, %v7759_v50, 0.0 }
 0xf51   :  { %v7763_v8 = vpop.eup %6001  ;;  %4092 = vadd.xlane.f32.xlu0 %v4091_v16  ;;  %v5872_v16 = vld [vmem:[#allocation7 + $0x1d8] sm:$0xff]  }
 0xf52   :  { %v4094_v29 = vsel %vm1458_vm3, %v7763_v8, 0.0 }
 0xf53   :  { %4095 = vadd.xlane.f32.xlu1 %v4094_v29  ;;  %v5874_v29 = vld [vmem:[#allocation7 + $0x198] sm:$0xff]  }
 0xfc6   :  { %v3769_v33 = vpop.xlane.xlu0 %3768 }
 0xfc7   :  { %6003 = vrcp.f32 %v3769_v33 }
 0xfc8   :  { %v3772_v41 = vpop.xlane.xlu1 %3771 }
 0xfc9   :  { %6005 = vrcp.f32 %v3772_v41 }
 0xfce   :  { %v3877_v26 = vpop.xlane.xlu0 %3876 }
 0xfcf   :  { %6007 = vrcp.f32 %v3877_v26 }
 0xfd0   :  { %v3880_v22 = vpop.xlane.xlu1 %3879 }
 0xfd1   :  { %v6004_v21 = vpop.eup %6003  ;;  %6009 = vrcp.f32 %v3880_v22 }
 0xfd2   :  { %v3775_v36 = vmul.f32 %v6004_v21, %v7735_v55  ;;  %v7917_v55 = vld [vmem:[#allocation32_spill] sm:$0xff] }
 0xfd3   :  { %v6006_v43 = vpop.eup %6005  ;;  %v7918_v63 = vpack.c.bf16 %v7916_v57, %v7917_v55  ;;  %v5886_v57 = vld [vmem:[#allocation13 + $0x90] ss:$8 sps:$4 sm:$0xff]   ;;  %v5891_v55 = vld [vmem:[#allocation13 + $0xa4] ss:$8 sps:$4 sm:$0xff]  }
 0xfd4   :  { %v3776_v46 = vmul.f32 %v6006_v43, %v7739_v60 }
 0xfd6   :  { %v3985_v61 = vpop.xlane.xlu0 %3984  ;;  %v3777_v30 = vpack.c.bf16 %v3776_v46, %v3775_v36 }
 0xfd7   :  { %6011 = vrcp.f32 %v3985_v61  ;;  %v7922_v61 = vmov 0  }
 0xfd8   :  { %5413 = vmatmul.mubr.msk.bf16.vlgmr.msra.gmra.mrb[48].mxu1 %vm1458_vm3, %v3777_v30  ;;  %v3988_v37 = vpop.xlane.xlu1 %3987 }
 0xfd9   :  { %v6008_v18 = vpop.eup %6007  ;;  %5423 = vmatpush3.bf16.msra.mxu1 %v7915_v44  ;;  %6013 = vrcp.f32 %v3988_v37  ;;  %5424 = vmatprep.mubr.msk.bf16.mxu1 %vm6379_vm2, %v7889_v9 }
 0xfda   :  { %5434 = vmatprep.subr.bf16.mxu1 %v7889_v9  ;;  %v3883_v38 = vmul.f32 %v6008_v18, %v7743_v51  ;;  %v7921_v51 = vpack.c.bf16 %v7919_v59, %v7920_v11  ;;  %v5134_v59 = vld [vmem:[#allocation9 + $0x1] ss:$0 sm:$0xff] }
 0xfdb   :  { %v6010_v52 = vpop.eup %6009 }
 0xfdc   :  { %v3884_v42 = vmul.f32 %v6010_v52, %v7747_v6 }
 0xfde   :  { %v4093_v34 = vpop.xlane.xlu0 %4092  ;;  %v3885_v17 = vpack.c.bf16 %v3884_v42, %v3883_v38 }
 0xfdf   :  { %6015 = vrcp.f32 %v4093_v34 }
 0xfe0   :  { %5425 = vmatmul.mubr.msk.bf16.vlgmr.msra.gmra.mrb[52].mxu1 %vm1458_vm3, %v3885_v17  ;;  %v4096_v31 = vpop.xlane.xlu1 %4095  ;;  %v5883_v17 = vld [vmem:[#allocation13 + $0x80] ss:$8 sps:$4 sm:$0xff]  }
 0xfe1   :  { %v6012_v47 = vpop.eup %6011  ;;  %6017 = vrcp.f32 %v4096_v31  ;;  %5435 = vmatpush3.bf16.msra.mxu1 %v7918_v63  ;;  %5436 = vmatprep.mubr.msk.bf16.mxu1 %vm6379_vm2, %v7889_v9  ;;  %v5885_v31 = vld [vmem:[#allocation13 + $0x84] ss:$8 sps:$4 sm:$0xff]   ;;  %v5889_v63 = vld [vmem:[#allocation13 + $0xa0] ss:$8 sps:$4 sm:$0xff]  }
 0xfe2   :  { %5446 = vmatprep.subr.bf16.mxu1 %v7889_v9  ;;  %v3991_v60 = vmul.f32 %v6012_v47, %v7751_v32  ;;  %v5867_v32 = vld [vmem:[#allocation7 + $0x170] sm:$0xff]   ;;  %v5888_v47 = vld [vmem:[#allocation13 + $0x94] ss:$8 sps:$4 sm:$0xff]  }
 0xfe3   :  { %v6014_v4 = vpop.eup %6013  ;;  %5295 = vmatprep.subr.bf16.mxu0 %v5867_v32 }
 0xfe4   :  { %v3992_v48 = vmul.f32 %v6014_v4, %v7755_v45  ;;  %v5869_v45 = vld [vmem:[#allocation7 + $0x130] sm:$0xff]  }
 0xfe5   :  { %5296 = vmatpush3.bf16.msra.mxu0 %v5869_v45 }
 0xfe6   :  { %v3993_v7 = vpack.c.bf16 %v3992_v48, %v3991_v60 }
 0xfe8   :  { %5437 = vmatmul.mubr.msk.bf16.vlgmr.msra.gmra.mrb[56].mxu1 %vm1458_vm3, %v3993_v7 }
 0xfe9   :  { %v6016_v53 = vpop.eup %6015  ;;  %5447 = vmatpush3.bf16.msra.mxu1 %v7921_v51  ;;  %5448 = vmatprep.mubr.msk.bf16.mxu1 %vm6379_vm2, %v7889_v9 }
 0xfea   :  { %5305 = vmatprep.subr.bf16.mxu1 %v5860_v1  ;;  %v4099_v3 = vmul.f32 %v6016_v53, %v7759_v50  ;;  %v5871_v50 = vld [vmem:[#allocation7 + $0x178] sm:$0xff]  }
 0xfeb   :  { %v6018_v62 = vpop.eup %6017  ;;  %5297 = vmatprep.subr.bf16.mxu0 %v5871_v50  ;;  %v7924_v50 = vld [vmem:[#allocation31_spill] sm:$0xff] }
 0xfec   :  { %v4100_v6 = vmul.f32 %v6018_v62, %v7763_v8  ;;  %v5873_v8 = vld [vmem:[#allocation7 + $0x138] sm:$0xff]  }
 0xfed   :  { %5298 = vmatpush3.bf16.msra.mxu0 %v5873_v8 }
 0xfee   :  { %v4101_v54 = vpack.c.bf16 %v4100_v6, %v4099_v3  ;;  %4644 = vmatprep.subr.bf16.mxu0 %v5885_v31 }
 0xff0   :  { %5449 = vmatmul.mubr.msk.bf16.vlgmr.msra.gmra.mrb[60].mxu1 %vm1458_vm3, %v4101_v54 }
 0xff1   :  { %5306 = vmatpush3.bf16.msra.mxu1 %v5862_v20  ;;  %v5167_v20 = vld [vmem:[#allocation10 + $0x1] ss:$0 sm:$0xff] }
 0xff2   :  { %5307 = vmatprep.subr.bf16.mxu1 %v5864_v28 }
 0xff5   :  { %5308 = vmatpush3.bf16.msra.mxu1 %v5866_v19 }
 0xff6   :  { %5309 = vmatprep.subr.bf16.mxu1 %v5868_v10  ;;  %v7923_v10 = vld [vmem:[#allocation33_spill] sm:$0xff] }
 0xff9   :  { %5310 = vmatpush3.bf16.msra.mxu1 %v5870_v13 }
 0xffa   :  { %5311 = vmatprep.subr.bf16.mxu1 %v5872_v16 }
 0xffd   :  { %5312 = vmatpush3.bf16.msra.mxu1 %v5874_v29 }
 0xffe   :  { %5313 = vmatprep.subr.bf16.mxu1 %v5875_v58  ;;  %v5894_v58 = vld [vmem:[#allocation13 + $0xb4] ss:$8 sps:$4 sm:$0xff]  }
0x1001   :  { %5314 = vmatpush3.bf16.msra.mxu1 %v5876_v14  ;;  %v5892_v14 = vld [vmem:[#allocation13 + $0xb0] ss:$8 sps:$4 sm:$0xff]  }
0x1002   :  { %5315 = vmatprep.subr.bf16.mxu1 %v5877_v0  ;;  %v5895_v0 = vld [vmem:[#allocation13 + $0xc0] ss:$8 sps:$4 sm:$0xff]  }
0x1005   :  { %5316 = vmatpush3.bf16.msra.mxu1 %v5878_v49  ;;  %v5897_v49 = vld [vmem:[#allocation13 + $0xc4] ss:$8 sps:$4 sm:$0xff]  }
0x1006   :  { %5317 = vmatprep.subr.bf16.mxu1 %v5879_v25  ;;  %v5900_v25 = vld [vmem:[#allocation13 + $0xd4] ss:$8 sps:$4 sm:$0xff]  }
0x1009   :  { %5318 = vmatpush3.bf16.msra.mxu1 %v5880_v27  ;;  %v5898_v27 = vld [vmem:[#allocation13 + $0xd0] ss:$8 sps:$4 sm:$0xff]  }
0x100a   :  { %5319 = vmatprep.subr.bf16.mxu1 %v5881_v23  ;;  %v5903_v23 = vld [vmem:[#allocation13 + $0xe4] ss:$8 sps:$4 sm:$0xff]  }
0x100d   :  { %5320 = vmatpush3.bf16.msra.mxu1 %v5882_v12  ;;  %v5901_v12 = vld [vmem:[#allocation13 + $0xe0] ss:$8 sps:$4 sm:$0xff]  }
0x100e   :  { %5452 = vmatprep.subr.bf16.mxu1 %v7889_v9 }
0x10ab   :  { %v3815_v5 = vpop.f32.mrb[48].mxu1 }
0x10ac   :  { %v5414_v56 = vpop.f32.mrb[49].mxu1 }
0x10ad   :  { %v3818_v33 = vpop.f32.mrb[50].mxu1  ;;  %v5904_v56 = vld [vmem:[#allocation13 + $0xf0] ss:$8 sps:$4 sm:$0xff]  }
0x10ae   :  { %v4146_v41 = vpack.c.bf16 %v3818_v33, %v3815_v5  ;;  %v5415_v26 = vpop.f32.mrb[51].mxu1  ;;  %v5906_v5 = vld [vmem:[#allocation13 + $0xf4] ss:$8 sps:$4 sm:$0xff]  }
0x10b3   :  { %v3923_v22 = vpop.f32.mrb[52].mxu1 }
0x10b4   :  { %v5426_v21 = vpop.f32.mrb[53].mxu1 }
0x10b5   :  { %v3926_v43 = vpop.f32.mrb[54].mxu1 }
0x10b6   :  { %v4147_v36 = vpack.c.bf16 %v3926_v43, %v3923_v22  ;;  %v5427_v46 = vpop.f32.mrb[55].mxu1 }
0x10b8   :  { %4447 = vmatprep.mubr.bf16.mxu0 %v4147_v36 }
0x10b9   :  { %4448 = vmatmul.mubr.bf16.vlgmr.msra.gmra.mrb[64].mxu0 %v4146_v41 }
0x10ba   :  { %4676 = vmatprep.mubr.bf16.mxu0 %v7922_v61  ;;  %4645 = vmatpush1.bf16.msra.mxu0 %v5883_v17 }
0x10bb   :  { %v4031_v30 = vpop.f32.mrb[56].mxu1  ;;  %4646 = vmatprep.subr.bf16.mxu0 %v5888_v47 }
0x10bc   :  { %v5438_v37 = vpop.f32.mrb[57].mxu1 }
0x10bd   :  { %v4034_v18 = vpop.f32.mrb[58].mxu1 }
0x10be   :  { %v4148_v15 = vpack.c.bf16 %v4034_v18, %v4031_v30  ;;  %v5439_v2 = vpop.f32.mrb[59].mxu1  ;;  %4647 = vmatpush1.bf16.msra.mxu0 %v5886_v57  ;;  %v5168_v30 = vld [vmem:[#allocation12 + $0x1] ss:$0 sm:$0xff] }
0x10bf   :  { %4648 = vmatprep.subr.bf16.mxu0 %v5891_v55 }
0x10c2   :  { %4649 = vmatpush1.bf16.msra.mxu0 %v5889_v63 }
0x10c3   :  { %v4139_v44 = vpop.f32.mrb[60].mxu1  ;;  %4650 = vmatprep.subr.bf16.mxu0 %v5894_v58 }
0x10c4   :  { %v5450_v52 = vpop.f32.mrb[61].mxu1 }
0x10c5   :  { %v4142_v38 = vpop.f32.mrb[62].mxu1  ;;  %v5908_v52 = vld [vmem:[#allocation18 + $0x48] sm:$0xff]  }
0x10c6   :  { %v4149_v42 = vpack.c.bf16 %v4142_v38, %v4139_v44  ;;  %v5451_v34 = vpop.f32.mrb[63].mxu1  ;;  %4651 = vmatpush1.bf16.msra.mxu0 %v5892_v14  ;;  %v5907_v44 = vld [vmem:[#allocation18 + $0x40] sm:$0xff]   ;;  %v4552_v38 = vld [vmem:[#allocation15 + $0x2] sm:$0x3] }
0x10c7   :  { %4652 = vmatprep.subr.bf16.mxu0 %v5897_v49 }
0x10c8   :  { %4488 = vmatprep.mubr.bf16.mxu1 %v4149_v42  ;;  %v4557_v42 = vrot.slane %v4552_v38, %v7126_v35 }
0x10c9   :  { %4489 = vmatmul.mubr.bf16.vlgmr.msra.gmra.mrb[64].mxu1 %v4148_v15 }
0x10ca   :  { %5468 = vmatprep.mubr.msk.bf16.mxu1 %vm6379_vm2, %v7889_v9  ;;  %4653 = vmatpush1.bf16.msra.mxu0 %v5895_v0 }
0x10cb   :  { %4654 = vmatprep.subr.bf16.mxu0 %v5900_v25  ;;  %5453 = vmatpush3.bf16.msra.mxu1 %v5907_v44 }
0x10cc   :  { %5454 = vmatprep.subr.bf16.mxu1 %v7889_v9 }
0x10ce   :  { %4655 = vmatpush1.bf16.msra.mxu0 %v5898_v27  ;;  %v5187_v27 = vld [vmem:[#allocation16 + $0x1] ss:$0 sm:$0xff] }
0x10cf   :  { %4656 = vmatprep.subr.bf16.mxu0 %v5903_v23  ;;  %5455 = vmatpush3.bf16.msra.mxu1 %v5908_v52 }
0x10d0   :  { %5456 = vmatprep.subr.bf16.mxu1 %v7889_v9 }
0x10d2   :  { %4657 = vmatpush1.bf16.msra.mxu0 %v5901_v12 }
0x10d3   :  { %4658 = vmatprep.subr.bf16.mxu0 %v5906_v5 }
0x10d6   :  { %4659 = vmatpush1.bf16.msra.mxu0 %v5904_v56 }
0x118c   :  { %v5299_v4 = vpop.f32.mrb[64].mxu0 }
0x118d   :  { %v5300_v60 = vpop.f32.mrb[65].mxu0 }
0x118e   :  { %v5301_v48 = vadd.f32 %v5300_v60, %v5299_v4  ;;  %v5302_v7 = vpop.f32.mrb[66].mxu0 }
0x118f   :  { %v5303_v1 = vpop.f32.mrb[67].mxu0 }
0x1190   :  { %v5304_v53 = vadd.f32 %v5303_v1, %v5302_v7  ;;  %v4450_v62 = vadd.f32 %v5301_v48, %v5134_v59 }
0x1192   :  { %v4453_v24 = vadd.f32 %v5304_v53, %v5134_v59  ;;  %v4561_v53 = vrot.slane %v4552_v38, %v7135_v39  ;;  %v5912_v39 = vld [vmem:[#allocation18 + $0x68] sm:$0xff]  }
0x119c   :  { %v5321_v11 = vpop.f32.mrb[64].mxu1 }
0x119d   :  { %v5322_v51 = vpop.f32.mrb[65].mxu1 }
0x119e   :  { %v5323_v3 = vadd.f32 %v5322_v51, %v5321_v11  ;;  %v5324_v6 = vpop.f32.mrb[66].mxu1 }
0x119f   :  { %v5325_v54 = vpop.f32.mrb[67].mxu1 }
0x11a0   :  { %v4491_v28 = vadd.f32 %v5323_v3, %v4450_v62  ;;  %v5326_v40 = vadd.f32 %v5325_v54, %v5324_v6 }
0x11a2   :  { %v4505_v19 = vmul.f32 %v5167_v20, %v4491_v28  ;;  %v4494_v32 = vadd.f32 %v5326_v40, %v4453_v24  ;;  %v5909_v28 = vld [vmem:[#allocation18 + $0x50] sm:$0xff]   ;;  %v5910_v40 = vld [vmem:[#allocation18 + $0x58] sm:$0xff]  }
0x11a3   :  { %5457 = vmatpush3.bf16.msra.mxu1 %v5909_v28 }
0x11a4   :  { %v7801_v45 = vadd.f32 %v4505_v19, %v7923_v10  ;;  %v4506_v13 = vmul.f32 %v5167_v20, %v4494_v32  ;;  %5458 = vmatprep.subr.bf16.mxu1 %v7889_v9  ;;  %v5911_v19 = vld [vmem:[#allocation18 + $0x60] sm:$0xff]   ;;  %v5913_v32 = vld [vmem:[#allocation18 + $0x70] sm:$0xff]   ;;  %v5914_v10 = vld [vmem:[#allocation18 + $0x78] sm:$0xff]  }
0x11a6   :  { %v7804_v16 = vadd.f32 %v4506_v13, %v7924_v50  ;;  %v4511_v8 = vmul.f32 %v7801_v45, %v7801_v45 }
0x11a7   :  { %5459 = vmatpush3.bf16.msra.mxu1 %v5910_v40 }
0x11a8   :  { %4513 = vadd.xlane.f32.xlu0 %v4511_v8  ;;  %v4512_v29 = vmul.f32 %v7804_v16, %v7804_v16  ;;  %5460 = vmatprep.subr.bf16.mxu1 %v7889_v9 }
0x11aa   :  { %4515 = vadd.xlane.f32.xlu1 %v4512_v29 }
0x11ab   :  { %5461 = vmatpush3.bf16.msra.mxu1 %v5911_v19 }
0x11ac   :  { %5462 = vmatprep.subr.bf16.mxu1 %v7889_v9 }
0x11af   :  { %5463 = vmatpush3.bf16.msra.mxu1 %v5912_v39 }
0x11b0   :  { %5464 = vmatprep.subr.bf16.mxu1 %v7889_v9 }
0x11b3   :  { %5465 = vmatpush3.bf16.msra.mxu1 %v5913_v32 }
0x11b4   :  { %5466 = vmatprep.subr.bf16.mxu1 %v7889_v9 }
0x11b7   :  { %5467 = vmatpush3.bf16.msra.mxu1 %v5914_v10 }
0x1235   :  { %v4514_v33 = vpop.xlane.xlu0 %4513 }
0x1236   :  { %v4517_v41 = vmul.f32 0.03125, %v4514_v33  ;;  %v5188_v33 = vld [vmem:[#allocation19 + $0x1] ss:$0 sm:$0xff] }
0x1237   :  { %v4516_v26 = vpop.xlane.xlu1 %4515 }
0x1238   :  { %v4519_v22 = vadd.f32 1e-06, %v4517_v41  ;;  %v4518_v21 = vmul.f32 0.03125, %v4516_v26  ;;  %v5197_v41 = vld [vmem:[#allocation21 + $0x1] ss:$0 sm:$0xff] }
0x123a   :  { %6019 = vrsqrt.f32 %v4519_v22  ;;  %v4520_v43 = vadd.f32 1e-06, %v4518_v21 }
0x123c   :  { %6021 = vrsqrt.f32 %v4520_v43 }
0x1244   :  { %v6020_v36 = vpop.eup %6019 }
0x1245   :  { %v4523_v46 = vmul.f32 %v6020_v36, %v7801_v45 }
0x1246   :  { %v6022_v61 = vpop.eup %6021 }
0x1247   :  { %v4524_v37 = vmul.f32 %v6022_v61, %v7804_v16  ;;  %v4531_v18 = vmul.f32 %v5168_v30, %v4523_v46 }
0x1249   :  { %v4532_v15 = vmul.f32 %v5168_v30, %v4524_v37 }
0x124b   :  { %v4533_v2 = vpack.c.bf16 %v4532_v15, %v4531_v18 }
0x124d   :  { %4677 = vmatmul.mubr.bf16.vlgmr.msra.gmra.mrb[68].mxu0 %v4533_v2 }
0x1320   :  { %v4678_v34 = vpop.f32.mrb[68].mxu0 }
0x1321   :  { %v4679_v17 = vadd.f32 %v4678_v34, %v4557_v42  ;;  %v4680_v31 = vpop.f32.mrb[69].mxu0 }
0x1322   :  { %v4682_v47 = vpop.f32.mrb[70].mxu0  ;;  %v4681_v11 = vadd.f32 %v4680_v31, %v4561_v53 }
0x1323   :  { %v5185_v57 = vmul.f32 -1.442695, %v4679_v17  ;;  %v4683_v55 = vadd.f32 %v4682_v47, %v4557_v42  ;;  %v4684_v63 = vpop.f32.mrb[71].mxu0 }
0x1324   :  { %v4685_v6 = vadd.f32 %v4684_v63, %v4561_v53 }
0x1325   :  { %6023 = vpow2.f32 %v5185_v57  ;;  %v5186_v4 = vmul.f32 -1.442695, %v4683_v55 }
0x1327   :  { %6025 = vpow2.f32 %v5186_v4 }
0x132f   :  { %v6024_v60 = vpop.eup %6023 }
0x1330   :  { %v4693_v48 = vadd.f32 1.0, %v6024_v60 }
0x1331   :  { %v6026_v7 = vpop.eup %6025 }
0x1332   :  { %6027 = vrcp.f32 %v4693_v48  ;;  %v4694_v1 = vadd.f32 1.0, %v6026_v7 }
0x1334   :  { %6029 = vrcp.f32 %v4694_v1 }
0x133c   :  { %v6028_v59 = vpop.eup %6027 }
0x133d   :  { %v4699_v35 = vmul.f32 %v6028_v59, %v4679_v17 }
0x133e   :  { %v6030_v51 = vpop.eup %6029 }
0x133f   :  { %v4701_v62 = vmul.f32 %v4699_v35, %v4681_v11  ;;  %v4700_v3 = vmul.f32 %v6030_v51, %v4683_v55 }
0x1341   :  { %v4702_v20 = vmul.f32 %v4700_v3, %v4685_v6  ;;  %v4705_v54 = vmul.f32 %v4701_v62, %v4701_v62 }
0x1343   :  { %4707 = vadd.xlane.f32.xlu0 %v4705_v54  ;;  %v4706_v24 = vmul.f32 %v4702_v20, %v4702_v20 }
0x1345   :  { %4709 = vadd.xlane.f32.xlu1 %v4706_v24 }
0x13d0   :  { %v4708_v13 = vpop.xlane.xlu0 %4707 }
0x13d1   :  { %v4711_v50 = vmul.f32 0.03125, %v4708_v13 }
0x13d2   :  { %v4710_v8 = vpop.xlane.xlu1 %4709 }
0x13d3   :  { %v4713_v29 = vadd.f32 1e-06, %v4711_v50  ;;  %v4712_v58 = vmul.f32 0.03125, %v4710_v8 }
0x13d5   :  { %6031 = vrsqrt.f32 %v4713_v29  ;;  %v4714_v14 = vadd.f32 1e-06, %v4712_v58 }
0x13d7   :  { %6033 = vrsqrt.f32 %v4714_v14 }
0x13df   :  { %v6032_v0 = vpop.eup %6031 }
0x13e0   :  { %v4717_v49 = vmul.f32 %v6032_v0, %v4701_v62 }
0x13e1   :  { %v6034_v25 = vpop.eup %6033 }
0x13e2   :  { %v4718_v23 = vmul.f32 %v6034_v25, %v4702_v20  ;;  %v4725_v12 = vmul.f32 %v5187_v27, %v4717_v49 }
0x13e4   :  { %v4726_v5 = vmul.f32 %v5187_v27, %v4718_v23 }
0x13e6   :  { %v4727_v56 = vpack.c.bf16 %v4726_v5, %v4725_v12 }
0x13e8   :  { %5469 = vmatmul.mubr.bf16.vlgmr.msra.gmra.mrb[68].mxu1 %v4727_v56 }
0x14bb   :  { %v4835_v9 = vpop.f32.mrb[68].mxu1 }
0x14bc   :  { %v4836_v26 = vadd.f32 %v5188_v33, %v4835_v9  ;;  %v5470_v22 = vpop.f32.mrb[69].mxu1 }
0x14bd   :  { %v4838_v21 = vpop.f32.mrb[70].mxu1 }
0x14be   :  { %v4850_v43 = vmul.f32 %v5197_v41, %v4836_v26  ;;  %v4839_v36 = vadd.f32 %v5188_v33, %v4838_v21  ;;  %v5471_v46 = vpop.f32.mrb[71].mxu1 }
0x14c0   :  { %v4852_v61 = vadd.f32 %v4850_v43, %v7801_v45  ;;  %v4851_v30 = vmul.f32 %v5197_v41, %v4839_v36 }
0x14c2   :  { %4854 = vst [vmem:[%s7846_s17] sm:$0xff] %v4852_v61  ;;  %v4853_v37 = vadd.f32 %v4851_v30, %v7804_v16 }
0x14c4   :  { %4855 = vst [vmem:[%s7846_s17 + $0x8] sm:$0xff] %v4853_v37 }
0x14c5   :  { %4860 = vsyncpa [#allocation3], 1 }
0x14c6   :  { %4861 = vsyncpa [#allocation5], 1 }
0x14c7   :  { %4862 = vsyncpa [#allocation8], 1 }
0x14c8   :  { %4863 = vsyncpa [#allocation11], 1 }
0x14c9   :  { %4864 = vsyncpa [#allocation14], 1 }
0x14ca   :  { %4865 = vsyncpa [#allocation17], 1 }
0x14cb   :  { %4866 = vsyncpa [#allocation20], 1 }

</bundles_post_ra>
